<compile_context>
chip_gen: v5e
topology: v5e:2x2
jax: 0.10.0
libtpu: 0.0.40
codegen_flags: <defaults>
</compile_context>

<pallas_src>
import functools

import jax
import jax.numpy as jnp
from jax.experimental import pallas as pl
from jax.experimental.pallas import tpu as pltpu


def _hardswish(x):
    # torch.nn.Hardswish: x * relu6(x + 3) / 6
    return x * jnp.clip(x + 3.0, 0.0, 6.0) * (1.0 / 6.0)


# ------------------------------ fused kernel ---------------------------------

def fused_ir_kernel(
    x_ref,        # (B, Cin, HW)   f32  input, NCHW-flat (also the residual)
    w_exp_ref,    # (Cin, Cexp)    bf16 expand weights (BN scale folded)
    cexp_ref,     # (K*K+3, Cexp)  f32  rows 0..K*K-1: depthwise taps (scale folded)
                  #                     row K*K: b_exp, K*K+1: b_dw, K*K+2: b_se2
    w_se1_ref,    # (Cexp, Csq)    f32
    b_se1_ref,    # (1, Csq)       f32
    w_se2_ref,    # (Csq, Cexp)    f32
    w_projT_ref,  # (Cout, Cexp)   bf16 projection weights, transposed (scale folded)
    b_proj_ref,   # (Cout, 1)      f32
    o_ref,        # (B, Cout, HW)  f32  lane-dense output (== NCHW-flat)
    pad_ref,      # VMEM scratch (H+K-1, W+K-1, Cexp) f32  padded expand output
    y2_ref,       # VMEM scratch (HW, Cexp) bf16           post-depthwise activation
    *, H, W, K, B,
):
    Cexp = w_exp_ref.shape[1]
    HW = H * W
    P = K // 2
    Hp, Wp = H + 2 * P, W + 2 * P
    KK = K * K

    SLAB = 8 if H % 8 == 0 else H      # H-slab for the depthwise accumulator
    n_slabs = H // SLAB
    SW = SLAB * W

    # ---- loop-invariant parameter loads (hoisted once per step) --------------
    cp = cexp_ref[...]                                        # (KK+3, Cexp)
    wdw_taps = [cp[t:t + 1, :].reshape(1, 1, Cexp) for t in range(KK)]
    b_exp = cp[KK:KK + 1, :]                                  # (1, Cexp)
    b_dw = cp[KK + 1:KK + 2, :].reshape(1, 1, Cexp)
    b_se2 = cp[KK + 2:KK + 3, :]                              # (1, Cexp)
    w_exp = w_exp_ref[...]
    w_se1 = w_se1_ref[...]
    b_se1 = b_se1_ref[...]
    w_se2 = w_se2_ref[...]
    w_projT_f32 = w_projT_ref[...].astype(jnp.float32)
    b_proj = b_proj_ref[...]

    # ---- zero ONLY the pad border (interior fully overwritten per image) -----
    zrow = jnp.zeros((P, Wp, Cexp), pad_ref.dtype)
    pad_ref[0:P, :, :] = zrow
    pad_ref[P + H:Hp, :, :] = zrow
    zcol = jnp.zeros((H, P, Cexp), pad_ref.dtype)
    pad_ref[P:P + H, 0:P, :] = zcol
    pad_ref[P:P + H, P + W:Wp, :] = zcol

    for b in range(B):
        # ---- 1x1 expand conv (BN scale folded) + bias + hardswish ------------
        xb = x_ref[b].astype(jnp.bfloat16)                    # (Cin, HW)
        y1 = jax.lax.dot_general(                             # (HW, Cexp) f32
            xb, w_exp,
            dimension_numbers=(((0,), (0,)), ((), ())),
            preferred_element_type=jnp.float32)
        y1 = _hardswish(y1 + b_exp)
        pad_ref[P:P + H, P:P + W, :] = y1.reshape(H, W, Cexp)

        # ---- KxK depthwise conv (stride 1) + bias + hardswish, in H-slabs ----
        def slab_body(s, pooled):
            r0 = pl.multiple_of(s * SLAB, SLAB)
            acc = pad_ref[pl.ds(r0, SLAB), pl.ds(0, W), :] * wdw_taps[0]
            for t in range(1, KK):
                dy, dx = t // K, t % K
                acc = acc + (pad_ref[pl.ds(r0 + dy, SLAB), pl.ds(dx, W), :]
                             * wdw_taps[t])
            y2s = _hardswish(acc + b_dw).reshape(SW, Cexp)    # (SW, Cexp) f32
            row0 = pl.multiple_of(s * SW, SW)
            y2_ref[pl.ds(row0, SW), :] = y2s.astype(y2_ref.dtype)
            return pooled + jnp.sum(y2s, axis=0, keepdims=True)

        pooled = jax.lax.fori_loop(
            0, n_slabs, slab_body, jnp.zeros((1, Cexp), jnp.float32)) * (1.0 / HW)

        # ---- Squeeze-Excite: avgpool -> FC -> ReLU -> FC -> sigmoid ----------
        hdn = jnp.maximum(
            jnp.dot(pooled, w_se1, preferred_element_type=jnp.float32) + b_se1,
            0.0)                                              # (1, Csq)
        gate = jax.nn.sigmoid(
            jnp.dot(hdn, w_se2, preferred_element_type=jnp.float32) + b_se2)

        # ---- 1x1 project conv: SE gate + BN scale folded into the weights ----
        wpg = (w_projT_f32 * gate).astype(jnp.bfloat16)       # (Cout, Cexp)
        y2 = y2_ref[...]                                      # (HW, Cexp) bf16
        out_t = jax.lax.dot_general(                          # (Cout, HW) f32
            wpg, y2,
            dimension_numbers=(((1,), (1,)), ((), ())),
            preferred_element_type=jnp.float32)
        # folded-BN bias + residual (use_res_connect, Cin == Cout), lane-dense
        o_ref[b] = out_t + b_proj + x_ref[b]


# --------------------------------- wrapper ------------------------------------

def _pick_block_b(n, cap=4):
    b = min(n, cap)
    while n % b:
        b -= 1
    return b


def inverted_residual(x_nchw, kp, *, K=3, block_b=None):
    N, Cin, H, W = x_nchw.shape
    Cexp = kp["w_exp"].shape[1]
    Csq = kp["w_se1"].shape[1]
    Cout = kp["w_projT"].shape[0]
    HW = H * W
    assert Cin == Cout, "use_res_connect requires input_channels == out_channels"
    if block_b is None:
        block_b = _pick_block_b(N)
    assert N % block_b == 0

    # Single input stream, no wrapper-side transpose: NCHW reshape is free.
    x_chw = x_nchw.astype(jnp.float32).reshape(N, Cin, HW)

    kernel = functools.partial(fused_ir_kernel, H=H, W=W, K=K, B=block_b)
    out_flat = pl.pallas_call(
        kernel,
        out_shape=jax.ShapeDtypeStruct((N, Cout, HW), jnp.float32),
        grid=(N // block_b,),
        in_specs=[
            pl.BlockSpec((block_b, Cin, HW), lambda n: (n, 0, 0)),   # x
            pl.BlockSpec((Cin, Cexp), lambda n: (0, 0)),             # w_exp
            pl.BlockSpec((K * K + 3, Cexp), lambda n: (0, 0)),       # packed Cexp params
            pl.BlockSpec((Cexp, Csq), lambda n: (0, 0)),             # w_se1
            pl.BlockSpec((1, Csq), lambda n: (0, 0)),                # b_se1
            pl.BlockSpec((Csq, Cexp), lambda n: (0, 0)),             # w_se2
            pl.BlockSpec((Cout, Cexp), lambda n: (0, 0)),            # w_projT
            pl.BlockSpec((Cout, 1), lambda n: (0, 0)),               # b_proj
        ],
        out_specs=pl.BlockSpec((block_b, Cout, HW), lambda n: (n, 0, 0)),
        scratch_shapes=[
            pltpu.VMEM((H + K - 1, W + K - 1, Cexp), jnp.float32),   # padded y1
            pltpu.VMEM((HW, Cexp), jnp.bfloat16),                    # y2
        ],
        compiler_params=pltpu.CompilerParams(
            dimension_semantics=("parallel",)),
    )(
        x_chw, kp["w_exp"], kp["cexp_pack"],
        kp["w_se1"], kp["b_se1"], kp["w_se2"],
        kp["w_projT"], kp["b_proj"],
    )
    # Output is already NCHW-flat (N, Cout, HW): pure reshape, no transpose.
    return out_flat.reshape(N, Cout, H, W)


# ------------------------------ parameter setup --------------------------------

def _folded_bn(key, c, eps=1e-3):
    kg, kb, km, kv = jax.random.split(key, 4)
    gamma = 1.0 + 0.1 * jax.random.normal(kg, (c,), jnp.float32)
    beta = 0.1 * jax.random.normal(kb, (c,), jnp.float32)
    mean = 0.1 * jax.random.normal(km, (c,), jnp.float32)
    var = jnp.abs(1.0 + 0.1 * jax.random.normal(kv, (c,), jnp.float32))
    scale = gamma * jax.lax.rsqrt(var + eps)
    bias = beta - mean * scale
    return scale, bias


def make_params(key, cin, cexp, csq, cout, k=3):
    """Raw module-style parameters (all f32) used by the pure-JAX reference."""
    ks = jax.random.split(key, 10)
    p = {}
    p["w_exp"] = 0.1 * jax.random.normal(ks[0], (cin, cexp), jnp.float32)
    s, b = _folded_bn(ks[1], cexp)
    p["s_exp"], p["b_exp"] = s.reshape(1, cexp), b.reshape(1, cexp)
    p["w_dw"] = 0.1 * jax.random.normal(ks[2], (k * k, cexp), jnp.float32)
    s, b = _folded_bn(ks[3], cexp)
    p["s_dw"], p["b_dw"] = s.reshape(1, cexp), b.reshape(1, cexp)
    p["w_se1"] = 0.1 * jax.random.normal(ks[4], (cexp, csq), jnp.float32)
    p["b_se1"] = 0.01 * jax.random.normal(ks[5], (1, csq), jnp.float32)
    p["w_se2"] = 0.1 * jax.random.normal(ks[6], (csq, cexp), jnp.float32)
    p["b_se2"] = 0.01 * jax.random.normal(ks[7], (1, cexp), jnp.float32)
    p["w_projT"] = 0.1 * jax.random.normal(ks[8], (cout, cexp), jnp.float32)
    s, b = _folded_bn(ks[9], cout)
    p["s_proj"], p["b_proj"] = s.reshape(cout, 1), b.reshape(cout, 1)
    return p


def pack_kernel_params(p):
    """Fold BN scales into the conv weights (f32 fold, then bf16 cast) and pack
    the per-Cexp vectors into one stream for the kernel."""
    kp = {}
    kp["w_exp"] = (p["w_exp"] * p["s_exp"]).astype(jnp.bfloat16)        # (Cin, Cexp)
    kp["cexp_pack"] = jnp.concatenate(
        [p["w_dw"] * p["s_dw"],                                         # (K*K, Cexp)
         p["b_exp"], p["b_dw"], p["b_se2"]], axis=0).astype(jnp.float32)
    kp["w_se1"], kp["b_se1"], kp["w_se2"] = p["w_se1"], p["b_se1"], p["w_se2"]
    kp["w_projT"] = (p["w_projT"] * p["s_proj"]).astype(jnp.bfloat16)   # (Cout, Cexp)
    kp["b_proj"] = p["b_proj"]                                          # (Cout, 1)
    return kp


# ------------------------------ pure-JAX reference -----------------------------

def inverted_residual_ref(x_nchw, p, *, K=3):
    N, Cin, H, W = x_nchw.shape
    x = jnp.transpose(x_nchw, (0, 2, 3, 1)).astype(jnp.float32)     # NHWC
    y1 = jnp.einsum("nhwc,ce->nhwe", x, p["w_exp"])
    y1 = _hardswish(y1 * p["s_exp"][0] + p["b_exp"][0])
    pd = K // 2
    yp = jnp.pad(y1, ((0, 0), (pd, pd), (pd, pd), (0, 0)))
    acc = jnp.zeros_like(y1)
    for dy in range(K):
        for dx in range(K):
            acc = acc + yp[:, dy:dy + H, dx:dx + W, :] * p["w_dw"][dy * K + dx]
    y2 = _hardswish(acc * p["s_dw"][0] + p["b_dw"][0])
    pooled = jnp.mean(y2, axis=(1, 2))                              # (N, Cexp)
    hdn = jax.nn.relu(pooled @ p["w_se1"] + p["b_se1"])
    gate = jax.nn.sigmoid(hdn @ p["w_se2"] + p["b_se2"])
    y2s = y2 * gate[:, None, None, :]
    out = jnp.einsum("nhwe,oe->nhwo", y2s, p["w_projT"])
    out = out * p["s_proj"][:, 0] + p["b_proj"][:, 0]
    return jnp.transpose(out, (0, 3, 1, 2)) + x_nchw


if __name__ == "__main__":
    N, Cin, H, W = 2, 16, 16, 16
    Cexp, Csq, Cout = 64, 16, 16

    key = jax.random.PRNGKey(0)
    kx, kw = jax.random.split(key)
    x_nchw = jax.random.normal(kx, (N, Cin, H, W), jnp.float32)
    raw = make_params(kw, Cin, Cexp, Csq, Cout)
    kparams = pack_kernel_params(raw)

    out = jax.block_until_ready(inverted_residual(x_nchw, kparams))
    assert out.shape == (N, Cout, H, W)

    ref = jax.block_until_ready(inverted_residual_ref(x_nchw, raw))
    err = float(jnp.max(jnp.abs(out - ref)))
    assert err < 2e-2, f"max abs error too large: {err}"
    print("KERNEL_OK")
</pallas_src>

<mosaic_0001>
module attributes {stable_mosaic.version = 11 : i64} {
  func.func @fused_ir_kernel(%arg0: i32, %arg1: memref<2x16x256xf32, #tpu.memory_space<vmem>>, %arg2: memref<16x64xbf16, #tpu.memory_space<vmem>>, %arg3: memref<12x64xf32, #tpu.memory_space<vmem>>, %arg4: memref<64x16xf32, #tpu.memory_space<vmem>>, %arg5: memref<1x16xf32, #tpu.memory_space<vmem>>, %arg6: memref<16x64xf32, #tpu.memory_space<vmem>>, %arg7: memref<16x64xbf16, #tpu.memory_space<vmem>>, %arg8: memref<16x1xf32, #tpu.memory_space<vmem>>, %arg9: memref<2x16x256xf32, #tpu.memory_space<vmem>>, %arg10: memref<18x18x64xf32, #tpu.memory_space<vmem>>, %arg11: memref<256x64xbf16, #tpu.memory_space<vmem>>) attributes {dimension_semantics = [#tpu.dimension_semantics<parallel>], iteration_bounds = array<i64: 1>, scalar_prefetch = 0 : i64, scratch_operands = 2 : i64, tpu.core_type = #tpu.core_type<tc>, window_params = [{transform_indices = @transform_0, window_bounds = array<i64: 2, 16, 256>}, {pipeline_mode = #tpu.pipeline_mode<synchronous>, transform_indices = @transform_1, window_bounds = array<i64: 16, 64>}, {pipeline_mode = #tpu.pipeline_mode<synchronous>, transform_indices = @transform_2, window_bounds = array<i64: 12, 64>}, {pipeline_mode = #tpu.pipeline_mode<synchronous>, transform_indices = @transform_3, window_bounds = array<i64: 64, 16>}, {pipeline_mode = #tpu.pipeline_mode<synchronous>, transform_indices = @transform_4, window_bounds = array<i64: 1, 16>}, {pipeline_mode = #tpu.pipeline_mode<synchronous>, transform_indices = @transform_5, window_bounds = array<i64: 16, 64>}, {pipeline_mode = #tpu.pipeline_mode<synchronous>, transform_indices = @transform_6, window_bounds = array<i64: 16, 64>}, {pipeline_mode = #tpu.pipeline_mode<synchronous>, transform_indices = @transform_7, window_bounds = array<i64: 16, 1>}, {transform_indices = @transform_8, window_bounds = array<i64: 2, 16, 256>}]} {
    %c0 = arith.constant 0 : index
    %c0_0 = arith.constant 0 : index
    %0 = vector.load %arg3[%c0, %c0_0] : memref<12x64xf32, #tpu.memory_space<vmem>>, vector<12x64xf32>
    %1 = vector.extract_strided_slice %0 {offsets = [0, 0], sizes = [1, 64], strides = [1, 1]} : vector<12x64xf32> to vector<1x64xf32>
    %2 = vector.shape_cast %1 : vector<1x64xf32> to vector<1x1x64xf32>
    %3 = vector.extract_strided_slice %0 {offsets = [1, 0], sizes = [1, 64], strides = [1, 1]} : vector<12x64xf32> to vector<1x64xf32>
    %4 = vector.shape_cast %3 : vector<1x64xf32> to vector<1x1x64xf32>
    %5 = vector.extract_strided_slice %0 {offsets = [2, 0], sizes = [1, 64], strides = [1, 1]} : vector<12x64xf32> to vector<1x64xf32>
    %6 = vector.shape_cast %5 : vector<1x64xf32> to vector<1x1x64xf32>
    %7 = vector.extract_strided_slice %0 {offsets = [3, 0], sizes = [1, 64], strides = [1, 1]} : vector<12x64xf32> to vector<1x64xf32>
    %8 = vector.shape_cast %7 : vector<1x64xf32> to vector<1x1x64xf32>
    %9 = vector.extract_strided_slice %0 {offsets = [4, 0], sizes = [1, 64], strides = [1, 1]} : vector<12x64xf32> to vector<1x64xf32>
    %10 = vector.shape_cast %9 : vector<1x64xf32> to vector<1x1x64xf32>
    %11 = vector.extract_strided_slice %0 {offsets = [5, 0], sizes = [1, 64], strides = [1, 1]} : vector<12x64xf32> to vector<1x64xf32>
    %12 = vector.shape_cast %11 : vector<1x64xf32> to vector<1x1x64xf32>
    %13 = vector.extract_strided_slice %0 {offsets = [6, 0], sizes = [1, 64], strides = [1, 1]} : vector<12x64xf32> to vector<1x64xf32>
    %14 = vector.shape_cast %13 : vector<1x64xf32> to vector<1x1x64xf32>
    %15 = vector.extract_strided_slice %0 {offsets = [7, 0], sizes = [1, 64], strides = [1, 1]} : vector<12x64xf32> to vector<1x64xf32>
    %16 = vector.shape_cast %15 : vector<1x64xf32> to vector<1x1x64xf32>
    %17 = vector.extract_strided_slice %0 {offsets = [8, 0], sizes = [1, 64], strides = [1, 1]} : vector<12x64xf32> to vector<1x64xf32>
    %18 = vector.shape_cast %17 : vector<1x64xf32> to vector<1x1x64xf32>
    %19 = vector.extract_strided_slice %0 {offsets = [9, 0], sizes = [1, 64], strides = [1, 1]} : vector<12x64xf32> to vector<1x64xf32>
    %20 = vector.extract_strided_slice %0 {offsets = [10, 0], sizes = [1, 64], strides = [1, 1]} : vector<12x64xf32> to vector<1x64xf32>
    %21 = vector.shape_cast %20 : vector<1x64xf32> to vector<1x1x64xf32>
    %22 = vector.extract_strided_slice %0 {offsets = [11, 0], sizes = [1, 64], strides = [1, 1]} : vector<12x64xf32> to vector<1x64xf32>
    %c0_1 = arith.constant 0 : index
    %c0_2 = arith.constant 0 : index
    %23 = vector.load %arg2[%c0_1, %c0_2] : memref<16x64xbf16, #tpu.memory_space<vmem>>, vector<16x64xbf16>
    %c0_3 = arith.constant 0 : index
    %c0_4 = arith.constant 0 : index
    %24 = vector.load %arg4[%c0_3, %c0_4] : memref<64x16xf32, #tpu.memory_space<vmem>>, vector<64x16xf32>
    %c0_5 = arith.constant 0 : index
    %c0_6 = arith.constant 0 : index
    %25 = vector.load %arg5[%c0_5, %c0_6] : memref<1x16xf32, #tpu.memory_space<vmem>>, vector<1x16xf32>
    %c0_7 = arith.constant 0 : index
    %c0_8 = arith.constant 0 : index
    %26 = vector.load %arg6[%c0_7, %c0_8] : memref<16x64xf32, #tpu.memory_space<vmem>>, vector<16x64xf32>
    %c0_9 = arith.constant 0 : index
    %c0_10 = arith.constant 0 : index
    %27 = vector.load %arg7[%c0_9, %c0_10] : memref<16x64xbf16, #tpu.memory_space<vmem>>, vector<16x64xbf16>
    %28 = arith.extf %27 : vector<16x64xbf16> to vector<16x64xf32>
    %c0_11 = arith.constant 0 : index
    %c0_12 = arith.constant 0 : index
    %29 = vector.load %arg8[%c0_11, %c0_12] : memref<16x1xf32, #tpu.memory_space<vmem>>, vector<16x1xf32>
    %cst = arith.constant 0.000000e+00 : f32
    %30 = vector.broadcast %cst : f32 to vector<1x18x64xf32>
    %c0_13 = arith.constant 0 : index
    %c0_14 = arith.constant 0 : index
    %c0_15 = arith.constant 0 : index
    %31 = vector.load %arg10[%c0_13, %c0_14, %c0_15] : memref<18x18x64xf32, #tpu.memory_space<vmem>>, vector<1x18x64xf32>
    tpu.vector_store %arg10[%c0_13, %c0_14, %c0_15], %30 {strides = array<i32>} : memref<18x18x64xf32, #tpu.memory_space<vmem>>, vector<1x18x64xf32>,
    %c17 = arith.constant 17 : index
    %c0_16 = arith.constant 0 : index
    %c0_17 = arith.constant 0 : index
    %32 = vector.load %arg10[%c17, %c0_16, %c0_17] : memref<18x18x64xf32, #tpu.memory_space<vmem>>, vector<1x18x64xf32>
    tpu.vector_store %arg10[%c17, %c0_16, %c0_17], %30 {strides = array<i32>} : memref<18x18x64xf32, #tpu.memory_space<vmem>>, vector<1x18x64xf32>,
    %cst_18 = arith.constant 0.000000e+00 : f32
    %33 = vector.broadcast %cst_18 : f32 to vector<16x1x64xf32>
    %c1 = arith.constant 1 : index
    %c0_19 = arith.constant 0 : index
    %c0_20 = arith.constant 0 : index
    %34 = vector.load %arg10[%c1, %c0_19, %c0_20] : memref<18x18x64xf32, #tpu.memory_space<vmem>>, vector<16x1x64xf32>
    tpu.vector_store %arg10[%c1, %c0_19, %c0_20], %33 {strides = array<i32>} : memref<18x18x64xf32, #tpu.memory_space<vmem>>, vector<16x1x64xf32>,
    %c1_21 = arith.constant 1 : index
    %c17_22 = arith.constant 17 : index
    %c0_23 = arith.constant 0 : index
    %35 = vector.load %arg10[%c1_21, %c17_22, %c0_23] : memref<18x18x64xf32, #tpu.memory_space<vmem>>, vector<16x1x64xf32>
    tpu.vector_store %arg10[%c1_21, %c17_22, %c0_23], %33 {strides = array<i32>} : memref<18x18x64xf32, #tpu.memory_space<vmem>>, vector<16x1x64xf32>,
    %c0_24 = arith.constant 0 : index
    %c0_25 = arith.constant 0 : index
    %c0_26 = arith.constant 0 : index
    %36 = vector.load %arg1[%c0_24, %c0_25, %c0_26] : memref<2x16x256xf32, #tpu.memory_space<vmem>>, vector<1x16x256xf32>
    %37 = vector.shape_cast %36 : vector<1x16x256xf32> to vector<16x256xf32>
    %38 = arith.truncf %37 : vector<16x256xf32> to vector<16x256xbf16>
    %cst_27 = arith.constant dense<0.000000e+00> : vector<256x64xf32>
    %39 = tpu.matmul %38, %23, %cst_27 {dimension_numbers = #tpu.dot_dimension_numbers<[0], [0], [1], [1], [0, 1, 1, 1], [], []>} : vector<16x256xbf16>, vector<16x64xbf16>, vector<256x64xf32> -> vector<256x64xf32>
    %40 = vector.broadcast %19 : vector<1x64xf32> to vector<256x64xf32>
    %41 = arith.addf %39, %40 : vector<256x64xf32>
    %cst_28 = arith.constant 3.000000e+00 : f32
    %42 = vector.broadcast %cst_28 : f32 to vector<256x64xf32>
    %43 = arith.addf %41, %42 : vector<256x64xf32>
    %cst_29 = arith.constant 0.000000e+00 : f32
    %cst_30 = arith.constant 6.000000e+00 : f32
    %44 = vector.broadcast %cst_29 : f32 to vector<256x64xf32>
    %45 = arith.maximumf %44, %43 : vector<256x64xf32>
    %46 = vector.broadcast %cst_30 : f32 to vector<256x64xf32>
    %47 = arith.minimumf %46, %45 : vector<256x64xf32>
    %48 = arith.mulf %41, %47 : vector<256x64xf32>
    %cst_31 = arith.constant 0.166666672 : f32
    %49 = vector.broadcast %cst_31 : f32 to vector<256x64xf32>
    %50 = arith.mulf %48, %49 : vector<256x64xf32>
    %51 = vector.shape_cast %50 : vector<256x64xf32> to vector<16x16x64xf32>
    %c1_32 = arith.constant 1 : index
    %c1_33 = arith.constant 1 : index
    %c0_34 = arith.constant 0 : index
    %52 = vector.load %arg10[%c1_32, %c1_33, %c0_34] : memref<18x18x64xf32, #tpu.memory_space<vmem>>, vector<16x16x64xf32>
    tpu.vector_store %arg10[%c1_32, %c1_33, %c0_34], %51 {strides = array<i32>} : memref<18x18x64xf32, #tpu.memory_space<vmem>>, vector<16x16x64xf32>,
    %cst_35 = arith.constant 0.000000e+00 : f32
    %53 = vector.broadcast %cst_35 : f32 to vector<1x64xf32>
    %c0_i32 = arith.constant 0 : i32
    %c2_i32 = arith.constant 2 : i32
    %54 = arith.addi %c0_i32, %c2_i32 : i32
    %c1_i32 = arith.constant 1 : i32
    %55 = scf.for %arg12 = %c0_i32 to %54 step %c1_i32 iter_args(%arg13 = %53) -> (vector<1x64xf32>)  : i32 {
      %c8_i32 = arith.constant 8 : i32
      %128 = arith.muli %arg12, %c8_i32 : i32
      %129 = tpu.assume_multiple %128, 8 : i32
      %130 = arith.index_cast %129 : i32 to index
      %c0_81 = arith.constant 0 : index
      %c0_82 = arith.constant 0 : index
      %131 = vector.load %arg10[%130, %c0_81, %c0_82] : memref<18x18x64xf32, #tpu.memory_space<vmem>>, vector<8x16x64xf32>
      %132 = vector.broadcast %2 : vector<1x1x64xf32> to vector<8x16x64xf32>
      %133 = arith.mulf %131, %132 : vector<8x16x64xf32>
      %c0_i32_83 = arith.constant 0 : i32
      %134 = arith.addi %129, %c0_i32_83 : i32
      %135 = arith.index_cast %134 : i32 to index
      %c1_84 = arith.constant 1 : index
      %c0_85 = arith.constant 0 : index
      %136 = vector.load %arg10[%135, %c1_84, %c0_85] : memref<18x18x64xf32, #tpu.memory_space<vmem>>, vector<8x16x64xf32>
      %137 = vector.broadcast %4 : vector<1x1x64xf32> to vector<8x16x64xf32>
      %138 = arith.mulf %136, %137 : vector<8x16x64xf32>
      %139 = arith.addf %133, %138 : vector<8x16x64xf32>
      %c0_i32_86 = arith.constant 0 : i32
      %140 = arith.addi %129, %c0_i32_86 : i32
      %141 = arith.index_cast %140 : i32 to index
      %c2 = arith.constant 2 : index
      %c0_87 = arith.constant 0 : index
      %142 = vector.load %arg10[%141, %c2, %c0_87] : memref<18x18x64xf32, #tpu.memory_space<vmem>>, vector<8x16x64xf32>
      %143 = vector.broadcast %6 : vector<1x1x64xf32> to vector<8x16x64xf32>
      %144 = arith.mulf %142, %143 : vector<8x16x64xf32>
      %145 = arith.addf %139, %144 : vector<8x16x64xf32>
      %c1_i32_88 = arith.constant 1 : i32
      %146 = arith.addi %129, %c1_i32_88 : i32
      %147 = arith.index_cast %146 : i32 to index
      %c0_89 = arith.constant 0 : index
      %c0_90 = arith.constant 0 : index
      %148 = vector.load %arg10[%147, %c0_89, %c0_90] : memref<18x18x64xf32, #tpu.memory_space<vmem>>, vector<8x16x64xf32>
      %149 = vector.broadcast %8 : vector<1x1x64xf32> to vector<8x16x64xf32>
      %150 = arith.mulf %148, %149 : vector<8x16x64xf32>
      %151 = arith.addf %145, %150 : vector<8x16x64xf32>
      %c1_i32_91 = arith.constant 1 : i32
      %152 = arith.addi %129, %c1_i32_91 : i32
      %153 = arith.index_cast %152 : i32 to index
      %c1_92 = arith.constant 1 : index
      %c0_93 = arith.constant 0 : index
      %154 = vector.load %arg10[%153, %c1_92, %c0_93] : memref<18x18x64xf32, #tpu.memory_space<vmem>>, vector<8x16x64xf32>
      %155 = vector.broadcast %10 : vector<1x1x64xf32> to vector<8x16x64xf32>
      %156 = arith.mulf %154, %155 : vector<8x16x64xf32>
      %157 = arith.addf %151, %156 : vector<8x16x64xf32>
      %c1_i32_94 = arith.constant 1 : i32
      %158 = arith.addi %129, %c1_i32_94 : i32
      %159 = arith.index_cast %158 : i32 to index
      %c2_95 = arith.constant 2 : index
      %c0_96 = arith.constant 0 : index
      %160 = vector.load %arg10[%159, %c2_95, %c0_96] : memref<18x18x64xf32, #tpu.memory_space<vmem>>, vector<8x16x64xf32>
      %161 = vector.broadcast %12 : vector<1x1x64xf32> to vector<8x16x64xf32>
      %162 = arith.mulf %160, %161 : vector<8x16x64xf32>
      %163 = arith.addf %157, %162 : vector<8x16x64xf32>
      %c2_i32_97 = arith.constant 2 : i32
      %164 = arith.addi %129, %c2_i32_97 : i32
      %165 = arith.index_cast %164 : i32 to index
      %c0_98 = arith.constant 0 : index
      %c0_99 = arith.constant 0 : index
      %166 = vector.load %arg10[%165, %c0_98, %c0_99] : memref<18x18x64xf32, #tpu.memory_space<vmem>>, vector<8x16x64xf32>
      %167 = vector.broadcast %14 : vector<1x1x64xf32> to vector<8x16x64xf32>
      %168 = arith.mulf %166, %167 : vector<8x16x64xf32>
      %169 = arith.addf %163, %168 : vector<8x16x64xf32>
      %c2_i32_100 = arith.constant 2 : i32
      %170 = arith.addi %129, %c2_i32_100 : i32
      %171 = arith.index_cast %170 : i32 to index
      %c1_101 = arith.constant 1 : index
      %c0_102 = arith.constant 0 : index
      %172 = vector.load %arg10[%171, %c1_101, %c0_102] : memref<18x18x64xf32, #tpu.memory_space<vmem>>, vector<8x16x64xf32>
      %173 = vector.broadcast %16 : vector<1x1x64xf32> to vector<8x16x64xf32>
      %174 = arith.mulf %172, %173 : vector<8x16x64xf32>
      %175 = arith.addf %169, %174 : vector<8x16x64xf32>
      %c2_i32_103 = arith.constant 2 : i32
      %176 = arith.addi %129, %c2_i32_103 : i32
      %177 = arith.index_cast %176 : i32 to index
      %c2_104 = arith.constant 2 : index
      %c0_105 = arith.constant 0 : index
      %178 = vector.load %arg10[%177, %c2_104, %c0_105] : memref<18x18x64xf32, #tpu.memory_space<vmem>>, vector<8x16x64xf32>
      %179 = vector.broadcast %18 : vector<1x1x64xf32> to vector<8x16x64xf32>
      %180 = arith.mulf %178, %179 : vector<8x16x64xf32>
      %181 = arith.addf %175, %180 : vector<8x16x64xf32>
      %182 = vector.broadcast %21 : vector<1x1x64xf32> to vector<8x16x64xf32>
      %183 = arith.addf %181, %182 : vector<8x16x64xf32>
      %cst_106 = arith.constant 3.000000e+00 : f32
      %184 = vector.broadcast %cst_106 : f32 to vector<8x16x64xf32>
      %185 = arith.addf %183, %184 : vector<8x16x64xf32>
      %cst_107 = arith.constant 0.000000e+00 : f32
      %cst_108 = arith.constant 6.000000e+00 : f32
      %186 = vector.broadcast %cst_107 : f32 to vector<8x16x64xf32>
      %187 = arith.maximumf %186, %185 : vector<8x16x64xf32>
      %188 = vector.broadcast %cst_108 : f32 to vector<8x16x64xf32>
      %189 = arith.minimumf %188, %187 : vector<8x16x64xf32>
      %190 = arith.mulf %183, %189 : vector<8x16x64xf32>
      %cst_109 = arith.constant 0.166666672 : f32
      %191 = vector.broadcast %cst_109 : f32 to vector<8x16x64xf32>
      %192 = arith.mulf %190, %191 : vector<8x16x64xf32>
      %193 = vector.shape_cast %192 : vector<8x16x64xf32> to vector<128x64xf32>
      %c128_i32 = arith.constant 128 : i32
      %194 = arith.muli %arg12, %c128_i32 : i32
      %195 = tpu.assume_multiple %194, 128 : i32
      %196 = arith.truncf %193 : vector<128x64xf32> to vector<128x64xbf16>
      %197 = arith.index_cast %195 : i32 to index
      %c0_110 = arith.constant 0 : index
      %198 = vector.load %arg11[%197, %c0_110] : memref<256x64xbf16, #tpu.memory_space<vmem>>, vector<128x64xbf16>
      tpu.vector_store %arg11[%197, %c0_110], %196 {strides = array<i32>} : memref<256x64xbf16, #tpu.memory_space<vmem>>, vector<128x64xbf16>,
      %cst_111 = arith.constant dense<0.000000e+00> : vector<64xf32>
      %199 = vector.multi_reduction <add>, %193, %cst_111 [0] : vector<128x64xf32> to vector<64xf32>
      %200 = vector.shape_cast %199 : vector<64xf32> to vector<1x64xf32>
      %201 = arith.addf %arg13, %200 : vector<1x64xf32>
      scf.yield %201 : vector<1x64xf32>
    }
    %c2_i32_36 = arith.constant 2 : i32
    %cst_37 = arith.constant 3.906250e-03 : f32
    %56 = vector.broadcast %cst_37 : f32 to vector<1x64xf32>
    %57 = arith.mulf %55, %56 : vector<1x64xf32>
    %cst_38 = arith.constant dense<0.000000e+00> : vector<1x16xf32>
    %58 = tpu.matmul %57, %24, %cst_38 {dimension_numbers = #tpu.dot_dimension_numbers<[1], [0], [0], [1], [0, 0, 1, 1], [], []>} : vector<1x64xf32>, vector<64x16xf32>, vector<1x16xf32> -> vector<1x16xf32>
    %59 = arith.addf %58, %25 : vector<1x16xf32>
    %cst_39 = arith.constant 0.000000e+00 : f32
    %60 = vector.broadcast %cst_39 : f32 to vector<1x16xf32>
    %61 = arith.maximumf %59, %60 : vector<1x16xf32>
    %cst_40 = arith.constant dense<0.000000e+00> : vector<1x64xf32>
    %62 = tpu.matmul %61, %26, %cst_40 {dimension_numbers = #tpu.dot_dimension_numbers<[1], [0], [0], [1], [0, 0, 1, 1], [], []>} : vector<1x16xf32>, vector<16x64xf32>, vector<1x64xf32> -> vector<1x64xf32>
    %63 = arith.addf %62, %22 : vector<1x64xf32>
    %64 = arith.negf %63 : vector<1x64xf32>
    %65 = math.exp %64 : vector<1x64xf32>
    %cst_41 = arith.constant 1.000000e+00 : f32
    %66 = vector.broadcast %cst_41 : f32 to vector<1x64xf32>
    %67 = arith.addf %66, %65 : vector<1x64xf32>
    %68 = arith.divf %66, %67 : vector<1x64xf32>
    %69 = vector.broadcast %68 : vector<1x64xf32> to vector<16x64xf32>
    %70 = arith.mulf %28, %69 : vector<16x64xf32>
    %71 = arith.truncf %70 : vector<16x64xf32> to vector<16x64xbf16>
    %c0_42 = arith.constant 0 : index
    %c0_43 = arith.constant 0 : index
    %72 = vector.load %arg11[%c0_42, %c0_43] : memref<256x64xbf16, #tpu.memory_space<vmem>>, vector<256x64xbf16>
    %cst_44 = arith.constant dense<0.000000e+00> : vector<16x256xf32>
    %73 = tpu.matmul %71, %72, %cst_44 {dimension_numbers = #tpu.dot_dimension_numbers<[1], [1], [0], [0], [0, 0, 1, 0], [], []>} : vector<16x64xbf16>, vector<256x64xbf16>, vector<16x256xf32> -> vector<16x256xf32>
    %74 = vector.broadcast %29 : vector<16x1xf32> to vector<16x256xf32>
    %75 = arith.addf %73, %74 : vector<16x256xf32>
    %c0_45 = arith.constant 0 : index
    %c0_46 = arith.constant 0 : index
    %c0_47 = arith.constant 0 : index
    %76 = vector.load %arg1[%c0_45, %c0_46, %c0_47] : memref<2x16x256xf32, #tpu.memory_space<vmem>>, vector<1x16x256xf32>
    %77 = vector.shape_cast %76 : vector<1x16x256xf32> to vector<16x256xf32>
    %78 = arith.addf %75, %77 : vector<16x256xf32>
    %c0_48 = arith.constant 0 : index
    %c0_49 = arith.constant 0 : index
    %c0_50 = arith.constant 0 : index
    %79 = vector.load %arg9[%c0_48, %c0_49, %c0_50] : memref<2x16x256xf32, #tpu.memory_space<vmem>>, vector<1x16x256xf32>
    %80 = vector.shape_cast %79 : vector<1x16x256xf32> to vector<16x256xf32>
    %81 = vector.shape_cast %78 : vector<16x256xf32> to vector<1x16x256xf32>
    tpu.vector_store %arg9[%c0_48, %c0_49, %c0_50], %81 {strides = array<i32>} : memref<2x16x256xf32, #tpu.memory_space<vmem>>, vector<1x16x256xf32>,
    %c1_51 = arith.constant 1 : index
    %c0_52 = arith.constant 0 : index
    %c0_53 = arith.constant 0 : index
    %82 = vector.load %arg1[%c1_51, %c0_52, %c0_53] : memref<2x16x256xf32, #tpu.memory_space<vmem>>, vector<1x16x256xf32>
    %83 = vector.shape_cast %82 : vector<1x16x256xf32> to vector<16x256xf32>
    %84 = arith.truncf %83 : vector<16x256xf32> to vector<16x256xbf16>
    %cst_54 = arith.constant dense<0.000000e+00> : vector<256x64xf32>
    %85 = tpu.matmul %84, %23, %cst_54 {dimension_numbers = #tpu.dot_dimension_numbers<[0], [0], [1], [1], [0, 1, 1, 1], [], []>} : vector<16x256xbf16>, vector<16x64xbf16>, vector<256x64xf32> -> vector<256x64xf32>
    %86 = vector.broadcast %19 : vector<1x64xf32> to vector<256x64xf32>
    %87 = arith.addf %85, %86 : vector<256x64xf32>
    %cst_55 = arith.constant 3.000000e+00 : f32
    %88 = vector.broadcast %cst_55 : f32 to vector<256x64xf32>
    %89 = arith.addf %87, %88 : vector<256x64xf32>
    %cst_56 = arith.constant 0.000000e+00 : f32
    %cst_57 = arith.constant 6.000000e+00 : f32
    %90 = vector.broadcast %cst_56 : f32 to vector<256x64xf32>
    %91 = arith.maximumf %90, %89 : vector<256x64xf32>
    %92 = vector.broadcast %cst_57 : f32 to vector<256x64xf32>
    %93 = arith.minimumf %92, %91 : vector<256x64xf32>
    %94 = arith.mulf %87, %93 : vector<256x64xf32>
    %cst_58 = arith.constant 0.166666672 : f32
    %95 = vector.broadcast %cst_58 : f32 to vector<256x64xf32>
    %96 = arith.mulf %94, %95 : vector<256x64xf32>
    %97 = vector.shape_cast %96 : vector<256x64xf32> to vector<16x16x64xf32>
    %c1_59 = arith.constant 1 : index
    %c1_60 = arith.constant 1 : index
    %c0_61 = arith.constant 0 : index
    %98 = vector.load %arg10[%c1_59, %c1_60, %c0_61] : memref<18x18x64xf32, #tpu.memory_space<vmem>>, vector<16x16x64xf32>
    tpu.vector_store %arg10[%c1_59, %c1_60, %c0_61], %97 {strides = array<i32>} : memref<18x18x64xf32, #tpu.memory_space<vmem>>, vector<16x16x64xf32>,
    %cst_62 = arith.constant 0.000000e+00 : f32
    %99 = vector.broadcast %cst_62 : f32 to vector<1x64xf32>
    %c0_i32_63 = arith.constant 0 : i32
    %c2_i32_64 = arith.constant 2 : i32
    %100 = arith.addi %c0_i32_63, %c2_i32_64 : i32
    %c1_i32_65 = arith.constant 1 : i32
    %101 = scf.for %arg12 = %c0_i32_63 to %100 step %c1_i32_65 iter_args(%arg13 = %99) -> (vector<1x64xf32>)  : i32 {
      %c8_i32 = arith.constant 8 : i32
      %128 = arith.muli %arg12, %c8_i32 : i32
      %129 = tpu.assume_multiple %128, 8 : i32
      %130 = arith.index_cast %129 : i32 to index
      %c0_81 = arith.constant 0 : index
      %c0_82 = arith.constant 0 : index
      %131 = vector.load %arg10[%130, %c0_81, %c0_82] : memref<18x18x64xf32, #tpu.memory_space<vmem>>, vector<8x16x64xf32>
      %132 = vector.broadcast %2 : vector<1x1x64xf32> to vector<8x16x64xf32>
      %133 = arith.mulf %131, %132 : vector<8x16x64xf32>
      %c0_i32_83 = arith.constant 0 : i32
      %134 = arith.addi %129, %c0_i32_83 : i32
      %135 = arith.index_cast %134 : i32 to index
      %c1_84 = arith.constant 1 : index
      %c0_85 = arith.constant 0 : index
      %136 = vector.load %arg10[%135, %c1_84, %c0_85] : memref<18x18x64xf32, #tpu.memory_space<vmem>>, vector<8x16x64xf32>
      %137 = vector.broadcast %4 : vector<1x1x64xf32> to vector<8x16x64xf32>
      %138 = arith.mulf %136, %137 : vector<8x16x64xf32>
      %139 = arith.addf %133, %138 : vector<8x16x64xf32>
      %c0_i32_86 = arith.constant 0 : i32
      %140 = arith.addi %129, %c0_i32_86 : i32
      %141 = arith.index_cast %140 : i32 to index
      %c2 = arith.constant 2 : index
      %c0_87 = arith.constant 0 : index
      %142 = vector.load %arg10[%141, %c2, %c0_87] : memref<18x18x64xf32, #tpu.memory_space<vmem>>, vector<8x16x64xf32>
      %143 = vector.broadcast %6 : vector<1x1x64xf32> to vector<8x16x64xf32>
      %144 = arith.mulf %142, %143 : vector<8x16x64xf32>
      %145 = arith.addf %139, %144 : vector<8x16x64xf32>
      %c1_i32_88 = arith.constant 1 : i32
      %146 = arith.addi %129, %c1_i32_88 : i32
      %147 = arith.index_cast %146 : i32 to index
      %c0_89 = arith.constant 0 : index
      %c0_90 = arith.constant 0 : index
      %148 = vector.load %arg10[%147, %c0_89, %c0_90] : memref<18x18x64xf32, #tpu.memory_space<vmem>>, vector<8x16x64xf32>
      %149 = vector.broadcast %8 : vector<1x1x64xf32> to vector<8x16x64xf32>
      %150 = arith.mulf %148, %149 : vector<8x16x64xf32>
      %151 = arith.addf %145, %150 : vector<8x16x64xf32>
      %c1_i32_91 = arith.constant 1 : i32
      %152 = arith.addi %129, %c1_i32_91 : i32
      %153 = arith.index_cast %152 : i32 to index
      %c1_92 = arith.constant 1 : index
      %c0_93 = arith.constant 0 : index
      %154 = vector.load %arg10[%153, %c1_92, %c0_93] : memref<18x18x64xf32, #tpu.memory_space<vmem>>, vector<8x16x64xf32>
      %155 = vector.broadcast %10 : vector<1x1x64xf32> to vector<8x16x64xf32>
      %156 = arith.mulf %154, %155 : vector<8x16x64xf32>
      %157 = arith.addf %151, %156 : vector<8x16x64xf32>
      %c1_i32_94 = arith.constant 1 : i32
      %158 = arith.addi %129, %c1_i32_94 : i32
      %159 = arith.index_cast %158 : i32 to index
      %c2_95 = arith.constant 2 : index
      %c0_96 = arith.constant 0 : index
      %160 = vector.load %arg10[%159, %c2_95, %c0_96] : memref<18x18x64xf32, #tpu.memory_space<vmem>>, vector<8x16x64xf32>
      %161 = vector.broadcast %12 : vector<1x1x64xf32> to vector<8x16x64xf32>
      %162 = arith.mulf %160, %161 : vector<8x16x64xf32>
      %163 = arith.addf %157, %162 : vector<8x16x64xf32>
      %c2_i32_97 = arith.constant 2 : i32
      %164 = arith.addi %129, %c2_i32_97 : i32
      %165 = arith.index_cast %164 : i32 to index
      %c0_98 = arith.constant 0 : index
      %c0_99 = arith.constant 0 : index
      %166 = vector.load %arg10[%165, %c0_98, %c0_99] : memref<18x18x64xf32, #tpu.memory_space<vmem>>, vector<8x16x64xf32>
      %167 = vector.broadcast %14 : vector<1x1x64xf32> to vector<8x16x64xf32>
      %168 = arith.mulf %166, %167 : vector<8x16x64xf32>
      %169 = arith.addf %163, %168 : vector<8x16x64xf32>
      %c2_i32_100 = arith.constant 2 : i32
      %170 = arith.addi %129, %c2_i32_100 : i32
      %171 = arith.index_cast %170 : i32 to index
      %c1_101 = arith.constant 1 : index
      %c0_102 = arith.constant 0 : index
      %172 = vector.load %arg10[%171, %c1_101, %c0_102] : memref<18x18x64xf32, #tpu.memory_space<vmem>>, vector<8x16x64xf32>
      %173 = vector.broadcast %16 : vector<1x1x64xf32> to vector<8x16x64xf32>
      %174 = arith.mulf %172, %173 : vector<8x16x64xf32>
      %175 = arith.addf %169, %174 : vector<8x16x64xf32>
      %c2_i32_103 = arith.constant 2 : i32
      %176 = arith.addi %129, %c2_i32_103 : i32
      %177 = arith.index_cast %176 : i32 to index
      %c2_104 = arith.constant 2 : index
      %c0_105 = arith.constant 0 : index
      %178 = vector.load %arg10[%177, %c2_104, %c0_105] : memref<18x18x64xf32, #tpu.memory_space<vmem>>, vector<8x16x64xf32>
      %179 = vector.broadcast %18 : vector<1x1x64xf32> to vector<8x16x64xf32>
      %180 = arith.mulf %178, %179 : vector<8x16x64xf32>
      %181 = arith.addf %175, %180 : vector<8x16x64xf32>
      %182 = vector.broadcast %21 : vector<1x1x64xf32> to vector<8x16x64xf32>
      %183 = arith.addf %181, %182 : vector<8x16x64xf32>
      %cst_106 = arith.constant 3.000000e+00 : f32
      %184 = vector.broadcast %cst_106 : f32 to vector<8x16x64xf32>
      %185 = arith.addf %183, %184 : vector<8x16x64xf32>
      %cst_107 = arith.constant 0.000000e+00 : f32
      %cst_108 = arith.constant 6.000000e+00 : f32
      %186 = vector.broadcast %cst_107 : f32 to vector<8x16x64xf32>
      %187 = arith.maximumf %186, %185 : vector<8x16x64xf32>
      %188 = vector.broadcast %cst_108 : f32 to vector<8x16x64xf32>
      %189 = arith.minimumf %188, %187 : vector<8x16x64xf32>
      %190 = arith.mulf %183, %189 : vector<8x16x64xf32>
      %cst_109 = arith.constant 0.166666672 : f32
      %191 = vector.broadcast %cst_109 : f32 to vector<8x16x64xf32>
      %192 = arith.mulf %190, %191 : vector<8x16x64xf32>
      %193 = vector.shape_cast %192 : vector<8x16x64xf32> to vector<128x64xf32>
      %c128_i32 = arith.constant 128 : i32
      %194 = arith.muli %arg12, %c128_i32 : i32
      %195 = tpu.assume_multiple %194, 128 : i32
      %196 = arith.truncf %193 : vector<128x64xf32> to vector<128x64xbf16>
      %197 = arith.index_cast %195 : i32 to index
      %c0_110 = arith.constant 0 : index
      %198 = vector.load %arg11[%197, %c0_110] : memref<256x64xbf16, #tpu.memory_space<vmem>>, vector<128x64xbf16>
      tpu.vector_store %arg11[%197, %c0_110], %196 {strides = array<i32>} : memref<256x64xbf16, #tpu.memory_space<vmem>>, vector<128x64xbf16>,
      %cst_111 = arith.constant dense<0.000000e+00> : vector<64xf32>
      %199 = vector.multi_reduction <add>, %193, %cst_111 [0] : vector<128x64xf32> to vector<64xf32>
      %200 = vector.shape_cast %199 : vector<64xf32> to vector<1x64xf32>
      %201 = arith.addf %arg13, %200 : vector<1x64xf32>
      scf.yield %201 : vector<1x64xf32>
    }
    %c2_i32_66 = arith.constant 2 : i32
    %cst_67 = arith.constant 3.906250e-03 : f32
    %102 = vector.broadcast %cst_67 : f32 to vector<1x64xf32>
    %103 = arith.mulf %101, %102 : vector<1x64xf32>
    %cst_68 = arith.constant dense<0.000000e+00> : vector<1x16xf32>
    %104 = tpu.matmul %103, %24, %cst_68 {dimension_numbers = #tpu.dot_dimension_numbers<[1], [0], [0], [1], [0, 0, 1, 1], [], []>} : vector<1x64xf32>, vector<64x16xf32>, vector<1x16xf32> -> vector<1x16xf32>
    %105 = arith.addf %104, %25 : vector<1x16xf32>
    %cst_69 = arith.constant 0.000000e+00 : f32
    %106 = vector.broadcast %cst_69 : f32 to vector<1x16xf32>
    %107 = arith.maximumf %105, %106 : vector<1x16xf32>
    %cst_70 = arith.constant dense<0.000000e+00> : vector<1x64xf32>
    %108 = tpu.matmul %107, %26, %cst_70 {dimension_numbers = #tpu.dot_dimension_numbers<[1], [0], [0], [1], [0, 0, 1, 1], [], []>} : vector<1x16xf32>, vector<16x64xf32>, vector<1x64xf32> -> vector<1x64xf32>
    %109 = arith.addf %108, %22 : vector<1x64xf32>
    %110 = arith.negf %109 : vector<1x64xf32>
    %111 = math.exp %110 : vector<1x64xf32>
    %cst_71 = arith.constant 1.000000e+00 : f32
    %112 = vector.broadcast %cst_71 : f32 to vector<1x64xf32>
    %113 = arith.addf %112, %111 : vector<1x64xf32>
    %114 = arith.divf %112, %113 : vector<1x64xf32>
    %115 = vector.broadcast %114 : vector<1x64xf32> to vector<16x64xf32>
    %116 = arith.mulf %28, %115 : vector<16x64xf32>
    %117 = arith.truncf %116 : vector<16x64xf32> to vector<16x64xbf16>
    %c0_72 = arith.constant 0 : index
    %c0_73 = arith.constant 0 : index
    %118 = vector.load %arg11[%c0_72, %c0_73] : memref<256x64xbf16, #tpu.memory_space<vmem>>, vector<256x64xbf16>
    %cst_74 = arith.constant dense<0.000000e+00> : vector<16x256xf32>
    %119 = tpu.matmul %117, %118, %cst_74 {dimension_numbers = #tpu.dot_dimension_numbers<[1], [1], [0], [0], [0, 0, 1, 0], [], []>} : vector<16x64xbf16>, vector<256x64xbf16>, vector<16x256xf32> -> vector<16x256xf32>
    %120 = vector.broadcast %29 : vector<16x1xf32> to vector<16x256xf32>
    %121 = arith.addf %119, %120 : vector<16x256xf32>
    %c1_75 = arith.constant 1 : index
    %c0_76 = arith.constant 0 : index
    %c0_77 = arith.constant 0 : index
    %122 = vector.load %arg1[%c1_75, %c0_76, %c0_77] : memref<2x16x256xf32, #tpu.memory_space<vmem>>, vector<1x16x256xf32>
    %123 = vector.shape_cast %122 : vector<1x16x256xf32> to vector<16x256xf32>
    %124 = arith.addf %121, %123 : vector<16x256xf32>
    %c1_78 = arith.constant 1 : index
    %c0_79 = arith.constant 0 : index
    %c0_80 = arith.constant 0 : index
    %125 = vector.load %arg9[%c1_78, %c0_79, %c0_80] : memref<2x16x256xf32, #tpu.memory_space<vmem>>, vector<1x16x256xf32>
    %126 = vector.shape_cast %125 : vector<1x16x256xf32> to vector<16x256xf32>
    %127 = vector.shape_cast %124 : vector<16x256xf32> to vector<1x16x256xf32>
    tpu.vector_store %arg9[%c1_78, %c0_79, %c0_80], %127 {strides = array<i32>} : memref<2x16x256xf32, #tpu.memory_space<vmem>>, vector<1x16x256xf32>,
    return
  }
  func.func @transform_0(%arg0: i32) -> (i32, i32, i32) {
    %c0_i32 = arith.constant 0 : i32
    %c0_i32_0 = arith.constant 0 : i32
    %c0_i32_1 = arith.constant 0 : i32
    return %arg0, %c0_i32, %c0_i32_0 : i32, i32, i32
  }
  func.func @transform_1(%arg0: i32) -> (i32, i32) {
    %c0_i32 = arith.constant 0 : i32
    %c0_i32_0 = arith.constant 0 : i32
    %c0_i32_1 = arith.constant 0 : i32
    return %c0_i32, %c0_i32_0 : i32, i32
  }
  func.func @transform_2(%arg0: i32) -> (i32, i32) {
    %c0_i32 = arith.constant 0 : i32
    %c0_i32_0 = arith.constant 0 : i32
    %c0_i32_1 = arith.constant 0 : i32
    return %c0_i32, %c0_i32_0 : i32, i32
  }
  func.func @transform_3(%arg0: i32) -> (i32, i32) {
    %c0_i32 = arith.constant 0 : i32
    %c0_i32_0 = arith.constant 0 : i32
    %c0_i32_1 = arith.constant 0 : i32
    return %c0_i32, %c0_i32_0 : i32, i32
  }
  func.func @transform_4(%arg0: i32) -> (i32, i32) {
    %c0_i32 = arith.constant 0 : i32
    %c0_i32_0 = arith.constant 0 : i32
    %c0_i32_1 = arith.constant 0 : i32
    return %c0_i32, %c0_i32_0 : i32, i32
  }
  func.func @transform_5(%arg0: i32) -> (i32, i32) {
    %c0_i32 = arith.constant 0 : i32
    %c0_i32_0 = arith.constant 0 : i32
    %c0_i32_1 = arith.constant 0 : i32
    return %c0_i32, %c0_i32_0 : i32, i32
  }
  func.func @transform_6(%arg0: i32) -> (i32, i32) {
    %c0_i32 = arith.constant 0 : i32
    %c0_i32_0 = arith.constant 0 : i32
    %c0_i32_1 = arith.constant 0 : i32
    return %c0_i32, %c0_i32_0 : i32, i32
  }
  func.func @transform_7(%arg0: i32) -> (i32, i32) {
    %c0_i32 = arith.constant 0 : i32
    %c0_i32_0 = arith.constant 0 : i32
    %c0_i32_1 = arith.constant 0 : i32
    return %c0_i32, %c0_i32_0 : i32, i32
  }
  func.func @transform_8(%arg0: i32) -> (i32, i32, i32) {
    %c0_i32 = arith.constant 0 : i32
    %c0_i32_0 = arith.constant 0 : i32
    %c0_i32_1 = arith.constant 0 : i32
    return %arg0, %c0_i32, %c0_i32_0 : i32, i32, i32
  }
}

</mosaic_0001>

<bundles_post_ra>
// kernel: tpu_custom_call.1
= control target key start
LH: loop header
LB: loop body
LE: loop exit
PB: predicated region body
PF: predicated region fallthrough
CT: control target
= control target key end

     0   :  { %13 = vsyncpa [#allocation5], 0  ;;  %s4916_s0 = inlined_call_operand.vmem [shape: f32[2,16,256], index: 0, kind: input, shape index: {}]   ;;  %s4917_s1 = inlined_call_operand.hbm [shape: bf16[16,64], index: 1, kind: input, shape index: {}]   ;;  %s4918_s2 = inlined_call_operand.vmem [shape: f32[12,64], index: 2, kind: input, shape index: {}]   ;;  %s4919_s3 = inlined_call_operand.vmem [shape: f32[64,16], index: 3, kind: input, shape index: {}]   ;;  %s4920_s4 = inlined_call_operand.vmem [shape: f32[1,16], index: 4, kind: input, shape index: {}]   ;;  %s4921_s5 = inlined_call_operand.hbm [shape: f32[16,64], index: 5, kind: input, shape index: {}]   ;;  %s4922_s6 = inlined_call_operand.hbm [shape: bf16[16,64], index: 6, kind: input, shape index: {}]   ;;  %s4923_s7 = inlined_call_operand.vmem [shape: f32[16,1], index: 7, kind: input, shape index: {}]   ;;  %s4924_s8 = inlined_call_operand.hbm [shape: f32[2,16,256], index: 8, kind: output, shape index: {}]  }
   0x1   :  { %14 = vsyncpa [#allocation8], 0  ;;  %s41_s29 = sshll.u32 %s4921_s5, 4  ;;  %s42_s29 = int_to_ptr.hbm [resolvable:$true] %s41_s29 }
   0x2   :  { %15 = vsyncpa [#allocation6], 0  ;;  %s3336_s30 = smov [#allocation7]   ;;  %s22_s12 = sshll.u32 %s4917_s1, 4  ;;  %s23_s12 = int_to_ptr.hbm [resolvable:$true] %s22_s12 }
   0x3   :  { %s43_s9 = sshll.u32 %s3336_s30, 4  ;;  %s3337_s13 = smov 128   ;;  %s44_s9 = int_to_ptr.vmem [resolvable:$true] %s43_s9 }
   0x4   :  { %s3338_s14 = smov 8   ;;  %s3339_s15 = smov [#allocation4]  }
   0x5   :  { %49 = dma.hbm_to_vmem [thread:$0]  %s42_s29, 256, %s44_s9, [#allocation8], %s3337_s13, %s3337_s13, %s3338_s14  }
   0x6   :  { %s24_s16 = sshll.u32 %s3339_s15, 4  ;;  %s3340_s17 = smov 64   ;;  %s25_s16 = int_to_ptr.vmem [resolvable:$true] %s24_s16 }
   0x7   :  { %s3341_s18 = smov 4   ;;  %s54_s20 = sshll.u32 %s4922_s6, 4  ;;  %s55_s20 = int_to_ptr.hbm [resolvable:$true] %s54_s20 }
   0x8   :  { %30 = dma.hbm_to_vmem [thread:$0]  %s23_s12, 128, %s25_s16, [#allocation5], %s3340_s17, %s3340_s17, %s3341_s18  }
   0x9   :  { %s3342_s21 = smov [#allocation9]  }
   0xa   :  { %s56_s22 = sshll.u32 %s3342_s21, 4  ;;  %s57_s22 = int_to_ptr.vmem [resolvable:$true] %s56_s22 }
   0xb   :  { %62 = dma.hbm_to_vmem [thread:$0]  %s55_s20, 128, %s57_s22, [#allocation8], %s3340_s17, %s3340_s17, %s3341_s18  }
   0xc   :  { %3314 = dma.done.wait [#allocation5], 128  }
   0xd   :  { %3315 = vsyncadd [#allocation5], 4294967168 }
   0xe   :  { %3316 = dma.done.wait [#allocation8], 384  }
   0xf   :  { %3317 = vsyncadd [#allocation8], 4294966912  ;;  %vm99_vm0 = vcmask 523264   ;;  %vm102_vm1 = vcmask 517120   ;;  %v3343_v0 = vmov 0.0   ;;  %vm109_vm2 = vcmask 516096  }
  0x10   :  { %100 = vst.msk [vmem:[#allocation2] sm:$0xff] %vm99_vm0, %v3343_v0  ;;  %v3415_v1 = vld [vmem:[%s4918_s2] sm:$0xff]  ;;  %v3425_v3 = vld [vmem:[%s4919_s3 + $0x8] sm:$0xff]  ;;  %v3432_v4 = vld [vmem:[%s4919_s3 + $0x10] sm:$0xff]  ;;  %vm179_vm3 = vcmask 130048  }
  0x11   :  { %101 = vst.msk [vmem:[#allocation2 + $0x8] sm:$0xff] %vm99_vm0, %v3343_v0  ;;  %v3420_v2 = vld [vmem:[%s4919_s3] sm:$0xff]  ;;  %v3437_v5 = vld [vmem:[%s4919_s3 + $0x18] sm:$0xff]  ;;  %v3449_v7 = vld [vmem:[%s4919_s3 + $0x28] sm:$0xff] }
  0x12   :  { %103 = vst.msk [vmem:[#allocation2 + $0x10] sm:$0x3] %vm102_vm1, %v3343_v0  ;;  %v3442_v6 = vld [vmem:[%s4919_s3 + $0x20] sm:$0xff]  ;;  %v3454_v8 = vld [vmem:[%s4919_s3 + $0x30] sm:$0xff]  ;;  %v3459_v9 = vld [vmem:[%s4919_s3 + $0x38] sm:$0xff] }
  0x13   :  { %105 = vst.msk [vmem:[#allocation2 + $0x198] sm:$0xff] %vm99_vm0, %v3343_v0  ;;  %v3466_v10 = vld [vmem:[%s4920_s4] sm:$0x1]  ;;  %v3468_v11 = vld [vmem:[#allocation7] sm:$0xff]  ;;  %v3474_v13 = vld [vmem:[#allocation9] sm:$0xff]  }
  0x14   :  { %106 = vst.msk [vmem:[#allocation2 + $0x1a0] sm:$0xff] %vm99_vm0, %v3343_v0  ;;  %v3470_v12 = vld [vmem:[#allocation7 + $0x8] sm:$0xff]  ;;  %v3484_v15 = vld [vmem:[%s4923_s7 + $0x8] sm:$0xff]  ;;  %v144_v20 = vld [vmem:[%s4916_s0 + $0x10] sm:$0xff] }
  0x15   :  { %107 = vst.msk [vmem:[#allocation2 + $0x1a8] sm:$0x3] %vm102_vm1, %v3343_v0  ;;  %v3479_v14 = vld [vmem:[%s4923_s7] sm:$0xff]  ;;  %v143_v19 = vld [vmem:[%s4916_s0 + $0x8] sm:$0xff]  ;;  %v145_v21 = vld [vmem:[%s4916_s0 + $0x18] sm:$0xff] }
  0x16   :  { %4939 = vst [vmem:[#allocation14_spill] sm:$0xff] %v3415_v1  ;;  %v142_v18 = vld [vmem:[%s4916_s0] sm:$0xff]  ;;  %v3506_v23 = vld [vmem:[#allocation4] sm:$0xff]  ;;  %v147_v24 = vpack.c.bf16 %v145_v21, %v143_v19  ;;  %v3578_v40 = vld [vmem:[%s4918_s2 + $0x8] sm:$0xf]  ;;  %s3659_s2 = smov 0  }
  0x17   :  { %4940 = vst [vmem:[#allocation15_spill] sm:$0xff] %v3420_v2  ;;  %v146_v22 = vpack.c.bf16 %v144_v20, %v142_v18  ;;  %235 = vmatpush.bf16.msra.mxu0 %v3506_v23  ;;  %3146 = vmatpush.bf16.msra.mxu2 %v3506_v23  ;;  %v3581_v41 = vperm.slane %v3578_v40, 1 }
  0x18   :  { %110 = vst.msk [vmem:[#allocation2 + $0x18] sm:$0x1] %vm109_vm2, %v3343_v0 }
  0x19   :  { %111 = vst.msk [vmem:[#allocation2 + $0x30] sm:$0x1] %vm109_vm2, %v3343_v0  ;;  %149 = vxpose.binary.xlu0.c.b16.start.end [1/2] (short) %v147_v24, %v146_v22, 128 }
  0x1a   :  { %112 = vst.msk [vmem:[#allocation2 + $0x48] sm:$0x1] %vm109_vm2, %v3343_v0 }
  0x1b   :  { %4941 = vst [vmem:[#allocation16_spill] sm:$0xff] %v3466_v10 }
  0x1c   :  { %113 = vst.msk [vmem:[#allocation2 + $0x60] sm:$0x1] %vm109_vm2, %v3343_v0 }
  0x1d   :  { %4942 = vst [vmem:[#allocation17_spill] sm:$0xff] %v3474_v13 }
  0x1e   :  { %4943 = vst [vmem:[#allocation18_spill] sm:$0xff] %v3479_v14 }
  0x1f   :  { %114 = vst.msk [vmem:[#allocation2 + $0x78] sm:$0x1] %vm109_vm2, %v3343_v0 }
  0x20   :  { %115 = vst.msk [vmem:[#allocation2 + $0x90] sm:$0x1] %vm109_vm2, %v3343_v0 }
  0x21   :  { %116 = vst.msk [vmem:[#allocation2 + $0xa8] sm:$0x1] %vm109_vm2, %v3343_v0 }
  0x22   :  { %4944 = vst [vmem:[#allocation19_spill] sm:$0xff] %v3506_v23 }
  0x23   :  { %117 = vst.msk [vmem:[#allocation2 + $0xc0] sm:$0x1] %vm109_vm2, %v3343_v0 }
  0x24   :  { %118 = vst.msk [vmem:[#allocation2 + $0xd8] sm:$0x1] %vm109_vm2, %v3343_v0 }
  0x25   :  { %119 = vst.msk [vmem:[#allocation2 + $0xf0] sm:$0x1] %vm109_vm2, %v3343_v0 }
  0x26   :  { %120 = vst.msk [vmem:[#allocation2 + $0x108] sm:$0x1] %vm109_vm2, %v3343_v0 }
  0x27   :  { %121 = vst.msk [vmem:[#allocation2 + $0x120] sm:$0x1] %vm109_vm2, %v3343_v0 }
  0x28   :  { %122 = vst.msk [vmem:[#allocation2 + $0x138] sm:$0x1] %vm109_vm2, %v3343_v0 }
  0x29   :  { %123 = vst.msk [vmem:[#allocation2 + $0x150] sm:$0x1] %vm109_vm2, %v3343_v0 }
  0x2a   :  { %124 = vst.msk [vmem:[#allocation2 + $0x168] sm:$0x1] %vm109_vm2, %v3343_v0 }
  0x2b   :  { %125 = vst.msk [vmem:[#allocation2 + $0x180] sm:$0x1] %vm109_vm2, %v3343_v0 }
  0x2c   :  { %126 = vst.msk [vmem:[#allocation2 + $0x29] sm:$0x1] %vm109_vm2, %v3343_v0 }
  0x2d   :  { %127 = vst.msk [vmem:[#allocation2 + $0x41] sm:$0x1] %vm109_vm2, %v3343_v0 }
  0x2e   :  { %128 = vst.msk [vmem:[#allocation2 + $0x59] sm:$0x1] %vm109_vm2, %v3343_v0 }
  0x2f   :  { %129 = vst.msk [vmem:[#allocation2 + $0x71] sm:$0x1] %vm109_vm2, %v3343_v0 }
  0x30   :  { %130 = vst.msk [vmem:[#allocation2 + $0x89] sm:$0x1] %vm109_vm2, %v3343_v0 }
  0x31   :  { %131 = vst.msk [vmem:[#allocation2 + $0xa1] sm:$0x1] %vm109_vm2, %v3343_v0 }
  0x32   :  { %132 = vst.msk [vmem:[#allocation2 + $0xb9] sm:$0x1] %vm109_vm2, %v3343_v0 }
  0x33   :  { %133 = vst.msk [vmem:[#allocation2 + $0xd1] sm:$0x1] %vm109_vm2, %v3343_v0 }
  0x34   :  { %134 = vst.msk [vmem:[#allocation2 + $0xe9] sm:$0x1] %vm109_vm2, %v3343_v0 }
  0x35   :  { %135 = vst.msk [vmem:[#allocation2 + $0x101] sm:$0x1] %vm109_vm2, %v3343_v0 }
  0x36   :  { %136 = vst.msk [vmem:[#allocation2 + $0x119] sm:$0x1] %vm109_vm2, %v3343_v0 }
  0x37   :  { %137 = vst.msk [vmem:[#allocation2 + $0x131] sm:$0x1] %vm109_vm2, %v3343_v0 }
  0x38   :  { %138 = vst.msk [vmem:[#allocation2 + $0x149] sm:$0x1] %vm109_vm2, %v3343_v0 }
  0x39   :  { %139 = vst.msk [vmem:[#allocation2 + $0x161] sm:$0x1] %vm109_vm2, %v3343_v0 }
  0x3a   :  { %140 = vst.msk [vmem:[#allocation2 + $0x179] sm:$0x1] %vm109_vm2, %v3343_v0 }
  0x3b   :  { %141 = vst.msk [vmem:[#allocation2 + $0x191] sm:$0x1] %vm109_vm2, %v3343_v0 }
  0x3c   :  { %4945 = vst [vmem:[#allocation20_spill] sm:$0xff] %v3578_v40 }
  0x3d   :  { %4946 = vst [vmem:[#allocation21_spill] sm:$0xff] %v3581_v41 }
  0xc5   :  { %v157_v25 = vpop.trf.xlu0 }
  0xc6   :  { %2723 = vmatmul.msk.bf16.vlgmr.msra.gmra.mxu0 %vm179_vm3, %v157_v25 }
  0xcd   :  { %v158_v26 = vpop.trf.xlu0 }
  0xd5   :  { %v159_v27 = vpop.trf.xlu0 }
  0xd6   :  { %2724 = vmatmul.msk.bf16.gmra.mxu0 %vm179_vm3, %v159_v27 }
  0xdd   :  { %v160_v28 = vpop.trf.xlu0 }
  0xe5   :  { %v161_v29 = vpop.trf.xlu0 }
  0xe6   :  { %2725 = vmatmul.msk.bf16.gmra.mxu0 %vm179_vm3, %v161_v29 }
  0xed   :  { %v162_v30 = vpop.trf.xlu0 }
  0xf5   :  { %v163_v31 = vpop.trf.xlu0 }
  0xf6   :  { %2726 = vmatmul.msk.bf16.gmra.mxu0 %vm179_vm3, %v163_v31 }
  0xfd   :  { %v3564_v32 = vpop.trf.xlu0 }
 0x105   :  { %v165_v33 = vpop.trf.xlu0 }
 0x106   :  { %2727 = vmatmul.msk.bf16.gmra.mxu0 %vm179_vm3, %v165_v33 }
 0x10d   :  { %v3567_v34 = vpop.trf.xlu0 }
 0x115   :  { %v167_v35 = vpop.trf.xlu0 }
 0x116   :  { %2728 = vmatmul.msk.bf16.gmra.mxu0 %vm179_vm3, %v167_v35 }
 0x11d   :  { %v3570_v36 = vpop.trf.xlu0 }
 0x125   :  { %v169_v37 = vpop.trf.xlu0 }
 0x126   :  { %2729 = vmatmul.msk.bf16.gmra.mxu0 %vm179_vm3, %v169_v37 }
 0x12d   :  { %v170_v38 = vpop.trf.xlu0 }
 0x12e   :  { %2737 = vmatmul.msk.bf16.vlgmr.msra.gmra.mxu2 %vm179_vm3, %v170_v38 }
 0x135   :  { %v171_v39 = vpop.trf.xlu0 }
 0x136   :  { %2730 = vmatmul.msk.bf16.gmra.mxu0 %vm179_vm3, %v171_v39 }
 0x13d   :  { %v172_v20 = vpop.trf.xlu0 }
 0x13e   :  { %2738 = vmatmul.msk.bf16.gmra.mxu2 %vm179_vm3, %v172_v20 }
 0x143   :  { %v237_v42 = vpop.f32.mrf.mxu0 }
 0x144   :  { %v238_v43 = vadd.f32 %v237_v42, %v3581_v41 }
 0x146   :  { %v317_v44 = vadd.f32 3.0, %v238_v43  ;;  %2731 = vmatmul.msk.bf16.gmra.mxu0 %vm179_vm3, %v158_v26 }
 0x148   :  { %v349_v45 = vmax.f32 %v317_v44, 0.0 }
 0x14a   :  { %v381_v46 = vmin.f32 %v349_v45, 6.0 }
 0x14b   :  { %v239_v47 = vpop.f32.mrf.mxu0 }
 0x14c   :  { %v413_v48 = vmul.f32 %v381_v46, %v238_v43  ;;  %v240_v49 = vadd.f32 %v239_v47, %v3581_v41 }
 0x14e   :  { %v445_v50 = vmul.f32 0.16666667, %v413_v48  ;;  %v318_v51 = vadd.f32 3.0, %v240_v49 }
 0x150   :  { %477 = vst.msk [vmem:[#allocation2 + $0x19] sm:$0xff] %vm99_vm0, %v445_v50  ;;  %v350_v52 = vmax.f32 %v318_v51, 0.0 }
 0x152   :  { %v382_v53 = vmin.f32 %v350_v52, 6.0 }
 0x153   :  { %v242_v54 = vpop.f32.mrf.mxu0 }
 0x154   :  { %v414_v55 = vmul.f32 %v382_v53, %v240_v49  ;;  %v243_v56 = vadd.f32 %v242_v54, %v3581_v41 }
 0x156   :  { %v446_v57 = vmul.f32 0.16666667, %v414_v55  ;;  %v319_v58 = vadd.f32 3.0, %v243_v56  ;;  %2732 = vmatmul.msk.bf16.gmra.mxu0 %vm179_vm3, %v160_v28 }
 0x158   :  { %478 = vst.msk [vmem:[#allocation2 + $0x21] sm:$0xff] %vm99_vm0, %v446_v57  ;;  %v351_v59 = vmax.f32 %v319_v58, 0.0 }
 0x15a   :  { %v383_v60 = vmin.f32 %v351_v59, 6.0 }
 0x15b   :  { %v244_v61 = vpop.f32.mrf.mxu0 }
 0x15c   :  { %v415_v62 = vmul.f32 %v383_v60, %v243_v56  ;;  %v245_v63 = vadd.f32 %v244_v61, %v3581_v41 }
 0x15e   :  { %v447_v0 = vmul.f32 0.16666667, %v415_v62  ;;  %v320_v18 = vadd.f32 3.0, %v245_v63 }
 0x160   :  { %479 = vst.msk [vmem:[#allocation2 + $0x31] sm:$0xff] %vm99_vm0, %v447_v0  ;;  %v352_v19 = vmax.f32 %v320_v18, 0.0 }
 0x162   :  { %v384_v21 = vmin.f32 %v352_v19, 6.0 }
 0x163   :  { %v247_v22 = vpop.f32.mrf.mxu0 }
 0x164   :  { %v416_v24 = vmul.f32 %v384_v21, %v245_v63  ;;  %v248_v25 = vadd.f32 %v247_v22, %v3581_v41 }
 0x166   :  { %v448_v26 = vmul.f32 0.16666667, %v416_v24  ;;  %v321_v27 = vadd.f32 3.0, %v248_v25  ;;  %2733 = vmatmul.msk.bf16.gmra.mxu0 %vm179_vm3, %v162_v30 }
 0x168   :  { %480 = vst.msk [vmem:[#allocation2 + $0x39] sm:$0xff] %vm99_vm0, %v448_v26  ;;  %v353_v28 = vmax.f32 %v321_v27, 0.0 }
 0x16a   :  { %v385_v29 = vmin.f32 %v353_v28, 6.0 }
 0x16b   :  { %v249_v31 = vpop.f32.mrf.mxu0 }
 0x16c   :  { %v417_v33 = vmul.f32 %v385_v29, %v248_v25  ;;  %v250_v35 = vadd.f32 %v249_v31, %v3581_v41 }
 0x16e   :  { %v449_v37 = vmul.f32 0.16666667, %v417_v33  ;;  %v322_v38 = vadd.f32 3.0, %v250_v35 }
 0x170   :  { %481 = vst.msk [vmem:[#allocation2 + $0x49] sm:$0xff] %vm99_vm0, %v449_v37  ;;  %v354_v39 = vmax.f32 %v322_v38, 0.0 }
 0x172   :  { %v386_v42 = vmin.f32 %v354_v39, 6.0 }
 0x173   :  { %v252_v43 = vpop.f32.mrf.mxu0 }
 0x174   :  { %v418_v44 = vmul.f32 %v386_v42, %v250_v35  ;;  %v253_v45 = vadd.f32 %v252_v43, %v3581_v41 }
 0x176   :  { %v450_v46 = vmul.f32 0.16666667, %v418_v44  ;;  %v323_v30 = vadd.f32 3.0, %v253_v45  ;;  %2734 = vmatmul.msk.bf16.gmra.mxu0 %vm179_vm3, %v3564_v32 }
 0x178   :  { %482 = vst.msk [vmem:[#allocation2 + $0x51] sm:$0xff] %vm99_vm0, %v450_v46  ;;  %v355_v47 = vmax.f32 %v323_v30, 0.0 }
 0x17a   :  { %v387_v48 = vmin.f32 %v355_v47, 6.0 }
 0x17b   :  { %v254_v49 = vpop.f32.mrf.mxu0 }
 0x17c   :  { %v419_v50 = vmul.f32 %v387_v48, %v253_v45  ;;  %v255_v51 = vadd.f32 %v254_v49, %v3581_v41 }
 0x17e   :  { %v451_v52 = vmul.f32 0.16666667, %v419_v50  ;;  %v324_v53 = vadd.f32 3.0, %v255_v51 }
 0x180   :  { %483 = vst.msk [vmem:[#allocation2 + $0x61] sm:$0xff] %vm99_vm0, %v451_v52  ;;  %v356_v54 = vmax.f32 %v324_v53, 0.0 }
 0x182   :  { %v388_v55 = vmin.f32 %v356_v54, 6.0 }
 0x183   :  { %v257_v56 = vpop.f32.mrf.mxu0 }
 0x184   :  { %v420_v57 = vmul.f32 %v388_v55, %v255_v51  ;;  %v258_v58 = vadd.f32 %v257_v56, %v3581_v41 }
 0x186   :  { %v452_v59 = vmul.f32 0.16666667, %v420_v57  ;;  %v325_v32 = vadd.f32 3.0, %v258_v58  ;;  %2735 = vmatmul.msk.bf16.gmra.mxu0 %vm179_vm3, %v3567_v34 }
 0x188   :  { %484 = vst.msk [vmem:[#allocation2 + $0x69] sm:$0xff] %vm99_vm0, %v452_v59  ;;  %v357_v60 = vmax.f32 %v325_v32, 0.0 }
 0x18a   :  { %v389_v61 = vmin.f32 %v357_v60, 6.0 }
 0x18b   :  { %v259_v62 = vpop.f32.mrf.mxu0 }
 0x18c   :  { %v421_v63 = vmul.f32 %v389_v61, %v258_v58  ;;  %v260_v0 = vadd.f32 %v259_v62, %v3581_v41 }
 0x18e   :  { %v453_v18 = vmul.f32 0.16666667, %v421_v63  ;;  %v326_v19 = vadd.f32 3.0, %v260_v0 }
 0x190   :  { %485 = vst.msk [vmem:[#allocation2 + $0x79] sm:$0xff] %vm99_vm0, %v453_v18  ;;  %v358_v20 = vmax.f32 %v326_v19, 0.0 }
 0x192   :  { %v390_v21 = vmin.f32 %v358_v20, 6.0 }
 0x193   :  { %v262_v22 = vpop.f32.mrf.mxu0 }
 0x194   :  { %v422_v24 = vmul.f32 %v390_v21, %v260_v0  ;;  %v263_v25 = vadd.f32 %v262_v22, %v3581_v41 }
 0x196   :  { %v454_v26 = vmul.f32 0.16666667, %v422_v24  ;;  %v327_v34 = vadd.f32 3.0, %v263_v25  ;;  %2736 = vmatmul.msk.bf16.gmra.mxu0 %vm179_vm3, %v3570_v36 }
 0x198   :  { %486 = vst.msk [vmem:[#allocation2 + $0x81] sm:$0xff] %vm99_vm0, %v454_v26  ;;  %v359_v27 = vmax.f32 %v327_v34, 0.0 }
 0x19a   :  { %v391_v28 = vmin.f32 %v359_v27, 6.0 }
 0x19b   :  { %v264_v29 = vpop.f32.mrf.mxu0 }
 0x19c   :  { %v423_v31 = vmul.f32 %v391_v28, %v263_v25  ;;  %v265_v33 = vadd.f32 %v264_v29, %v3581_v41 }
 0x19e   :  { %v455_v35 = vmul.f32 0.16666667, %v423_v31  ;;  %v328_v37 = vadd.f32 3.0, %v265_v33 }
 0x1a0   :  { %487 = vst.msk [vmem:[#allocation2 + $0x91] sm:$0xff] %vm99_vm0, %v455_v35  ;;  %v360_v38 = vmax.f32 %v328_v37, 0.0 }
 0x1a2   :  { %v392_v39 = vmin.f32 %v360_v38, 6.0 }
 0x1a3   :  { %v267_v42 = vpop.f32.mrf.mxu0 }
 0x1a4   :  { %v424_v43 = vmul.f32 %v392_v39, %v265_v33  ;;  %v268_v44 = vadd.f32 %v267_v42, %v3581_v41 }
 0x1a6   :  { %v456_v45 = vmul.f32 0.16666667, %v424_v43  ;;  %v329_v36 = vadd.f32 3.0, %v268_v44 }
 0x1a8   :  { %488 = vst.msk [vmem:[#allocation2 + $0x99] sm:$0xff] %vm99_vm0, %v456_v45  ;;  %v361_v46 = vmax.f32 %v329_v36, 0.0 }
 0x1aa   :  { %v393_v30 = vmin.f32 %v361_v46, 6.0 }
 0x1ab   :  { %v269_v47 = vpop.f32.mrf.mxu0 }
 0x1ac   :  { %v425_v48 = vmul.f32 %v393_v30, %v268_v44  ;;  %v270_v49 = vadd.f32 %v269_v47, %v3581_v41 }
 0x1ae   :  { %v457_v50 = vmul.f32 0.16666667, %v425_v48  ;;  %v330_v51 = vadd.f32 3.0, %v270_v49 }
 0x1b0   :  { %489 = vst.msk [vmem:[#allocation2 + $0xa9] sm:$0xff] %vm99_vm0, %v457_v50  ;;  %v362_v52 = vmax.f32 %v330_v51, 0.0 }
 0x1b1   :  { %v307_v53 = vpop.f32.mrf.mxu2 }
 0x1b2   :  { %v394_v54 = vmin.f32 %v362_v52, 6.0  ;;  %v308_v55 = vadd.f32 %v307_v53, %v3581_v41 }
 0x1b3   :  { %v272_v56 = vpop.f32.mrf.mxu0 }
 0x1b4   :  { %v426_v57 = vmul.f32 %v394_v54, %v270_v49  ;;  %v345_v58 = vadd.f32 3.0, %v308_v55  ;;  %v273_v59 = vadd.f32 %v272_v56, %v3581_v41 }
 0x1b6   :  { %v458_v32 = vmul.f32 0.16666667, %v426_v57  ;;  %v377_v60 = vmax.f32 %v345_v58, 0.0  ;;  %v331_v61 = vadd.f32 3.0, %v273_v59 }
 0x1b8   :  { %490 = vst.msk [vmem:[#allocation2 + $0xb1] sm:$0xff] %vm99_vm0, %v458_v32  ;;  %v409_v62 = vmin.f32 %v377_v60, 6.0  ;;  %v363_v63 = vmax.f32 %v331_v61, 0.0 }
 0x1b9   :  { %v309_v0 = vpop.f32.mrf.mxu2 }
 0x1ba   :  { %v441_v18 = vmul.f32 %v409_v62, %v308_v55  ;;  %v395_v19 = vmin.f32 %v363_v63, 6.0  ;;  %v310_v20 = vadd.f32 %v309_v0, %v3581_v41 }
 0x1bb   :  { %v274_v21 = vpop.f32.mrf.mxu0 }
 0x1bc   :  { %v473_v22 = vmul.f32 0.16666667, %v441_v18  ;;  %v427_v24 = vmul.f32 %v395_v19, %v273_v59  ;;  %v346_v25 = vadd.f32 3.0, %v310_v20  ;;  %v275_v26 = vadd.f32 %v274_v21, %v3581_v41 }
 0x1be   :  { %505 = vst.msk [vmem:[#allocation2 + $0x169] sm:$0xff] %vm99_vm0, %v473_v22  ;;  %v459_v34 = vmul.f32 0.16666667, %v427_v24  ;;  %v378_v27 = vmax.f32 %v346_v25, 0.0  ;;  %v332_v28 = vadd.f32 3.0, %v275_v26 }
 0x1c0   :  { %491 = vst.msk [vmem:[#allocation2 + $0xc1] sm:$0xff] %vm99_vm0, %v459_v34  ;;  %v410_v29 = vmin.f32 %v378_v27, 6.0  ;;  %v364_v31 = vmax.f32 %v332_v28, 0.0 }
 0x1c1   :  { %v312_v21 = vpop.f32.mrf.mxu2 }
 0x1c2   :  { %v442_v33 = vmul.f32 %v410_v29, %v310_v20  ;;  %v396_v35 = vmin.f32 %v364_v31, 6.0 }
 0x1c3   :  { %v277_v37 = vpop.f32.mrf.mxu0 }
 0x1c4   :  { %v474_v38 = vmul.f32 0.16666667, %v442_v33  ;;  %v428_v39 = vmul.f32 %v396_v35, %v275_v26  ;;  %v278_v42 = vadd.f32 %v277_v37, %v3581_v41  ;;  %v313_v35 = vadd.f32 %v312_v21, %v3581_v41 }
 0x1c6   :  { %506 = vst.msk [vmem:[#allocation2 + $0x171] sm:$0xff] %vm99_vm0, %v474_v38  ;;  %v460_v43 = vmul.f32 0.16666667, %v428_v39  ;;  %v333_v44 = vadd.f32 3.0, %v278_v42  ;;  %v347_v39 = vadd.f32 3.0, %v313_v35 }
 0x1c8   :  { %492 = vst.msk [vmem:[#allocation2 + $0xc9] sm:$0xff] %vm99_vm0, %v460_v43  ;;  %v365_v45 = vmax.f32 %v333_v44, 0.0  ;;  %v379_v44 = vmax.f32 %v347_v39, 0.0 }
 0x1c9   :  { %v314_v29 = vpop.f32.mrf.mxu2 }
 0x1ca   :  { %v397_v36 = vmin.f32 %v365_v45, 6.0  ;;  %v315_v37 = vadd.f32 %v314_v29, %v3581_v41 }
 0x1cb   :  { %v279_v46 = vpop.f32.mrf.mxu0 }
 0x1cc   :  { %v429_v30 = vmul.f32 %v397_v36, %v278_v42  ;;  %v280_v47 = vadd.f32 %v279_v46, %v3581_v41  ;;  %v348_v42 = vadd.f32 3.0, %v315_v37 }
 0x1ce   :  { %v461_v48 = vmul.f32 0.16666667, %v429_v30  ;;  %v334_v49 = vadd.f32 3.0, %v280_v47  ;;  %v380_v45 = vmax.f32 %v348_v42, 0.0 }
 0x1d0   :  { %493 = vst.msk [vmem:[#allocation2 + $0xd9] sm:$0xff] %vm99_vm0, %v461_v48  ;;  %v366_v50 = vmax.f32 %v334_v49, 0.0  ;;  %v412_v48 = vmin.f32 %v380_v45, 6.0 }
 0x1d2   :  { %v398_v51 = vmin.f32 %v366_v50, 6.0 }
 0x1d3   :  { %v282_v52 = vpop.f32.mrf.mxu0 }
 0x1d4   :  { %v430_v53 = vmul.f32 %v398_v51, %v280_v47  ;;  %v283_v54 = vadd.f32 %v282_v52, %v3581_v41  ;;  %v411_v47 = vmin.f32 %v379_v44, 6.0  ;;  %v444_v52 = vmul.f32 %v412_v48, %v315_v37 }
 0x1d6   :  { %v462_v55 = vmul.f32 0.16666667, %v430_v53  ;;  %v335_v56 = vadd.f32 3.0, %v283_v54  ;;  %v443_v51 = vmul.f32 %v411_v47, %v313_v35 }
 0x1d8   :  { %494 = vst.msk [vmem:[#allocation2 + $0xe1] sm:$0xff] %vm99_vm0, %v462_v55  ;;  %v367_v57 = vmax.f32 %v335_v56, 0.0  ;;  %v476_v55 = vmul.f32 0.16666667, %v444_v52 }
 0x1da   :  { %v399_v58 = vmin.f32 %v367_v57, 6.0  ;;  %508 = vst.msk [vmem:[#allocation2 + $0x189] sm:$0xff] %vm99_vm0, %v476_v55 }
 0x1db   :  { %v284_v59 = vpop.f32.mrf.mxu0 }
 0x1dc   :  { %v431_v32 = vmul.f32 %v399_v58, %v283_v54  ;;  %v285_v60 = vadd.f32 %v284_v59, %v3581_v41  ;;  %v475_v54 = vmul.f32 0.16666667, %v443_v51 }
 0x1de   :  { %v463_v61 = vmul.f32 0.16666667, %v431_v32  ;;  %v336_v62 = vadd.f32 3.0, %v285_v60  ;;  %507 = vst.msk [vmem:[#allocation2 + $0x181] sm:$0xff] %vm99_vm0, %v475_v54 }
 0x1e0   :  { %495 = vst.msk [vmem:[#allocation2 + $0xf1] sm:$0xff] %vm99_vm0, %v463_v61  ;;  %v368_v63 = vmax.f32 %v336_v62, 0.0 }
 0x1e2   :  { %v400_v0 = vmin.f32 %v368_v63, 6.0 }
 0x1e3   :  { %v287_v18 = vpop.f32.mrf.mxu0 }
 0x1e4   :  { %v432_v19 = vmul.f32 %v400_v0, %v285_v60  ;;  %v288_v20 = vadd.f32 %v287_v18, %v3581_v41 }
 0x1e6   :  { %v464_v22 = vmul.f32 0.16666667, %v432_v19  ;;  %v337_v24 = vadd.f32 3.0, %v288_v20 }
 0x1e8   :  { %496 = vst.msk [vmem:[#allocation2 + $0xf9] sm:$0xff] %vm99_vm0, %v464_v22  ;;  %v369_v25 = vmax.f32 %v337_v24, 0.0 }
 0x1ea   :  { %v401_v26 = vmin.f32 %v369_v25, 6.0 }
 0x1eb   :  { %v289_v34 = vpop.f32.mrf.mxu0 }
 0x1ec   :  { %v433_v27 = vmul.f32 %v401_v26, %v288_v20  ;;  %v290_v28 = vadd.f32 %v289_v34, %v3581_v41 }
 0x1ee   :  { %v465_v31 = vmul.f32 0.16666667, %v433_v27  ;;  %v338_v33 = vadd.f32 3.0, %v290_v28 }
 0x1f0   :  { %497 = vst.msk [vmem:[#allocation2 + $0x109] sm:$0xff] %vm99_vm0, %v465_v31  ;;  %v370_v38 = vmax.f32 %v338_v33, 0.0 }
 0x1f2   :  { %v402_v43 = vmin.f32 %v370_v38, 6.0 }
 0x1f3   :  { %v292_v36 = vpop.f32.mrf.mxu0 }
 0x1f4   :  { %v434_v46 = vmul.f32 %v402_v43, %v290_v28  ;;  %v293_v30 = vadd.f32 %v292_v36, %v3581_v41 }
 0x1f6   :  { %v466_v49 = vmul.f32 0.16666667, %v434_v46  ;;  %v339_v50 = vadd.f32 3.0, %v293_v30 }
 0x1f8   :  { %498 = vst.msk [vmem:[#allocation2 + $0x111] sm:$0xff] %vm99_vm0, %v466_v49  ;;  %v371_v53 = vmax.f32 %v339_v50, 0.0  ;;  %v3657_v50 = vmov 0.0  }
 0x1fa   :  { %v403_v56 = vmin.f32 %v371_v53, 6.0 }
 0x1fb   :  { %v294_v57 = vpop.f32.mrf.mxu0 }
 0x1fc   :  { %v435_v58 = vmul.f32 %v403_v56, %v293_v30  ;;  %v295_v59 = vadd.f32 %v294_v57, %v3581_v41 }
 0x1fe   :  { %v467_v32 = vmul.f32 0.16666667, %v435_v58  ;;  %v340_v60 = vadd.f32 3.0, %v295_v59 }
 0x200   :  { %499 = vst.msk [vmem:[#allocation2 + $0x121] sm:$0xff] %vm99_vm0, %v467_v32  ;;  %v372_v61 = vmax.f32 %v340_v60, 0.0 }
 0x202   :  { %v404_v62 = vmin.f32 %v372_v61, 6.0 }
 0x203   :  { %v297_v63 = vpop.f32.mrf.mxu0 }
 0x204   :  { %v436_v0 = vmul.f32 %v404_v62, %v295_v59  ;;  %v298_v18 = vadd.f32 %v297_v63, %v3581_v41 }
 0x206   :  { %v468_v19 = vmul.f32 0.16666667, %v436_v0  ;;  %v341_v20 = vadd.f32 3.0, %v298_v18 }
 0x208   :  { %500 = vst.msk [vmem:[#allocation2 + $0x129] sm:$0xff] %vm99_vm0, %v468_v19  ;;  %v373_v21 = vmax.f32 %v341_v20, 0.0 }
 0x20a   :  { %v405_v22 = vmin.f32 %v373_v21, 6.0 }
 0x20b   :  { %v299_v24 = vpop.f32.mrf.mxu0 }
 0x20c   :  { %v437_v25 = vmul.f32 %v405_v22, %v298_v18  ;;  %v300_v26 = vadd.f32 %v299_v24, %v3581_v41 }
 0x20e   :  { %v469_v34 = vmul.f32 0.16666667, %v437_v25  ;;  %v342_v27 = vadd.f32 3.0, %v300_v26 }
 0x210   :  { %501 = vst.msk [vmem:[#allocation2 + $0x139] sm:$0xff] %vm99_vm0, %v469_v34  ;;  %v374_v28 = vmax.f32 %v342_v27, 0.0 }
 0x212   :  { %v406_v29 = vmin.f32 %v374_v28, 6.0 }
 0x213   :  { %v302_v31 = vpop.f32.mrf.mxu0 }
 0x214   :  { %v438_v33 = vmul.f32 %v406_v29, %v300_v26  ;;  %v303_v35 = vadd.f32 %v302_v31, %v3581_v41 }
 0x216   :  { %v470_v37 = vmul.f32 0.16666667, %v438_v33  ;;  %v343_v38 = vadd.f32 3.0, %v303_v35 }
 0x218   :  { %502 = vst.msk [vmem:[#allocation2 + $0x141] sm:$0xff] %vm99_vm0, %v470_v37  ;;  %v375_v39 = vmax.f32 %v343_v38, 0.0 }
 0x21a   :  { %v407_v42 = vmin.f32 %v375_v39, 6.0 }
 0x21b   :  { %v304_v43 = vpop.f32.mrf.mxu0 }
 0x21c   :  { %v439_v44 = vmul.f32 %v407_v42, %v303_v35  ;;  %v305_v45 = vadd.f32 %v304_v43, %v3581_v41 }
 0x21e   :  { %v471_v36 = vmul.f32 0.16666667, %v439_v44  ;;  %v344_v46 = vadd.f32 3.0, %v305_v45 }
 0x220   :  { %503 = vst.msk [vmem:[#allocation2 + $0x151] sm:$0xff] %vm99_vm0, %v471_v36  ;;  %v376_v30 = vmax.f32 %v344_v46, 0.0 }
 0x222   :  { %v408_v47 = vmin.f32 %v376_v30, 6.0 }
 0x224   :  { %v440_v48 = vmul.f32 %v408_v47, %v305_v45 }
 0x226   :  { %v472_v49 = vmul.f32 0.16666667, %v440_v48 }
 0x228   :  { %504 = vst.msk [vmem:[#allocation2 + $0x159] sm:$0xff] %vm99_vm0, %v472_v49 }
 0x229 LB: > { %v4947_v40 = vld [vmem:[#allocation20_spill] sm:$0xff]  ;;  %v4948_v1 = vld [vmem:[#allocation14_spill] sm:$0xff]  ;;  %s2740_s27 = smul.u32 192, %s3326_s2  ;;  %s2841_s29 = sshll.u32 %s3326_s2, 7  ;;  %vm1068_vm4 = vcmask 519168   ;;  %s3326_s2 = sphi %s3659_s2, %s514_s2   ;;  %v3322_v50 = vphi %v3657_v50, %v4949_v50  }
 0x22a   : > { %v3669_v51 = vperm.slane %v4948_v1, 0  ;;  %v3672_v52 = vperm.slane %v4948_v1, 1  ;;  %v3675_v53 = vperm.slane %v4948_v1, 2  ;;  %v3678_v54 = vperm.slane %v4948_v1, 3  ;;  %s3848_s30 = sshra.s32 %s2841_s29, 3  ;;  %s514_s2 = sadd.s32 1, %s3326_s2  }
 0x22b   : > { %v3681_v55 = vperm.slane %v4948_v1, 4  ;;  %v3684_v56 = vperm.slane %v4948_v1, 5  ;;  %v3687_v57 = vperm.slane %v4948_v1, 6  ;;  %v3690_v58 = vperm.slane %v4948_v1, 7  ;;  %s3695_s28 = scalar_lea.vmem [#allocation2], %s2740_s27  ;;  %s2842_s9 = sshll.u32 %s3848_s30, 2 }
 0x22c   : > { %v3693_v59 = vperm.slane %v4947_v40, 0  ;;  %v3707_v21 = vperm.slane %v4947_v40, 2  ;;  %s3875_s10 = scalar_lea.vmem [#allocation3], %s2842_s9  ;;  %p511_p0 = scmp.ge.s32.totalorder %s514_s2, 2  }
 0x22d   :  { %1135 = vmatpush.msra.mxu1 (%p511_p0), %v3459_v9  ;;  %1168 = vmatpush.msrb.mxu2 (%p511_p0), %v3470_v12  ;;  %s4363_s7 = smov (%p511_p0), 0  }
 0x22f   : > { %v519_v32 = vld [vmem:[%s3695_s28] sm:$0xff]  ;;  %v2743_v18 = vld [vmem:[%s3695_s28 + $0x18] sm:$0xff]  ;;  %v3713_v26 = vld [vmem:[%s3695_s28 + $0x30] sm:$0xff]  ;;  %1136 = vmatpush.msra.mxu1 (%p511_p0), %v3454_v8  ;;  %1169 = vmatpush.msrb.mxu2 (%p511_p0), %v3468_v11 }
 0x230   : > { %v552_v60 = vld [vmem:[%s3695_s28 + $0x1] sm:$0xff]  ;;  %v536_v62 = vmul.f32 %v3669_v51, %v519_v32  ;;  %v2759_v19 = vld [vmem:[%s3695_s28 + $0x19] sm:$0xff]  ;;  %v670_v22 = vmul.f32 %v2743_v18, %v3678_v54  ;;  %v3716_v34 = vld [vmem:[%s3695_s28 + $0x31] sm:$0xff]  ;;  %v538_v28 = vmul.f32 %v2743_v18, %v3669_v51  ;;  %v820_v31 = vmul.f32 %v3713_v26, %v3687_v57 }
 0x231   : > { %v601_v61 = vld [vmem:[%s3695_s28 + $0x2] sm:$0xff]  ;;  %v569_v63 = vmul.f32 %v3672_v52, %v552_v60  ;;  %v2775_v20 = vld [vmem:[%s3695_s28 + $0x1a] sm:$0xff]  ;;  %v719_v24 = vmul.f32 %v2759_v19, %v3681_v55  ;;  %v3719_v27 = vld [vmem:[%s3695_s28 + $0x32] sm:$0xff]  ;;  %v869_v33 = vmul.f32 %v3716_v34, %v3690_v58  ;;  %v571_v30 = vmul.f32 %v2759_v19, %v3672_v52  ;;  %1137 = vmatpush.msra.mxu1 (%p511_p0), %v3449_v7 }
 0x232   : > { %v618_v0 = vmul.f32 %v3675_v53, %v601_v61  ;;  %v768_v25 = vmul.f32 %v2775_v20, %v3684_v56  ;;  %v3728_v35 = vmul.f32 %v3719_v27, %v3693_v59  ;;  %v520_v37 = vld [vmem:[%s3695_s28 + $0x8] sm:$0xff]  ;;  %v2744_v45 = vld [vmem:[%s3695_s28 + $0x20] sm:$0xff]  ;;  %v3744_v60 = vld [vmem:[%s3695_s28 + $0x38] sm:$0xff] }
 0x233   : > { %v585_v29 = vadd.f32 %v569_v63, %v536_v62  ;;  %v553_v38 = vld [vmem:[%s3695_s28 + $0x9] sm:$0xff]  ;;  %v537_v42 = vmul.f32 %v3669_v51, %v520_v37  ;;  %v2760_v36 = vld [vmem:[%s3695_s28 + $0x21] sm:$0xff]  ;;  %v671_v48 = vmul.f32 %v2744_v45, %v3678_v54  ;;  %v3747_v61 = vld [vmem:[%s3695_s28 + $0x39] sm:$0xff]  ;;  %v821_v18 = vmul.f32 %v3744_v60, %v3687_v57  ;;  %1138 = vmatpush.msra.mxu1 (%p511_p0), %v3442_v6 }
 0x234   : > { %v602_v39 = vld [vmem:[%s3695_s28 + $0xa] sm:$0xff]  ;;  %v570_v43 = vmul.f32 %v3672_v52, %v553_v38  ;;  %v2776_v46 = vld [vmem:[%s3695_s28 + $0x22] sm:$0xff]  ;;  %v720_v49 = vmul.f32 %v2760_v36, %v3681_v55  ;;  %v3750_v62 = vld [vmem:[%s3695_s28 + $0x3a] sm:$0xff]  ;;  %v587_v37 = vadd.f32 %v571_v30, %v538_v28  ;;  %v620_v38 = vmul.f32 %v2775_v20, %v3675_v53 }
 0x235   : > { %v619_v44 = vmul.f32 %v3675_v53, %v602_v39  ;;  %v634_v47 = vadd.f32 %v618_v0, %v585_v29  ;;  %v769_v32 = vmul.f32 %v2776_v46, %v3684_v56  ;;  %v870_v0 = vmul.f32 %v3747_v61, %v3690_v58  ;;  %v3762_v17 = vld [vmem:[%s3695_s28 + $0x48] sm:$0xff]  ;;  %1139 = vmatpush.msra.mxu1 (%p511_p0), %v3437_v5 }
 0x236   : > { %v586_v63 = vadd.f32 %v570_v43, %v537_v42  ;;  %v919_v19 = vmul.f32 %v3750_v62, %v3693_v59  ;;  %v672_v39 = vmul.f32 %v3713_v26, %v3678_v54  ;;  %v721_v42 = vmul.f32 %v3716_v34, %v3681_v55  ;;  %v3774_v28 = vld [vmem:[%s3695_s28 + $0x4a] sm:$0xff] }
 0x237   : > { %v686_v29 = vadd.f32 %v670_v22, %v634_v47  ;;  %v770_v43 = vmul.f32 %v3719_v27, %v3684_v56  ;;  %v822_v1 = vmul.f32 %v3762_v17, %v3687_v57  ;;  %v3771_v22 = vld [vmem:[%s3695_s28 + $0x49] sm:$0xff]  ;;  %v636_v30 = vadd.f32 %v620_v38, %v587_v37  ;;  %1140 = vmatpush.msra.mxu1 (%p511_p0), %v3432_v4 }
 0x238   : > { %v635_v16 = vadd.f32 %v619_v44, %v586_v63  ;;  %v871_v44 = vmul.f32 %v3771_v22, %v3690_v58  ;;  %v920_v47 = vmul.f32 %v3774_v28, %v3693_v59  ;;  %v539_v13 = vmul.f32 %v2744_v45, %v3669_v51  ;;  %v3788_v37 = vld [vmem:[%s3695_s28 + $0x50] sm:$0xff] }
 0x239   : > { %v735_v20 = vadd.f32 %v719_v24, %v686_v29  ;;  %v572_v41 = vmul.f32 %v2760_v36, %v3672_v52  ;;  %v621_v40 = vmul.f32 %v2776_v46, %v3675_v53  ;;  %v688_v10 = vadd.f32 %v672_v39, %v636_v30  ;;  %v3795_v36 = vld [vmem:[%s3695_s28 + $0x51] sm:$0xff]  ;;  %1141 = vmatpush.msra.mxu1 (%p511_p0), %v3425_v3 }
 0x23a   : > { %v687_v63 = vadd.f32 %v671_v48, %v635_v16  ;;  %v673_v24 = vmul.f32 %v3744_v60, %v3678_v54  ;;  %v722_v29 = vmul.f32 %v3747_v61, %v3681_v55  ;;  %v771_v16 = vmul.f32 %v3750_v62, %v3684_v56 }
 0x23b   : > { %v784_v14 = vadd.f32 %v768_v25, %v735_v20  ;;  %v588_v23 = vadd.f32 %v572_v41, %v539_v13  ;;  %v823_v45 = vmul.f32 %v3788_v37, %v3687_v57  ;;  %v3798_v25 = vld [vmem:[%s3695_s28 + $0x52] sm:$0xff]  ;;  %v737_v48 = vadd.f32 %v721_v42, %v688_v10 }
 0x23c   : > { %v736_v38 = vadd.f32 %v720_v49, %v687_v63  ;;  %v872_v39 = vmul.f32 %v3795_v36, %v3690_v58  ;;  %v921_v49 = vmul.f32 %v3798_v25, %v3693_v59  ;;  %v540_v20 = vmul.f32 %v3713_v26, %v3669_v51 }
 0x23d   : > { %v836_v46 = vadd.f32 %v820_v31, %v784_v14  ;;  %v637_v41 = vadd.f32 %v621_v40, %v588_v23  ;;  %v573_v30 = vmul.f32 %v3716_v34, %v3672_v52  ;;  %v786_v2 = vadd.f32 %v770_v43, %v737_v48  ;;  %v3815_v40 = vld [vmem:[%s3695_s28 + $0x60] sm:$0xff] }
 0x23e   : > { %v785_v13 = vadd.f32 %v769_v32, %v736_v38  ;;  %v622_v10 = vmul.f32 %v3719_v27, %v3675_v53  ;;  %v674_v14 = vmul.f32 %v3762_v17, %v3678_v54  ;;  %v723_v23 = vmul.f32 %v3771_v22, %v3681_v55  ;;  %v3823_v43 = vld [vmem:[%s3695_s28 + $0x61] sm:$0xff] }
 0x23f   : > { %v885_v63 = vadd.f32 %v869_v33, %v836_v46  ;;  %v689_v42 = vadd.f32 %v673_v24, %v637_v41  ;;  %v589_v32 = vadd.f32 %v573_v30, %v540_v20  ;;  %v838_v34 = vadd.f32 %v822_v1, %v786_v2  ;;  %v3828_v48 = vld [vmem:[%s3695_s28 + $0x62] sm:$0xff] }
 0x240   : > { %v837_v31 = vadd.f32 %v821_v18, %v785_v13  ;;  %v772_v33 = vmul.f32 %v3774_v28, %v3684_v56  ;;  %v824_v27 = vmul.f32 %v3815_v40, %v3687_v57  ;;  %v873_v46 = vmul.f32 %v3823_v43, %v3690_v58 }
 0x241   : > { %v934_v26 = vadd.f32 %v3728_v35, %v885_v63  ;;  %v738_v24 = vadd.f32 %v722_v29, %v689_v42  ;;  %v638_v38 = vadd.f32 %v622_v10, %v589_v32  ;;  %v887_v1 = vadd.f32 %v871_v44, %v838_v34 }
 0x242   : > { %v886_v18 = vadd.f32 %v870_v0, %v837_v31  ;;  %v922_v2 = vmul.f32 %v3828_v48, %v3693_v59  ;;  %v541_v13 = vmul.f32 %v3744_v60, %v3669_v51  ;;  %v574_v0 = vmul.f32 %v3747_v61, %v3672_v52 }
 0x243   : > { %v951_v35 = vadd.f32 %v3707_v21, %v934_v26  ;;  %v787_v20 = vadd.f32 %v771_v16, %v738_v24  ;;  %v690_v30 = vadd.f32 %v674_v14, %v638_v38  ;;  %v936_v63 = vadd.f32 %v920_v47, %v887_v1 }
 0x244   : > { %v935_v41 = vadd.f32 %v919_v19, %v886_v18  ;;  %v623_v10 = vmul.f32 %v3750_v62, %v3675_v53  ;;  %v675_v44 = vmul.f32 %v3788_v37, %v3678_v54  ;;  %v590_v14 = vadd.f32 %v574_v0, %v541_v13  ;;  %v3861_v0 = vld [vmem:[%s3695_s28 + $0x6a] sm:$0xff] }
 0x245   : > { %v967_v29 = vadd.f32 3.0, %v951_v35  ;;  %v839_v19 = vadd.f32 %v823_v45, %v787_v20  ;;  %v739_v16 = vadd.f32 %v723_v23, %v690_v30  ;;  %v953_v61 = vadd.f32 %v3707_v21, %v936_v63  ;;  %v3851_v45 = vld [vmem:[%s3695_s28 + $0x68] sm:$0xff] }
 0x246   : > { %v952_v60 = vadd.f32 %v3707_v21, %v935_v41  ;;  %v724_v47 = vmul.f32 %v3795_v36, %v3681_v55  ;;  %v773_v62 = vmul.f32 %v3798_v25, %v3684_v56  ;;  %v639_v34 = vadd.f32 %v623_v10, %v590_v14  ;;  %v3854_v23 = vld [vmem:[%s3695_s28 + $0x69] sm:$0xff] }
 0x247   : > { %v983_v31 = vmax.f32 %v967_v29, 0.0  ;;  %v888_v32 = vadd.f32 %v872_v39, %v839_v19  ;;  %v788_v26 = vadd.f32 %v772_v33, %v739_v16  ;;  %v969_v24 = vadd.f32 3.0, %v953_v61 }
 0x248   : > { %v968_v42 = vadd.f32 3.0, %v952_v60  ;;  %v825_v38 = vmul.f32 %v3851_v45, %v3687_v57  ;;  %v874_v1 = vmul.f32 %v3854_v23, %v3690_v58  ;;  %v691_v30 = vadd.f32 %v675_v44, %v639_v34 }
 0x249   : > { %v999_v18 = vmin.f32 %v983_v31, 6.0  ;;  %v937_v41 = vadd.f32 %v921_v49, %v888_v32  ;;  %v840_v20 = vadd.f32 %v824_v27, %v788_v26  ;;  %v985_v33 = vmax.f32 %v969_v24, 0.0 }
 0x24a   : > { %v984_v13 = vmax.f32 %v968_v42, 0.0  ;;  %v923_v29 = vmul.f32 %v3861_v0, %v3693_v59  ;;  %v542_v63 = vmul.f32 %v3762_v17, %v3669_v51  ;;  %v740_v14 = vadd.f32 %v724_v47, %v691_v30 }
 0x24b   : > { %v1015_v39 = vmul.f32 %v999_v18, %v951_v35  ;;  %v954_v19 = vadd.f32 %v3707_v21, %v937_v41  ;;  %v889_v16 = vadd.f32 %v873_v46, %v840_v20  ;;  %v1001_v49 = vmin.f32 %v985_v33, 6.0 }
 0x24c   : > { %v1000_v10 = vmin.f32 %v984_v13, 6.0  ;;  %v575_v27 = vmul.f32 %v3771_v22, %v3672_v52  ;;  %v624_v35 = vmul.f32 %v3774_v28, %v3675_v53  ;;  %v789_v26 = vadd.f32 %v773_v62, %v740_v14 }
 0x24d   : > { %v1031_v31 = vmul.f32 0.16666667, %v1015_v39  ;;  %v970_v42 = vadd.f32 3.0, %v954_v19  ;;  %v938_v32 = vadd.f32 %v922_v2, %v889_v16  ;;  %v1017_v18 = vmul.f32 %v1001_v49, %v953_v61 }
 0x24e   : > { %v1016_v44 = vmul.f32 %v1000_v10, %v952_v60  ;;  %v591_v24 = vadd.f32 %v575_v27, %v542_v63  ;;  %v841_v41 = vadd.f32 %v825_v38, %v789_v26  ;;  %v676_v2 = vmul.f32 %v3815_v40, %v3678_v54  ;;  %v3892_v27 = vld [vmem:[%s3695_s28 + $0x78] sm:$0xff] }
 0x24f   : > { %v1048_v34 = vpack.c.bf16 %v1031_v31, %v1031_v31  ;;  %v1085_v17 = vsel %vm99_vm0, %v1031_v31, 0.0  ;;  %v986_v46 = vmax.f32 %v970_v42, 0.0  ;;  %v955_v47 = vadd.f32 %v3707_v21, %v938_v32  ;;  %v3898_v32 = vld [vmem:[%s3695_s28 + $0x79] sm:$0xff] }
 0x250   : > { %v1032_v13 = vmul.f32 0.16666667, %v1016_v44  ;;  %v1033_v22 = vmul.f32 0.16666667, %v1017_v18  ;;  %v640_v28 = vadd.f32 %v624_v35, %v591_v24  ;;  %v725_v60 = vmul.f32 %v3823_v43, %v3681_v55 }
 0x251   : > { %1069 = vst.msk [vmem:[%s3875_s10] sm:$0xf] %vm1068_vm4, %v1048_v34  ;;  %v1002_v38 = vmin.f32 %v986_v46, 6.0  ;;  %v971_v20 = vadd.f32 3.0, %v955_v47  ;;  %v890_v39 = vadd.f32 %v874_v1, %v841_v41  ;;  %v774_v16 = vmul.f32 %v3828_v48, %v3684_v56  ;;  %v3909_v41 = vld [vmem:[%s3695_s28 + $0x7a] sm:$0xff] }
 0x252   : > { %v1049_v61 = vpack.c.bf16 %v1032_v13, %v1032_v13  ;;  %v1086_v62 = vsel %vm99_vm0, %v1032_v13, 0.0  ;;  %v1050_v30 = vpack.c.bf16 %v1033_v22, %v1033_v22  ;;  %v692_v10 = vadd.f32 %v676_v2, %v640_v28 }
 0x253   : > { %v1018_v33 = vmul.f32 %v1002_v38, %v954_v19  ;;  %v987_v63 = vmax.f32 %v971_v20, 0.0  ;;  %v1087_v14 = vadd.f32 %v1086_v62, %v1085_v17  ;;  %v1088_v31 = vsel %vm99_vm0, %v1033_v22, 0.0 }
 0x254   : > { %1070 = vst.msk [vmem:[%s3875_s10 + $0x4] sm:$0xf] %vm1068_vm4, %v1049_v61  ;;  %v939_v49 = vadd.f32 %v923_v29, %v890_v39  ;;  %v741_v44 = vadd.f32 %v725_v60, %v692_v10  ;;  %v826_v19 = vmul.f32 %v3892_v27, %v3687_v57  ;;  %v543_v26 = vmul.f32 %v3788_v37, %v3669_v51 }
 0x255   : > { %1071 = vst.msk [vmem:[%s3875_s10 + $0x8] sm:$0xf] %vm1068_vm4, %v1050_v30  ;;  %v1034_v35 = vmul.f32 0.16666667, %v1018_v33  ;;  %v1003_v1 = vmin.f32 %v987_v63, 6.0  ;;  %v576_v29 = vmul.f32 %v3795_v36, %v3672_v52  ;;  %v625_v34 = vmul.f32 %v3798_v25, %v3675_v53 }
 0x256   : > { %v956_v42 = vadd.f32 %v3707_v21, %v939_v49  ;;  %v790_v24 = vadd.f32 %v774_v16, %v741_v44  ;;  %v875_v13 = vmul.f32 %v3898_v32, %v3690_v58  ;;  %v677_v28 = vmul.f32 %v3851_v45, %v3678_v54 }
 0x257   : > { %v1051_v17 = vpack.c.bf16 %v1034_v35, %v1034_v35  ;;  %v1019_v18 = vmul.f32 %v1003_v1, %v955_v47  ;;  %v592_v22 = vadd.f32 %v576_v29, %v543_v26  ;;  %v1089_v37 = vadd.f32 %v1088_v31, %v1087_v14  ;;  %v3927_v14 = vld [vmem:[%s3695_s28 + $0x80] sm:$0xff] }
 0x258   : > { %v972_v46 = vadd.f32 3.0, %v956_v42  ;;  %v842_v25 = vadd.f32 %v826_v19, %v790_v24  ;;  %v924_v47 = vmul.f32 %v3909_v41, %v3693_v59  ;;  %v1090_v2 = vsel %vm99_vm0, %v1034_v35, 0.0  ;;  %v3930_v31 = vld [vmem:[%s3695_s28 + $0x81] sm:$0xff] }
 0x259   : > { %1072 = vst.msk [vmem:[%s3875_s10 + $0xc] sm:$0xf] %vm1068_vm4, %v1051_v17  ;;  %v1035_v36 = vmul.f32 0.16666667, %v1019_v18  ;;  %v641_v61 = vadd.f32 %v625_v34, %v592_v22  ;;  %v726_v62 = vmul.f32 %v3854_v23, %v3681_v55  ;;  %v775_v33 = vmul.f32 %v3861_v0, %v3684_v56 }
 0x25a   : > { %v988_v60 = vmax.f32 %v972_v46, 0.0  ;;  %v891_v20 = vadd.f32 %v875_v13, %v842_v25  ;;  %v544_v63 = vmul.f32 %v3815_v40, %v3669_v51  ;;  %v1091_v10 = vadd.f32 %v1090_v2, %v1089_v37  ;;  %v3949_v13 = vld [vmem:[%s3695_s28 + $0x82] sm:$0xff] }
 0x25b   : > { %v1052_v38 = vpack.c.bf16 %v1035_v36, %v1035_v36  ;;  %v693_v39 = vadd.f32 %v677_v28, %v641_v61  ;;  %v577_v49 = vmul.f32 %v3823_v43, %v3672_v52  ;;  %v626_v35 = vmul.f32 %v3828_v48, %v3675_v53  ;;  %v3963_v61 = vld [vmem:[%s3695_s28 + $0x91] sm:$0xff] }
 0x25c   : > { %v1004_v30 = vmin.f32 %v988_v60, 6.0  ;;  %v940_v16 = vadd.f32 %v924_v47, %v891_v20  ;;  %v827_v40 = vmul.f32 %v3927_v14, %v3687_v57  ;;  %v876_v19 = vmul.f32 %v3930_v31, %v3690_v58  ;;  %v3960_v60 = vld [vmem:[%s3695_s28 + $0x90] sm:$0xff] }
 0x25d   : > { %1073 = vst.msk [vmem:[%s3875_s10 + $0x10] sm:$0xf] %vm1068_vm4, %v1052_v38  ;;  %v742_v44 = vadd.f32 %v726_v62, %v693_v39  ;;  %v1092_v26 = vsel %vm99_vm0, %v1035_v36, 0.0  ;;  %v593_v34 = vadd.f32 %v577_v49, %v544_v63  ;;  %v678_v17 = vmul.f32 %v3892_v27, %v3678_v54 }
 0x25e   : > { %v1020_v1 = vmul.f32 %v1004_v30, %v956_v42  ;;  %v957_v29 = vadd.f32 %v3707_v21, %v940_v16  ;;  %v727_v42 = vmul.f32 %v3898_v32, %v3681_v55  ;;  %v545_v18 = vmul.f32 %v3851_v45, %v3669_v51 }
 0x25f   : > { %v791_v48 = vadd.f32 %v775_v33, %v742_v44  ;;  %v642_v46 = vadd.f32 %v626_v35, %v593_v34  ;;  %v578_v22 = vmul.f32 %v3854_v23, %v3672_v52  ;;  %v627_v28 = vmul.f32 %v3861_v0, %v3675_v53 }
 0x260   : > { %v1036_v43 = vmul.f32 0.16666667, %v1020_v1  ;;  %v973_v24 = vadd.f32 3.0, %v957_v29  ;;  %v925_v25 = vmul.f32 %v3949_v13, %v3693_v59  ;;  %v776_v47 = vmul.f32 %v3909_v41, %v3684_v56 }
 0x261   : > { %v843_v36 = vadd.f32 %v827_v40, %v791_v48  ;;  %v694_v2 = vadd.f32 %v678_v17, %v642_v46  ;;  %v594_v62 = vadd.f32 %v578_v22, %v545_v18  ;;  %v679_v23 = vmul.f32 %v3927_v14, %v3678_v54 }
 0x262   : > { %v1053_v37 = vpack.c.bf16 %v1036_v43, %v1036_v43  ;;  %v989_v45 = vmax.f32 %v973_v24, 0.0  ;;  %v3967_v0 = vadd.f32 %v1092_v26, %v1091_v10  ;;  %v828_v20 = vmul.f32 %v3960_v60, %v3687_v57 }
 0x263   : > { %v892_v38 = vadd.f32 %v876_v19, %v843_v36  ;;  %v877_v30 = vmul.f32 %v3963_v61, %v3690_v58  ;;  %v743_v33 = vadd.f32 %v727_v42, %v694_v2  ;;  %v643_v63 = vadd.f32 %v627_v28, %v594_v62  ;;  %v2833_v19 = vld [vmem:[%s3695_s28 + $0x92] sm:$0xff]  ;;  %v4008_v62 = vld [vmem:[%s3695_s28 + $0x9a] sm:$0xff] }
 0x264   : > { %1074 = vst.msk [vmem:[%s3875_s10 + $0x14] sm:$0xf] %vm1068_vm4, %v1053_v37  ;;  %v1005_v39 = vmin.f32 %v989_v45, 6.0  ;;  %v728_v16 = vmul.f32 %v3930_v31, %v3681_v55  ;;  %v777_v10 = vmul.f32 %v3949_v13, %v3684_v56  ;;  %v546_v35 = vmul.f32 %v3892_v27, %v3669_v51  ;;  %v3989_v42 = vld [vmem:[%s3695_s28 + $0x98] sm:$0xff] }
 0x265   : > { %v941_v49 = vadd.f32 %v925_v25, %v892_v38  ;;  %v579_v1 = vmul.f32 %v3898_v32, %v3672_v52  ;;  %v792_v40 = vadd.f32 %v776_v47, %v743_v33  ;;  %v695_v26 = vadd.f32 %v679_v23, %v643_v63  ;;  %v3999_v28 = vld [vmem:[%s3695_s28 + $0x99] sm:$0xff] }
 0x266   : > { %v1021_v44 = vmul.f32 %v1005_v39, %v957_v29  ;;  %v628_v34 = vmul.f32 %v3909_v41, %v3675_v53  ;;  %v926_v48 = vmul.f32 %v2833_v19, %v3693_v59  ;;  %v680_v27 = vmul.f32 %v3960_v60, %v3678_v54 }
 0x267   : > { %v958_v17 = vadd.f32 %v3707_v21, %v941_v49  ;;  %v595_v18 = vadd.f32 %v579_v1, %v546_v35  ;;  %v844_v29 = vadd.f32 %v828_v20, %v792_v40  ;;  %v744_v24 = vadd.f32 %v728_v16, %v695_v26  ;;  %v4028_v26 = vld [vmem:[%s3695_s28 + $0xa9] sm:$0xff] }
 0x268   : > { %v3993_v32 = vmul.f32 0.16666667, %v1021_v44  ;;  %v829_v46 = vmul.f32 %v3989_v42, %v3687_v57  ;;  %v1094_v41 = vsel %vm99_vm0, %v1036_v43, 0.0  ;;  %v729_v36 = vmul.f32 %v3963_v61, %v3681_v55 }
 0x269   : > { %v974_v22 = vadd.f32 3.0, %v958_v17  ;;  %v644_v37 = vadd.f32 %v628_v34, %v595_v18  ;;  %v893_v47 = vadd.f32 %v877_v30, %v844_v29  ;;  %v793_v45 = vadd.f32 %v777_v10, %v744_v24  ;;  %v4016_v30 = vld [vmem:[%s3695_s28 + $0xa8] sm:$0xff] }
 0x26a   : > { %v1054_v25 = vpack.c.bf16 %v3993_v32, %v3993_v32  ;;  %v878_v2 = vmul.f32 %v3999_v28, %v3690_v58  ;;  %v927_v43 = vmul.f32 %v4008_v62, %v3693_v59  ;;  %v778_v20 = vmul.f32 %v2833_v19, %v3684_v56  ;;  %v4031_v34 = vld [vmem:[%s3695_s28 + $0xaa] sm:$0xff] }
 0x26b   : > { %v990_v23 = vmax.f32 %v974_v22, 0.0  ;;  %v696_v38 = vadd.f32 %v680_v27, %v644_v37  ;;  %v942_v39 = vadd.f32 %v926_v48, %v893_v47  ;;  %v845_v33 = vadd.f32 %v829_v46, %v793_v45 }
 0x26c   : > { %1075 = vst.msk [vmem:[%s3875_s10 + $0x18] sm:$0xf] %vm1068_vm4, %v1054_v25  ;;  %v547_v63 = vmul.f32 %v3927_v14, %v3669_v51  ;;  %v580_v16 = vmul.f32 %v3930_v31, %v3672_v52  ;;  %v830_v35 = vmul.f32 %v4016_v30, %v3687_v57  ;;  %v629_v1 = vmul.f32 %v3949_v13, %v3675_v53 }
 0x26d   : > { %v1006_v49 = vmin.f32 %v990_v23, 6.0  ;;  %v745_v10 = vadd.f32 %v729_v36, %v696_v38  ;;  %v959_v44 = vadd.f32 %v3707_v21, %v942_v39  ;;  %v894_v40 = vadd.f32 %v878_v2, %v845_v33 }
 0x26e   : > { %v596_v48 = vadd.f32 %v580_v16, %v547_v63  ;;  %v681_v14 = vmul.f32 %v3989_v42, %v3678_v54  ;;  %v879_v27 = vmul.f32 %v4028_v26, %v3690_v58  ;;  %v928_v13 = vmul.f32 %v4031_v34, %v3693_v59 }
 0x26f   : > { %v1022_v31 = vmul.f32 %v1006_v49, %v958_v17  ;;  %v794_v18 = vadd.f32 %v778_v20, %v745_v10  ;;  %v975_v29 = vadd.f32 3.0, %v959_v44  ;;  %v943_v24 = vadd.f32 %v927_v43, %v894_v40  ;;  %v4053_v20 = vld [vmem:[%s3695_s28 + $0xb0] sm:$0xff] }
 0x270   : > { %v645_v46 = vadd.f32 %v629_v1, %v596_v48  ;;  %v730_v22 = vmul.f32 %v3999_v28, %v3681_v55  ;;  %v779_v17 = vmul.f32 %v4008_v62, %v3684_v56  ;;  %v548_v25 = vmul.f32 %v3960_v60, %v3669_v51  ;;  %v4062_v10 = vld [vmem:[%s3695_s28 + $0xb1] sm:$0xff] }
 0x271   : > { %v4041_v37 = vmul.f32 0.16666667, %v1022_v31  ;;  %v846_v36 = vadd.f32 %v830_v35, %v794_v18  ;;  %v991_v47 = vmax.f32 %v975_v29, 0.0  ;;  %v960_v45 = vadd.f32 %v3707_v21, %v943_v24  ;;  %v4069_v31 = vld [vmem:[%s3695_s28 + $0xb2] sm:$0xff] }
 0x272   : > { %v697_v2 = vadd.f32 %v681_v14, %v645_v46  ;;  %v581_v23 = vmul.f32 %v3963_v61, %v3672_v52  ;;  %v630_v39 = vmul.f32 %v2833_v19, %v3675_v53  ;;  %v831_v16 = vmul.f32 %v4053_v20, %v3687_v57 }
 0x273   : > { %v1055_v43 = vpack.c.bf16 %v4041_v37, %v4041_v37  ;;  %v895_v38 = vadd.f32 %v879_v27, %v846_v36  ;;  %v1007_v33 = vmin.f32 %v991_v47, 6.0  ;;  %v976_v63 = vadd.f32 3.0, %v960_v45 }
 0x274   : > { %v746_v60 = vadd.f32 %v730_v22, %v697_v2  ;;  %v1095_v49 = vadd.f32 %v1094_v41, %v3967_v0  ;;  %v597_v35 = vadd.f32 %v581_v23, %v548_v25  ;;  %v682_v1 = vmul.f32 %v4016_v30, %v3678_v54 }
 0x275   : > { %1076 = vst.msk [vmem:[%s3875_s10 + $0x1c] sm:$0xf] %vm1068_vm4, %v1055_v43  ;;  %v944_v61 = vadd.f32 %v928_v13, %v895_v38  ;;  %v1023_v40 = vmul.f32 %v1007_v33, %v959_v44  ;;  %v992_v48 = vmax.f32 %v976_v63, 0.0  ;;  %v880_v14 = vmul.f32 %v4062_v10, %v3690_v58  ;;  %v2805_v43 = vld [vmem:[%s3695_s28 + $0xc0] sm:$0xff] }
 0x276   : > { %v795_v19 = vadd.f32 %v779_v17, %v746_v60  ;;  %v929_v0 = vmul.f32 %v4069_v31, %v3693_v59  ;;  %v646_v41 = vadd.f32 %v630_v39, %v597_v35  ;;  %v731_v27 = vmul.f32 %v4028_v26, %v3681_v55  ;;  %v2821_v60 = vld [vmem:[%s3695_s28 + $0xc1] sm:$0xff] }
 0x277   : > { %v961_v18 = vadd.f32 %v3707_v21, %v944_v61  ;;  %v4076_v13 = vmul.f32 0.16666667, %v1023_v40  ;;  %v1008_v44 = vmin.f32 %v992_v48, 6.0  ;;  %v780_v24 = vmul.f32 %v4031_v34, %v3684_v56  ;;  %v2837_v48 = vld [vmem:[%s3695_s28 + $0xc2] sm:$0xff] }
 0x278   : > { %v847_v29 = vadd.f32 %v831_v16, %v795_v19  ;;  %v698_v22 = vadd.f32 %v682_v1, %v646_v41  ;;  %v549_v36 = vmul.f32 %v3989_v42, %v3669_v51  ;;  %v582_v17 = vmul.f32 %v3999_v28, %v3672_v52 }
 0x279   : > { %v977_v46 = vadd.f32 3.0, %v961_v18  ;;  %v1096_v25 = vsel %vm99_vm0, %v3993_v32, 0.0  ;;  %v1056_v47 = vpack.c.bf16 %v4076_v13, %v4076_v13  ;;  %v1024_v2 = vmul.f32 %v1008_v44, %v960_v45 }
 0x27a   : > { %v896_v23 = vadd.f32 %v880_v14, %v847_v29  ;;  %v747_v39 = vadd.f32 %v731_v27, %v698_v22  ;;  %v832_v33 = vmul.f32 %v2805_v43, %v3687_v57  ;;  %v598_v63 = vadd.f32 %v582_v17, %v549_v36 }
 0x27b   : > { %v993_v38 = vmax.f32 %v977_v46, 0.0  ;;  %1077 = vst.msk [vmem:[%s3875_s10 + $0x20] sm:$0xf] %vm1068_vm4, %v1056_v47  ;;  %v4092_v42 = vmul.f32 0.16666667, %v1024_v2  ;;  %v631_v32 = vmul.f32 %v4008_v62, %v3675_v53  ;;  %v683_v45 = vmul.f32 %v4053_v20, %v3678_v54 }
 0x27c   : > { %v945_v28 = vadd.f32 %v929_v0, %v896_v23  ;;  %v796_v61 = vadd.f32 %v780_v24, %v747_v39  ;;  %v881_v35 = vmul.f32 %v2821_v60, %v3690_v58  ;;  %v732_v14 = vmul.f32 %v4062_v10, %v3681_v55  ;;  %v2822_v39 = vld [vmem:[%s3695_s28 + $0xc9] sm:$0xff] }
 0x27d   : > { %v1009_v16 = vmin.f32 %v993_v38, 6.0  ;;  %v1057_v1 = vpack.c.bf16 %v4092_v42, %v4092_v42  ;;  %v647_v19 = vadd.f32 %v631_v32, %v598_v63  ;;  %v1097_v0 = vadd.f32 %v1096_v25, %v1095_v49  ;;  %v2806_v49 = vld [vmem:[%s3695_s28 + $0xc8] sm:$0xff] }
 0x27e   : > { %v962_v40 = vadd.f32 %v3707_v21, %v945_v28  ;;  %v848_v41 = vadd.f32 %v832_v33, %v796_v61  ;;  %v930_v27 = vmul.f32 %v2837_v48, %v3693_v59  ;;  %v1098_v44 = vsel %vm99_vm0, %v4041_v37, 0.0 }
 0x27f   : > { %v1025_v62 = vmul.f32 %v1009_v16, %v961_v18  ;;  %1078 = vst.msk [vmem:[%s3875_s10 + $0x24] sm:$0xf] %vm1068_vm4, %v1057_v1  ;;  %v699_v24 = vadd.f32 %v683_v45, %v647_v19  ;;  %v781_v46 = vmul.f32 %v4069_v31, %v3684_v56  ;;  %v550_v18 = vmul.f32 %v4016_v30, %v3669_v51  ;;  %v2838_v45 = vld [vmem:[%s3695_s28 + $0xca] sm:$0xff] }
 0x280   : > { %v978_v29 = vadd.f32 3.0, %v962_v40  ;;  %v897_v36 = vadd.f32 %v881_v35, %v848_v41  ;;  %v583_v37 = vmul.f32 %v4028_v26, %v3672_v52  ;;  %v833_v47 = vmul.f32 %v2806_v49, %v3687_v57 }
 0x281   : > { %v4113_v22 = vmul.f32 0.16666667, %v1025_v62  ;;  %v748_v25 = vadd.f32 %v732_v14, %v699_v24  ;;  %v632_v2 = vmul.f32 %v4031_v34, %v3675_v53  ;;  %v684_v30 = vmul.f32 %v2805_v43, %v3678_v54  ;;  %v2807_v14 = vld [vmem:[%s3695_s28 + $0xd8] sm:$0xff] }
 0x282   : > { %v994_v17 = vmax.f32 %v978_v29, 0.0  ;;  %v946_v38 = vadd.f32 %v930_v27, %v897_v36  ;;  %v599_v33 = vadd.f32 %v583_v37, %v550_v18  ;;  %v882_v26 = vmul.f32 %v2822_v39, %v3690_v58 }
 0x283   : > { %v1058_v23 = vpack.c.bf16 %v4113_v22, %v4113_v22  ;;  %v797_v28 = vadd.f32 %v781_v46, %v748_v25  ;;  %v733_v16 = vmul.f32 %v2821_v60, %v3681_v55  ;;  %v1099_v61 = vadd.f32 %v1098_v44, %v1097_v0  ;;  %v2823_v60 = vld [vmem:[%s3695_s28 + $0xd9] sm:$0xff] }
 0x284   : > { %v1010_v63 = vmin.f32 %v994_v17, 6.0  ;;  %v963_v32 = vadd.f32 %v3707_v21, %v946_v38  ;;  %v648_v34 = vadd.f32 %v632_v2, %v599_v33  ;;  %v931_v19 = vmul.f32 %v2838_v45, %v3693_v59 }
 0x285   : > { %1079 = vst.msk [vmem:[%s3875_s10 + $0x28] sm:$0xf] %vm1068_vm4, %v1058_v23  ;;  %v849_v1 = vadd.f32 %v833_v47, %v797_v28  ;;  %v782_v41 = vmul.f32 %v2837_v48, %v3684_v56  ;;  %v551_v27 = vmul.f32 %v4053_v20, %v3669_v51  ;;  %v1100_v29 = vsel %vm99_vm0, %v4076_v13, 0.0  ;;  %v2839_v20 = vld [vmem:[%s3695_s28 + $0xda] sm:$0xff] }
 0x286   : > { %v1026_v35 = vmul.f32 %v1010_v63, %v962_v40  ;;  %v979_v43 = vadd.f32 3.0, %v963_v32  ;;  %v700_v62 = vadd.f32 %v684_v30, %v648_v34  ;;  %v584_v40 = vmul.f32 %v4062_v10, %v3672_v52  ;;  %v2808_v28 = vld [vmem:[%s3695_s28 + $0xe0] sm:$0xff] }
 0x287   : > { %v898_v46 = vadd.f32 %v882_v26, %v849_v1  ;;  %v834_v36 = vmul.f32 %v2807_v14, %v3687_v57  ;;  %v633_v48 = vmul.f32 %v4069_v31, %v3675_v53  ;;  %v685_v13 = vmul.f32 %v2806_v49, %v3678_v54  ;;  %v2824_v1 = vld [vmem:[%s3695_s28 + $0xe1] sm:$0xff] }
 0x288   : > { %v1042_v24 = vmul.f32 0.16666667, %v1026_v35  ;;  %v995_v0 = vmax.f32 %v979_v43, 0.0  ;;  %v749_v44 = vadd.f32 %v733_v16, %v700_v62  ;;  %v600_v17 = vadd.f32 %v584_v40, %v551_v27 }
 0x289   : > { %v947_v37 = vadd.f32 %v931_v19, %v898_v46  ;;  %v1101_v25 = vadd.f32 %v1100_v29, %v1099_v61  ;;  %v883_v23 = vmul.f32 %v2823_v60, %v3690_v58  ;;  %v1102_v10 = vsel %vm99_vm0, %v4092_v42, 0.0 }
 0x28a   : > { %v1059_v18 = vpack.c.bf16 %v1042_v24, %v1042_v24  ;;  %v1011_v47 = vmin.f32 %v995_v0, 6.0  ;;  %v798_v2 = vadd.f32 %v782_v41, %v749_v44  ;;  %v649_v38 = vadd.f32 %v633_v48, %v600_v17  ;;  %v2840_v41 = vld [vmem:[%s3695_s28 + $0xe2] sm:$0xff] }
 0x28b   : > { %v964_v31 = vadd.f32 %v3707_v21, %v947_v37  ;;  %v734_v33 = vmul.f32 %v2822_v39, %v3681_v55  ;;  %v932_v49 = vmul.f32 %v2839_v20, %v3693_v59  ;;  %v783_v16 = vmul.f32 %v2838_v45, %v3684_v56 }
 0x28c   : > { %1080 = vst.msk [vmem:[%s3875_s10 + $0x2c] sm:$0xf] %vm1068_vm4, %v1059_v18  ;;  %v1027_v30 = vmul.f32 %v1011_v47, %v963_v32  ;;  %v850_v63 = vadd.f32 %v834_v36, %v798_v2  ;;  %v701_v34 = vadd.f32 %v685_v13, %v649_v38  ;;  %v1103_v61 = vadd.f32 %v1102_v10, %v1101_v25 }
 0x28d   : > { %v980_v26 = vadd.f32 3.0, %v964_v31  ;;  %v1104_v19 = vsel %vm99_vm0, %v4113_v22, 0.0  ;;  %v835_v32 = vmul.f32 %v2808_v28, %v3687_v57  ;;  %v884_v46 = vmul.f32 %v2824_v1, %v3690_v58 }
 0x28e   : > { %v1043_v42 = vmul.f32 0.16666667, %v1027_v30  ;;  %v899_v35 = vadd.f32 %v883_v23, %v850_v63  ;;  %v750_v39 = vadd.f32 %v734_v33, %v701_v34  ;;  %v1105_v45 = vadd.f32 %v1104_v19, %v1103_v61 }
 0x28f   : > { %v996_v14 = vmax.f32 %v980_v26, 0.0  ;;  %v1106_v40 = vsel %vm99_vm0, %v1042_v24, 0.0  ;;  %v933_v44 = vmul.f32 %v2840_v41, %v3693_v59  ;;  %v2912_v41 = vld [vmem:[%s4916_s0 + $0x20] sm:$0xff] (%p511_p0) }
 0x290   : > { %v1060_v43 = vpack.c.bf16 %v1043_v42, %v1043_v42  ;;  %v948_v62 = vadd.f32 %v932_v49, %v899_v35  ;;  %v799_v29 = vadd.f32 %v783_v16, %v750_v39  ;;  %v1107_v37 = vadd.f32 %v1106_v40, %v1105_v45 }
 0x291   : > { %v1012_v27 = vmin.f32 %v996_v14, 6.0  ;;  %v1108_v17 = vsel %vm99_vm0, %v1043_v42, 0.0  ;;  %v3344_v45 = vmov (%p511_p0), 0  }
 0x292   : > { %1081 = vst.msk [vmem:[%s3875_s10 + $0x30] sm:$0xf] %vm1068_vm4, %v1060_v43  ;;  %v965_v60 = vadd.f32 %v3707_v21, %v948_v62  ;;  %v851_v0 = vadd.f32 %v835_v32, %v799_v29  ;;  %v1109_v24 = vadd.f32 %v1108_v17, %v1107_v37  ;;  %v2915_v29 = vld [vmem:[%s4916_s0 + $0x38] sm:$0xff] (%p511_p0)  ;;  %3193 = vset.pattern.permute.xlu1 (%p511_p0), %v3344_v45 }
 0x293   : > { %v1028_v22 = vmul.f32 %v1012_v27, %v964_v31  ;;  %v2913_v27 = vld [vmem:[%s4916_s0 + $0x28] sm:$0xff] (%p511_p0)  ;;  %1236 = vperm.xlu1 (%p511_p0), %3193, %v3484_v15  }
 0x294   : > { %v981_v36 = vadd.f32 3.0, %v965_v60  ;;  %v900_v18 = vadd.f32 %v884_v46, %v851_v0  ;;  %v4951_v0 = vld [vmem:[#allocation19_spill] sm:$0xff] (%p511_p0) }
 0x295   : > { %v1044_v48 = vmul.f32 0.16666667, %v1028_v22  ;;  %v4950_v22 = vld [vmem:[#allocation15_spill] sm:$0xff] (%p511_p0) }
 0x296   : > { %v997_v20 = vmax.f32 %v981_v36, 0.0  ;;  %v949_v25 = vadd.f32 %v933_v44, %v900_v18  ;;  %1142 = vmatpush.msra.mxu1 (%p511_p0), %v4950_v22  ;;  %v4952_v44 = vld [vmem:[#allocation16_spill] sm:$0xff] (%p511_p0) }
 0x297   : > { %v1061_v13 = vpack.c.bf16 %v1044_v48, %v1044_v48  ;;  %v1110_v10 = vsel %vm99_vm0, %v1044_v48, 0.0 }
 0x298   : > { %v1013_v47 = vmin.f32 %v997_v20, 6.0  ;;  %v966_v2 = vadd.f32 %v3707_v21, %v949_v25  ;;  %v1111_v30 = vadd.f32 %v1110_v10, %v1109_v24  ;;  %1496 = vmatpush.bf16.msrb.mxu1 (%p511_p0), %v4951_v0 }
 0x299   : > { %1082 = vst.msk [vmem:[%s3875_s10 + $0x34] sm:$0xf] %vm1068_vm4, %v1061_v13 }
 0x29a   : > { %v1029_v23 = vmul.f32 %v1013_v47, %v965_v60  ;;  %v982_v31 = vadd.f32 3.0, %v966_v2  ;;  %v1416_v60 = vpack.c.bf16 (%p511_p0), %v2915_v29, %v2913_v27 }
 0x29c   : > { %v1045_v38 = vmul.f32 0.16666667, %v1029_v23  ;;  %v998_v33 = vmax.f32 %v982_v31, 0.0 }
 0x29e   : > { %v1062_v63 = vpack.c.bf16 %v1045_v38, %v1045_v38  ;;  %v1112_v49 = vsel %vm99_vm0, %v1045_v38, 0.0  ;;  %v1014_v28 = vmin.f32 %v998_v33, 6.0 }
 0x29f   : > { %v1113_v34 = vadd.f32 %v1112_v49, %v1111_v30 }
 0x2a0   : > { %1083 = vst.msk [vmem:[%s3875_s10 + $0x38] sm:$0xf] %vm1068_vm4, %v1062_v63  ;;  %v1030_v26 = vmul.f32 %v1014_v28, %v966_v2  ;;  %v4953_v63 = vld [vmem:[#allocation18_spill] sm:$0xff] (%p511_p0) }
 0x2a2   : > { %v1046_v16 = vmul.f32 0.16666667, %v1030_v26 }
 0x2a4   : > { %v1063_v61 = vpack.c.bf16 %v1046_v16, %v1046_v16  ;;  %v1114_v42 = vsel %vm99_vm0, %v1046_v16, 0.0 }
 0x2a5   : > { %v1115_v35 = vadd.f32 %v1114_v42, %v1113_v34 }
 0x2a6   : > { %1084 = vst.msk [vmem:[%s3875_s10 + $0x3c] sm:$0xf] %vm1068_vm4, %v1063_v61 }
 0x2a7   : > { %v1116_v1 = vrot.slane %v1115_v35, 4 }
 0x2a9   : > { %v1117_v19 = vadd.f32 %v1116_v1, %v1115_v35 }
 0x2ab   : > { %v1118_v14 = vrot.slane %v1117_v19, 2 }
 0x2ad   : > { %v1119_v39 = vadd.f32 %v1118_v14, %v1117_v19  ;;  %v3117_v47 = vld [vmem:[#allocation3 + $0x38] sm:$0xff] (%p511_p0)  ;;  %v3116_v31 = vld [vmem:[#allocation3 + $0x30] sm:$0xff] (%p511_p0)  ;;  %v3115_v28 = vld [vmem:[#allocation3 + $0x28] sm:$0xff] (%p511_p0) }
 0x2ae   :  { %v3125_v2 = vld [vmem:[#allocation3 + $0x78] sm:$0xff] (%p511_p0)  ;;  %v1344_v24 = vsel (%p511_p0), %vm99_vm0, %v3117_v47, 0  ;;  %v3124_v38 = vld [vmem:[#allocation3 + $0x70] sm:$0xff] (%p511_p0)  ;;  %v1341_v33 = vsel (%p511_p0), %vm99_vm0, %v3116_v31, 0  ;;  %v3123_v26 = vld [vmem:[#allocation3 + $0x68] sm:$0xff] (%p511_p0)  ;;  %v1338_v34 = vsel (%p511_p0), %vm99_vm0, %v3115_v28, 0 }
 0x2af   : > { %v1120_v32 = vrot.slane %v1119_v39, 1  ;;  %v1368_v23 = vsel (%p511_p0), %vm99_vm0, %v3125_v2, 0  ;;  %1370 = vmatpush.bf16.xpose.msra.mxu3 (%p511_p0), %v1344_v24  ;;  %v1365_v30 = vsel (%p511_p0), %vm99_vm0, %v3124_v38, 0  ;;  %v1362_v16 = vsel (%p511_p0), %vm99_vm0, %v3123_v26, 0  ;;  %v3114_v42 = vld [vmem:[#allocation3 + $0x20] sm:$0xff] (%p511_p0)  ;;  %v3112_v27 = vld [vmem:[#allocation3 + $0x10] sm:$0xff] (%p511_p0) }
 0x2b0   :  { %1384 = vmatpush.bf16.xpose.msra.mxu2 (%p511_p0), %v1368_v23  ;;  %v3122_v35 = vld [vmem:[#allocation3 + $0x60] sm:$0xff] (%p511_p0)  ;;  %v1335_v1 = vsel (%p511_p0), %vm99_vm0, %v3114_v42, 0  ;;  %v1329_v29 = vsel (%p511_p0), %vm99_vm0, %v3112_v27, 0 }
 0x2b1   : > { %v1121_v43 = vadd.f32 %v1120_v32, %v1119_v39  ;;  %513 = sbr.rel (!%p511_p0) target bundleno = 553 (0x229), region = 90  ;;  %v1359_v19 = vsel (%p511_p0), %vm99_vm0, %v3122_v35, 0  ;;  %v3113_v39 = vld [vmem:[#allocation3 + $0x18] sm:$0xff] (%p511_p0) }
 0x2b2   :  { %v3121_v32 = vld [vmem:[#allocation3 + $0x58] sm:$0xff] (%p511_p0) }
 0x2b3   : > { %v1122_v62 = vadd.f32 %v3322_v50, %v1121_v43   ;;  %v1332_v43 = vsel (%p511_p0), %vm99_vm0, %v3113_v39, 0 }
 0x2b5   : > { %v4949_v50 = vmov %v1122_v62  ;;  %v1123_v40 = vmul.f32 (%p511_p0), 0.00390625, %v1122_v62  ;;  %v1356_v62 = vsel (%p511_p0), %vm99_vm0, %v3121_v32, 0 }
 0x2b6   :  { %v2914_v50 = vld [vmem:[%s4916_s0 + $0x30] sm:$0xff] }
 0x2b7   :  { %v1415_v46 = vpack.c.bf16 %v2914_v50, %v2912_v41  ;;  %2843 = vmatmul.msk.f32.vlgmr.msra.gmra.mxu1 %vm99_vm0, %v1123_v40  ;;  %1371 = vmatpush.bf16.xpose.msra.mxu3 %v1341_v33  ;;  %v3120_v50 = vld [vmem:[#allocation3 + $0x50] sm:$0xff]  ;;  %v3119_v40 = vld [vmem:[#allocation3 + $0x48] sm:$0xff] }
 0x2b8   :  { %1385 = vmatpush.bf16.xpose.msra.mxu2 %v1365_v30 }
 0x2b9   :  { %1417 = vxpose.binary.xlu0.c.b16.start.end [1/2] (short) %v1416_v60, %v1415_v46, 128  ;;  %v1353_v46 = vsel %vm99_vm0, %v3120_v50, 0  ;;  %v3111_v60 = vld [vmem:[#allocation3 + $0x8] sm:$0xff]  ;;  %v4956_v50 = vld [vmem:[#allocation17_spill] sm:$0xff] }
 0x2ba   :  { %v1326_v22 = vsel %vm99_vm0, %v3111_v60, 0  ;;  %v4958_v60 = vunpack.c.h.bf16 %v4956_v50 }
 0x2bf   :  { %1372 = vmatpush.bf16.xpose.msra.mxu3 %v1338_v34 }
 0x2c0   :  { %1386 = vmatpush.bf16.xpose.msra.mxu2 %v1362_v16 }
 0x2c7   :  { %1373 = vmatpush.bf16.xpose.msra.mxu3 %v1335_v1 }
 0x2c8   :  { %1387 = vmatpush.bf16.xpose.msra.mxu2 %v1359_v19 }
 0x2cf   :  { %1374 = vmatpush.bf16.xpose.msra.mxu3 %v1332_v43 }
 0x2d0   :  { %1388 = vmatpush.bf16.xpose.msra.mxu2 %v1356_v62 }
 0x2d7   :  { %1375 = vmatpush.bf16.xpose.msra.mxu3 %v1329_v29  ;;  %v4957_v29 = vunpack.c.l.bf16 %v4956_v50 }
 0x2d8   :  { %1389 = vmatpush.bf16.xpose.msra.mxu2 %v1353_v46 }
 0x2df   :  { %1376 = vmatpush.bf16.xpose.msra.mxu3 %v1326_v22 }
 0x320   :  { %3192 = vset.pattern.permute.xlu0 %v3344_v45 }
 0x334   :  { %v1144_v15 = vpop.f32.mrf.mxu1 }
 0x335   :  { %v1145_v36 = vadd.f32 %v1144_v15, %v4952_v44  ;;  %v1350_v15 = vsel %vm99_vm0, %v3119_v40, 0 }
 0x336   :  { %1390 = vmatpush.bf16.xpose.msra.mxu2 %v1350_v15 }
 0x337   :  { %v1147_v48 = vmax.f32 %v1145_v36, 0.0  ;;  %v3110_v36 = vld [vmem:[#allocation3] sm:$0xff] }
 0x339   :  { %2844 = vmatmul.msk.f32.vlgmr.msrb.gmra.mxu2 %vm179_vm3, %v1147_v48  ;;  %v3118_v48 = vld [vmem:[#allocation3 + $0x40] sm:$0xff] }
 0x33a   :  { %v1347_v47 = vsel %vm99_vm0, %v3118_v48, 0 }
 0x33e   :  { %1391 = vmatpush.bf16.xpose.msra.mxu2 %v1347_v47 }
 0x365   :  { %v1425_v18 = vpop.trf.xlu0 }
 0x366   :  { %2916 = vmatmul.msk.bf16.vlgmr.msrb.gmra.mxu1 %vm179_vm3, %v1425_v18  ;;  %v4954_v18 = vld [vmem:[#allocation20_spill] sm:$0xff] }
 0x36d   :  { %v4214_v37 = vpop.trf.xlu0 }
 0x375   :  { %v1427_v20 = vpop.trf.xlu0 }
 0x376   :  { %2917 = vmatmul.msk.bf16.gmra.mxu1 %vm179_vm3, %v1427_v20  ;;  %v4936_v20 = vrot.slane %v4954_v18, 3 }
 0x37d   :  { %v4217_v17 = vpop.trf.xlu0 }
 0x385   :  { %v1429_v13 = vpop.trf.xlu0 }
 0x386   :  { %2918 = vmatmul.msk.bf16.gmra.mxu1 %vm179_vm3, %v1429_v13  ;;  %v1323_v13 = vsel %vm99_vm0, %v3110_v36, 0 }
 0x387   :  { %1377 = vmatpush.bf16.xpose.msra.mxu3 %v1323_v13 }
 0x38d   :  { %v4220_v25 = vpop.trf.xlu0 }
 0x38f   :  { %3147 = vmatpush.bf16.msrb.mxu3 %v4951_v0 }
 0x395   :  { %v1431_v10 = vpop.trf.xlu0 }
 0x396   :  { %2919 = vmatmul.msk.bf16.gmra.mxu1 %vm179_vm3, %v1431_v10 }
 0x397   :  { %1231 = vperm.xlu0 %3192, %v4953_v63  }
 0x39d   :  { %v4228_v49 = vpop.trf.xlu0 }
 0x3a5   :  { %v1433_v61 = vpop.trf.xlu0 }
 0x3a6   :  { %2920 = vmatmul.msk.bf16.gmra.mxu1 %vm179_vm3, %v1433_v61  ;;  %v4955_v61 = vld [vmem:[#allocation21_spill] sm:$0xff] }
 0x3ad   :  { %v4235_v14 = vpop.trf.xlu0 }
 0x3b5   :  { %v1435_v41 = vpop.trf.xlu0 }
 0x3b6   :  { %2921 = vmatmul.msk.bf16.gmra.mxu1 %vm179_vm3, %v1435_v41 }
 0x3bc   :  { %v1171_v2 = vpop.f32.mrf.mxu2 }
 0x3bd   :  { %v4242_v45 = vpop.trf.xlu0  ;;  %v1172_v24 = vadd.f32 %v1171_v2, %v4936_v20 }
 0x3bf   :  { %v2845_v23 = vmul.f32 -1.442695, %v1172_v24 }
 0x3c1   :  { %3194 = vpow2.f32 %v2845_v23 }
 0x3c5   :  { %v1437_v44 = vpop.trf.xlu0 }
 0x3c6   :  { %2922 = vmatmul.msk.bf16.gmra.mxu1 %vm179_vm3, %v1437_v44 }
 0x3c7   :  { %v3195_v31 = vpop.eup %3194 }
 0x3c8   :  { %v1177_v33 = vadd.f32 1.0, %v3195_v31 }
 0x3ca   :  { %3196 = vrcp.f32 %v1177_v33  ;;  %v1189_v26 = vand.u32 2147483648, %v1177_v33  ;;  %v1187_v16 = vand.u32 2147483647, %v1177_v33  ;;  %vm1183_vm6 = vweird.f32 %v1177_v33 }
 0x3cc   :  { %v1190_v19 = vor.u32 1.1754944e-38, %v1189_v26  ;;  %vm1188_vm8 = vcmp.eq.f32.partialorder %v1187_v16, 8.507059e+37 }
 0x3cd   :  { %v4253_v10 = vpop.trf.xlu0 }
 0x3d0   :  { %v3197_v30 = vpop.eup %3196 }
 0x3d1   :  { %v1179_v63 = vmul.f32 %v3197_v30, %v1177_v33  ;;  %vm1184_vm5 = vweird.f32 %v3197_v30 }
 0x3d2   :  { %vm1185_vm7 = vmor %vm1183_vm6, %vm1184_vm5 }
 0x3d3   :  { %v1180_v28 = vsub.f32 1.0, %v1179_v63 }
 0x3d5   :  { %v1439_v38 = vpop.trf.xlu0  ;;  %v1181_v0 = vmul.f32 %v3197_v30, %v1180_v28 }
 0x3d6   :  { %2923 = vmatmul.msk.bf16.gmra.mxu1 %vm179_vm3, %v1439_v38 }
 0x3d7   :  { %v1182_v35 = vadd.f32 %v3197_v30, %v1181_v0 }
 0x3d9   :  { %v1186_v39 = vsel %vm1185_vm7, %v3197_v30, %v1182_v35 }
 0x3da   :  { %v1191_v43 = vsel %vm1188_vm8, %v1190_v19, %v1186_v39 }
 0x3db   :  { %v1193_v62 = vperm.slane %v1191_v43, 0 }
 0x3dd   :  { %v1194_v46 = vmul.f32 %v4957_v29, %v1193_v62  ;;  %v1195_v40 = vmul.f32 %v4958_v60, %v1193_v62 }
 0x3df   :  { %v1196_v44 = vpack.c.bf16 %v1195_v40, %v1194_v46 }
 0x3e1   :  { %2910 = vmatmul.msk.bf16.vlgmr.msra.gmra.mxu3 %vm99_vm0, %v1196_v44  ;;  %2911 = vmatmul.msk.bf16.vlgmr.msra.gmra.mxu2 %vm99_vm0, %v1196_v44 }
 0x3e3   :  { %v1498_v34 = vpop.f32.mrf.mxu1 }
 0x3e4   :  { %v1499_v42 = vadd.f32 %v1498_v34, %v4955_v61 }
 0x3e6   :  { %v1578_v1 = vadd.f32 3.0, %v1499_v42  ;;  %2924 = vmatmul.msk.bf16.gmra.mxu1 %vm179_vm3, %v4214_v37 }
 0x3e8   :  { %v1610_v32 = vmax.f32 %v1578_v1, 0.0 }
 0x3ea   :  { %v1642_v41 = vmin.f32 %v1610_v32, 6.0 }
 0x3eb   :  { %v1500_v27 = vpop.f32.mrf.mxu1 }
 0x3ec   :  { %v1674_v22 = vmul.f32 %v1642_v41, %v1499_v42  ;;  %v1501_v15 = vadd.f32 %v1500_v27, %v4955_v61 }
 0x3ee   :  { %v1706_v37 = vmul.f32 0.16666667, %v1674_v22  ;;  %v1579_v36 = vadd.f32 3.0, %v1501_v15 }
 0x3f0   :  { %1738 = vst.msk [vmem:[#allocation2 + $0x19] sm:$0xff] %vm99_vm0, %v1706_v37  ;;  %v1611_v48 = vmax.f32 %v1579_v36, 0.0 }
 0x3f1   :  { %2928 = vmatmul.msk.bf16.vlgmr.msrb.gmra.mxu3 %vm179_vm3, %v4235_v14 }
 0x3f2   :  { %v1643_v18 = vmin.f32 %v1611_v48, 6.0 }
 0x3f3   :  { %v1503_v13 = vpop.f32.mrf.mxu1 }
 0x3f4   :  { %v1675_v47 = vmul.f32 %v1643_v18, %v1501_v15  ;;  %v1504_v2 = vadd.f32 %v1503_v13, %v4955_v61 }
 0x3f6   :  { %v1707_v24 = vmul.f32 0.16666667, %v1675_v47  ;;  %v1580_v23 = vadd.f32 3.0, %v1504_v2  ;;  %2925 = vmatmul.msk.bf16.gmra.mxu1 %vm179_vm3, %v4217_v17 }
 0x3f8   :  { %1739 = vst.msk [vmem:[#allocation2 + $0x21] sm:$0xff] %vm99_vm0, %v1707_v24  ;;  %v1612_v31 = vmax.f32 %v1580_v23, 0.0 }
 0x3fa   :  { %v1644_v38 = vmin.f32 %v1612_v31, 6.0 }
 0x3fb   :  { %v1505_v33 = vpop.f32.mrf.mxu1 }
 0x3fc   :  { %v1676_v30 = vmul.f32 %v1644_v38, %v1504_v2  ;;  %v1506_v63 = vadd.f32 %v1505_v33, %v4955_v61 }
 0x3fe   :  { %v1708_v28 = vmul.f32 0.16666667, %v1676_v30  ;;  %v1581_v26 = vadd.f32 3.0, %v1506_v63 }
 0x400   :  { %1740 = vst.msk [vmem:[#allocation2 + $0x31] sm:$0xff] %vm99_vm0, %v1708_v28  ;;  %v1613_v34 = vmax.f32 %v1581_v26, 0.0  ;;  %v1440_v28 = vpop.trf.xlu0 }
 0x401   :  { %2929 = vmatmul.msk.bf16.gmra.mxu3 %vm179_vm3, %v4242_v45 }
 0x402   :  { %v1645_v0 = vmin.f32 %v1613_v34, 6.0 }
 0x403   :  { %v1508_v16 = vpop.f32.mrf.mxu1 }
 0x404   :  { %v1677_v42 = vmul.f32 %v1645_v0, %v1506_v63  ;;  %v1509_v17 = vadd.f32 %v1508_v16, %v4955_v61 }
 0x406   :  { %v1709_v35 = vmul.f32 0.16666667, %v1677_v42  ;;  %v1582_v1 = vadd.f32 3.0, %v1509_v17  ;;  %2926 = vmatmul.msk.bf16.gmra.mxu1 %vm179_vm3, %v4220_v25 }
 0x408   :  { %1741 = vst.msk [vmem:[#allocation2 + $0x39] sm:$0xff] %vm99_vm0, %v1709_v35  ;;  %v1614_v19 = vmax.f32 %v1582_v1, 0.0 }
 0x40a   :  { %v1646_v39 = vmin.f32 %v1614_v19, 6.0 }
 0x40b   :  { %v1510_v32 = vpop.f32.mrf.mxu1 }
 0x40c   :  { %v1678_v43 = vmul.f32 %v1646_v39, %v1509_v17  ;;  %v1511_v14 = vadd.f32 %v1510_v32, %v4955_v61 }
 0x40e   :  { %v1710_v62 = vmul.f32 0.16666667, %v1678_v43  ;;  %v1583_v41 = vadd.f32 3.0, %v1511_v14 }
 0x410   :  { %1742 = vst.msk [vmem:[#allocation2 + $0x49] sm:$0xff] %vm99_vm0, %v1710_v62  ;;  %v1615_v27 = vmax.f32 %v1583_v41, 0.0 }
 0x411   :  { %2930 = vmatmul.msk.bf16.gmra.mxu3 %vm179_vm3, %v4253_v10 }
 0x412   :  { %v1647_v50 = vmin.f32 %v1615_v27, 6.0 }
 0x413   :  { %v1513_v29 = vpop.f32.mrf.mxu1 }
 0x414   :  { %v1679_v46 = vmul.f32 %v1647_v50, %v1511_v14  ;;  %v1514_v25 = vadd.f32 %v1513_v29, %v4955_v61 }
 0x416   :  { %v1711_v60 = vmul.f32 0.16666667, %v1679_v46  ;;  %v1584_v40 = vadd.f32 3.0, %v1514_v25  ;;  %2927 = vmatmul.msk.bf16.gmra.mxu1 %vm179_vm3, %v4228_v49 }
 0x418   :  { %1743 = vst.msk [vmem:[#allocation2 + $0x51] sm:$0xff] %vm99_vm0, %v1711_v60  ;;  %v1616_v22 = vmax.f32 %v1584_v40, 0.0 }
 0x41a   :  { %v1648_v15 = vmin.f32 %v1616_v22, 6.0 }
 0x41b   :  { %v1515_v44 = vpop.f32.mrf.mxu1 }
 0x41c   :  { %v1680_v37 = vmul.f32 %v1648_v15, %v1514_v25  ;;  %v1516_v45 = vadd.f32 %v1515_v44, %v4955_v61 }
 0x41e   :  { %v1712_v36 = vmul.f32 0.16666667, %v1680_v37  ;;  %v1585_v48 = vadd.f32 3.0, %v1516_v45 }
 0x420   :  { %1744 = vst.msk [vmem:[#allocation2 + $0x61] sm:$0xff] %vm99_vm0, %v1712_v36  ;;  %v1617_v18 = vmax.f32 %v1585_v48, 0.0 }
 0x421   :  { %2931 = vmatmul.msk.bf16.gmra.mxu3 %vm179_vm3, %v1440_v28 }
 0x422   :  { %v1649_v13 = vmin.f32 %v1617_v18, 6.0 }
 0x423   :  { %v1518_v47 = vpop.f32.mrf.mxu1 }
 0x424   :  { %v1681_v2 = vmul.f32 %v1649_v13, %v1516_v45  ;;  %v1519_v49 = vadd.f32 %v1518_v47, %v4955_v61 }
 0x426   :  { %v1713_v24 = vmul.f32 0.16666667, %v1681_v2  ;;  %v1586_v23 = vadd.f32 3.0, %v1519_v49 }
 0x428   :  { %1745 = vst.msk [vmem:[#allocation2 + $0x69] sm:$0xff] %vm99_vm0, %v1713_v24  ;;  %v1618_v31 = vmax.f32 %v1586_v23, 0.0 }
 0x42a   :  { %v1650_v38 = vmin.f32 %v1618_v31, 6.0 }
 0x42b   :  { %v1520_v33 = vpop.f32.mrf.mxu1 }
 0x42c   :  { %v1682_v30 = vmul.f32 %v1650_v38, %v1519_v49  ;;  %v1521_v63 = vadd.f32 %v1520_v33, %v4955_v61 }
 0x42e   :  { %v1714_v10 = vmul.f32 0.16666667, %v1682_v30  ;;  %v1587_v26 = vadd.f32 3.0, %v1521_v63 }
 0x430   :  { %1746 = vst.msk [vmem:[#allocation2 + $0x79] sm:$0xff] %vm99_vm0, %v1714_v10  ;;  %v1619_v34 = vmax.f32 %v1587_v26, 0.0 }
 0x432   :  { %v1651_v0 = vmin.f32 %v1619_v34, 6.0 }
 0x433   :  { %v1523_v16 = vpop.f32.mrf.mxu1 }
 0x434   :  { %v1683_v42 = vmul.f32 %v1651_v0, %v1521_v63  ;;  %v1524_v17 = vadd.f32 %v1523_v16, %v4955_v61 }
 0x436   :  { %v1715_v35 = vmul.f32 0.16666667, %v1683_v42  ;;  %v1588_v1 = vadd.f32 3.0, %v1524_v17 }
 0x438   :  { %1747 = vst.msk [vmem:[#allocation2 + $0x81] sm:$0xff] %vm99_vm0, %v1715_v35  ;;  %v1620_v19 = vmax.f32 %v1588_v1, 0.0 }
 0x43a   :  { %v1652_v39 = vmin.f32 %v1620_v19, 6.0 }
 0x43b   :  { %v1525_v32 = vpop.f32.mrf.mxu1 }
 0x43c   :  { %v1684_v43 = vmul.f32 %v1652_v39, %v1524_v17  ;;  %v1526_v14 = vadd.f32 %v1525_v32, %v4955_v61 }
 0x43e   :  { %v1716_v62 = vmul.f32 0.16666667, %v1684_v43  ;;  %v1589_v41 = vadd.f32 3.0, %v1526_v14 }
 0x440   :  { %1748 = vst.msk [vmem:[#allocation2 + $0x91] sm:$0xff] %vm99_vm0, %v1716_v62  ;;  %v1621_v27 = vmax.f32 %v1589_v41, 0.0 }
 0x442   :  { %v1653_v50 = vmin.f32 %v1621_v27, 6.0  ;;  %v4312_v27 = vpop.permute.xlu0 %1231 }
 0x443   :  { %v1528_v29 = vpop.f32.mrf.mxu1 }
 0x444   :  { %v1685_v46 = vmul.f32 %v1653_v50, %v1526_v14  ;;  %v1529_v25 = vadd.f32 %v1528_v29, %v4955_v61 }
 0x446   :  { %v1717_v60 = vmul.f32 0.16666667, %v1685_v46  ;;  %v1590_v40 = vadd.f32 3.0, %v1529_v25  ;;  %v1398_v46 = vld [vmem:[%s4916_s0] sm:$0xff] }
 0x448   :  { %1749 = vst.msk [vmem:[#allocation2 + $0x99] sm:$0xff] %vm99_vm0, %v1717_v60  ;;  %v1622_v22 = vmax.f32 %v1590_v40, 0.0  ;;  %v1399_v60 = vld [vmem:[%s4916_s0 + $0x8] sm:$0xff] }
 0x44a   :  { %v1654_v15 = vmin.f32 %v1622_v22, 6.0 }
 0x44b   :  { %v1530_v44 = vpop.f32.mrf.mxu1 }
 0x44c   :  { %v1686_v37 = vmul.f32 %v1654_v15, %v1529_v25  ;;  %v1531_v45 = vadd.f32 %v1530_v44, %v4955_v61 }
 0x44e   :  { %v1718_v36 = vmul.f32 0.16666667, %v1686_v37  ;;  %v1591_v48 = vadd.f32 3.0, %v1531_v45 }
 0x450   :  { %1750 = vst.msk [vmem:[#allocation2 + $0xa9] sm:$0xff] %vm99_vm0, %v1718_v36  ;;  %v1623_v18 = vmax.f32 %v1591_v48, 0.0 }
 0x452   :  { %v1655_v13 = vmin.f32 %v1623_v18, 6.0 }
 0x453   :  { %v1533_v47 = vpop.f32.mrf.mxu1 }
 0x454   :  { %v1687_v2 = vmul.f32 %v1655_v13, %v1531_v45  ;;  %v1534_v49 = vadd.f32 %v1533_v47, %v4955_v61  ;;  %v4324_v47 = vpop.permute.xlu1 %1236 }
 0x455   :  { %4959 = vst [vmem:[#allocation14_spill] sm:$0xff] %v4324_v47 }
 0x456   :  { %v1719_v24 = vmul.f32 0.16666667, %v1687_v2  ;;  %v1592_v23 = vadd.f32 3.0, %v1534_v49 }
 0x458   :  { %1751 = vst.msk [vmem:[#allocation2 + $0xb1] sm:$0xff] %vm99_vm0, %v1719_v24  ;;  %v1624_v31 = vmax.f32 %v1592_v23, 0.0  ;;  %v1400_v24 = vld [vmem:[%s4916_s0 + $0x10] sm:$0xff] }
 0x45a   :  { %v1656_v38 = vmin.f32 %v1624_v31, 6.0  ;;  %v1401_v31 = vld [vmem:[%s4916_s0 + $0x18] sm:$0xff] }
 0x45b   :  { %v1535_v33 = vpop.f32.mrf.mxu1 }
 0x45c   :  { %v1688_v30 = vmul.f32 %v1656_v38, %v1534_v49  ;;  %v1536_v63 = vadd.f32 %v1535_v33, %v4955_v61 }
 0x45e   :  { %v1720_v28 = vmul.f32 0.16666667, %v1688_v30  ;;  %v1593_v10 = vadd.f32 3.0, %v1536_v63 }
 0x460   :  { %1752 = vst.msk [vmem:[#allocation2 + $0xc1] sm:$0xff] %vm99_vm0, %v1720_v28  ;;  %v1625_v26 = vmax.f32 %v1593_v10, 0.0 }
 0x462   :  { %v1657_v34 = vmin.f32 %v1625_v26, 6.0 }
 0x463   :  { %v1538_v0 = vpop.f32.mrf.mxu1 }
 0x464   :  { %v1689_v16 = vmul.f32 %v1657_v34, %v1536_v63  ;;  %v1539_v42 = vadd.f32 %v1538_v0, %v4955_v61  ;;  %v1379_v29 = vpop.f32.mrf.mxu3  ;;  %v1393_v25 = vpop.f32.mrf.mxu2 }
 0x465   :  { %v1380_v40 = vadd.f32 %v1379_v29, %v4312_v27  ;;  %v1394_v22 = vadd.f32 %v1393_v25, %v4312_v27 }
 0x466   :  { %v1721_v17 = vmul.f32 0.16666667, %v1689_v16  ;;  %v1594_v35 = vadd.f32 3.0, %v1539_v42 }
 0x467   :  { %v1402_v45 = vadd.f32 %v1398_v46, %v1380_v40  ;;  %v1403_v36 = vadd.f32 %v1399_v60, %v1394_v22 }
 0x468   :  { %1753 = vst.msk [vmem:[#allocation2 + $0xc9] sm:$0xff] %vm99_vm0, %v1721_v17  ;;  %v1626_v1 = vmax.f32 %v1594_v35, 0.0 }
 0x469   :  { %1406 = vst [vmem:[#allocation10] sm:$0xff] %v1402_v45 }
 0x46a   :  { %v1658_v19 = vmin.f32 %v1626_v1, 6.0  ;;  %1407 = vst [vmem:[#allocation10 + $0x8] sm:$0xff] %v1403_v36 }
 0x46b   :  { %v1540_v39 = vpop.f32.mrf.mxu1 }
 0x46c   :  { %v1690_v32 = vmul.f32 %v1658_v19, %v1539_v42  ;;  %v1541_v43 = vadd.f32 %v1540_v39, %v4955_v61  ;;  %v1381_v49 = vpop.f32.mrf.mxu3  ;;  %v1395_v23 = vpop.f32.mrf.mxu2 }
 0x46d   :  { %v1382_v38 = vadd.f32 %v1381_v49, %v4324_v47  ;;  %v1396_v33 = vadd.f32 %v1395_v23, %v4324_v47 }
 0x46e   :  { %v1722_v14 = vmul.f32 0.16666667, %v1690_v32  ;;  %v1595_v62 = vadd.f32 3.0, %v1541_v43 }
 0x46f   :  { %v1404_v10 = vadd.f32 %v1400_v24, %v1382_v38  ;;  %v1405_v26 = vadd.f32 %v1401_v31, %v1396_v33 }
 0x470   :  { %1754 = vst.msk [vmem:[#allocation2 + $0xd9] sm:$0xff] %vm99_vm0, %v1722_v14  ;;  %v1627_v41 = vmax.f32 %v1595_v62, 0.0 }
 0x471   :  { %1408 = vst [vmem:[#allocation10 + $0x10] sm:$0xff] %v1404_v10 }
 0x472   :  { %v1659_v50 = vmin.f32 %v1627_v41, 6.0  ;;  %1409 = vst [vmem:[#allocation10 + $0x18] sm:$0xff] %v1405_v26 }
 0x473   :  { %v1543_v15 = vpop.f32.mrf.mxu1 }
 0x474   :  { %v1691_v44 = vmul.f32 %v1659_v50, %v1541_v43  ;;  %v1544_v37 = vadd.f32 %v1543_v15, %v4955_v61  ;;  %v1558_v17 = vpop.f32.mrf.mxu3 }
 0x475   :  { %v1559_v35 = vadd.f32 %v1558_v17, %v4955_v61 }
 0x476   :  { %v1723_v48 = vmul.f32 0.16666667, %v1691_v44  ;;  %v1596_v18 = vadd.f32 3.0, %v1544_v37 }
 0x477   :  { %v1602_v32 = vadd.f32 3.0, %v1559_v35 }
 0x478   :  { %1755 = vst.msk [vmem:[#allocation2 + $0xe1] sm:$0xff] %vm99_vm0, %v1723_v48  ;;  %v1628_v13 = vmax.f32 %v1596_v18, 0.0 }
 0x479   :  { %v1634_v62 = vmax.f32 %v1602_v32, 0.0 }
 0x47a   :  { %v1660_v2 = vmin.f32 %v1628_v13, 6.0 }
 0x47b   :  { %v1545_v30 = vpop.f32.mrf.mxu1  ;;  %v1666_v50 = vmin.f32 %v1634_v62, 6.0 }
 0x47c   :  { %v1692_v63 = vmul.f32 %v1660_v2, %v1544_v37  ;;  %v1546_v28 = vadd.f32 %v1545_v30, %v4955_v61  ;;  %v1560_v46 = vpop.f32.mrf.mxu3 }
 0x47d   :  { %v1698_v25 = vmul.f32 %v1666_v50, %v1559_v35  ;;  %v1561_v60 = vadd.f32 %v1560_v46, %v4955_v61 }
 0x47e   :  { %v1724_v34 = vmul.f32 0.16666667, %v1692_v63  ;;  %v1597_v0 = vadd.f32 3.0, %v1546_v28 }
 0x47f   :  { %v1730_v44 = vmul.f32 0.16666667, %v1698_v25  ;;  %v1603_v37 = vadd.f32 3.0, %v1561_v60 }
 0x480   :  { %1756 = vst.msk [vmem:[#allocation2 + $0xf1] sm:$0xff] %vm99_vm0, %v1724_v34  ;;  %v1629_v16 = vmax.f32 %v1597_v0, 0.0 }
 0x481   :  { %1762 = vst.msk [vmem:[#allocation2 + $0x139] sm:$0xff] %vm99_vm0, %v1730_v44  ;;  %v1635_v48 = vmax.f32 %v1603_v37, 0.0 }
 0x482   :  { %v1661_v42 = vmin.f32 %v1629_v16, 6.0 }
 0x483   :  { %v1548_v1 = vpop.f32.mrf.mxu1  ;;  %v1667_v13 = vmin.f32 %v1635_v48, 6.0 }
 0x484   :  { %v1693_v19 = vmul.f32 %v1661_v42, %v1546_v28  ;;  %v1549_v39 = vadd.f32 %v1548_v1, %v4955_v61  ;;  %v1563_v49 = vpop.f32.mrf.mxu3 }
 0x485   :  { %v1699_v24 = vmul.f32 %v1667_v13, %v1561_v60  ;;  %v1564_v23 = vadd.f32 %v1563_v49, %v4955_v61 }
 0x486   :  { %v1725_v43 = vmul.f32 0.16666667, %v1693_v19  ;;  %v1598_v14 = vadd.f32 3.0, %v1549_v39 }
 0x487   :  { %v1731_v30 = vmul.f32 0.16666667, %v1699_v24  ;;  %v1604_v63 = vadd.f32 3.0, %v1564_v23 }
 0x488   :  { %1757 = vst.msk [vmem:[#allocation2 + $0xf9] sm:$0xff] %vm99_vm0, %v1725_v43  ;;  %v1630_v41 = vmax.f32 %v1598_v14, 0.0 }
 0x489   :  { %1763 = vst.msk [vmem:[#allocation2 + $0x141] sm:$0xff] %vm99_vm0, %v1731_v30  ;;  %v1636_v26 = vmax.f32 %v1604_v63, 0.0 }
 0x48a   :  { %v1662_v29 = vmin.f32 %v1630_v41, 6.0 }
 0x48b   :  { %v1550_v40 = vpop.f32.mrf.mxu1  ;;  %v1668_v0 = vmin.f32 %v1636_v26, 6.0 }
 0x48c   :  { %v1694_v22 = vmul.f32 %v1662_v29, %v1549_v39  ;;  %v1551_v15 = vadd.f32 %v1550_v40, %v4955_v61  ;;  %v1565_v42 = vpop.f32.mrf.mxu3 }
 0x48d   :  { %v1700_v17 = vmul.f32 %v1668_v0, %v1564_v23  ;;  %v1566_v35 = vadd.f32 %v1565_v42, %v4955_v61 }
 0x48e   :  { %v1726_v45 = vmul.f32 0.16666667, %v1694_v22  ;;  %v1599_v36 = vadd.f32 3.0, %v1551_v15 }
 0x48f   :  { %v1732_v32 = vmul.f32 0.16666667, %v1700_v17  ;;  %v1605_v43 = vadd.f32 3.0, %v1566_v35 }
 0x490   :  { %1758 = vst.msk [vmem:[#allocation2 + $0x109] sm:$0xff] %vm99_vm0, %v1726_v45  ;;  %v1631_v18 = vmax.f32 %v1599_v36, 0.0 }
 0x491   :  { %1764 = vst.msk [vmem:[#allocation2 + $0x151] sm:$0xff] %vm99_vm0, %v1732_v32  ;;  %v1637_v41 = vmax.f32 %v1605_v43, 0.0 }
 0x492   :  { %v1663_v2 = vmin.f32 %v1631_v18, 6.0 }
 0x493   :  { %v1553_v31 = vpop.f32.mrf.mxu1  ;;  %v1669_v29 = vmin.f32 %v1637_v41, 6.0 }
 0x494   :  { %v1695_v38 = vmul.f32 %v1663_v2, %v1551_v15  ;;  %v1554_v33 = vadd.f32 %v1553_v31, %v4955_v61  ;;  %v1568_v25 = vpop.f32.mrf.mxu3 }
 0x495   :  { %v1701_v60 = vmul.f32 %v1669_v29, %v1566_v35  ;;  %v1569_v40 = vadd.f32 %v1568_v25, %v4955_v61 }
 0x496   :  { %v1727_v28 = vmul.f32 0.16666667, %v1695_v38  ;;  %v1600_v10 = vadd.f32 3.0, %v1554_v33 }
 0x497   :  { %v1733_v15 = vmul.f32 0.16666667, %v1701_v60  ;;  %v1606_v44 = vadd.f32 3.0, %v1569_v40 }
 0x498   :  { %1759 = vst.msk [vmem:[#allocation2 + $0x111] sm:$0xff] %vm99_vm0, %v1727_v28  ;;  %v1632_v34 = vmax.f32 %v1600_v10, 0.0 }
 0x499   :  { %1765 = vst.msk [vmem:[#allocation2 + $0x159] sm:$0xff] %vm99_vm0, %v1733_v15  ;;  %v1638_v45 = vmax.f32 %v1606_v44, 0.0 }
 0x49a   :  { %v1664_v16 = vmin.f32 %v1632_v34, 6.0 }
 0x49b   :  { %v1555_v1 = vpop.f32.mrf.mxu1  ;;  %v1670_v36 = vmin.f32 %v1638_v45, 6.0 }
 0x49c   :  { %v1696_v19 = vmul.f32 %v1664_v16, %v1554_v33  ;;  %v1556_v39 = vadd.f32 %v1555_v1, %v4955_v61  ;;  %v1570_v48 = vpop.f32.mrf.mxu3 }
 0x49d   :  { %v1702_v18 = vmul.f32 %v1670_v36, %v1569_v40  ;;  %v1571_v13 = vadd.f32 %v1570_v48, %v4955_v61 }
 0x49e   :  { %v1728_v14 = vmul.f32 0.16666667, %v1696_v19  ;;  %v1601_v62 = vadd.f32 3.0, %v1556_v39 }
 0x49f   :  { %v1734_v2 = vmul.f32 0.16666667, %v1702_v18  ;;  %v1607_v49 = vadd.f32 3.0, %v1571_v13 }
 0x4a0   :  { %1760 = vst.msk [vmem:[#allocation2 + $0x121] sm:$0xff] %vm99_vm0, %v1728_v14  ;;  %v1633_v50 = vmax.f32 %v1601_v62, 0.0 }
 0x4a1   :  { %1766 = vst.msk [vmem:[#allocation2 + $0x169] sm:$0xff] %vm99_vm0, %v1734_v2  ;;  %v1639_v24 = vmax.f32 %v1607_v49, 0.0 }
 0x4a2   :  { %v1665_v46 = vmin.f32 %v1633_v50, 6.0 }
 0x4a3   :  { %v1671_v23 = vmin.f32 %v1639_v24, 6.0 }
 0x4a4   :  { %v1697_v22 = vmul.f32 %v1665_v46, %v1556_v39  ;;  %v1573_v31 = vpop.f32.mrf.mxu3  ;;  %v4361_v39 = vmov 0.0  }
 0x4a5   :  { %v1703_v38 = vmul.f32 %v1671_v23, %v1571_v13  ;;  %v1574_v33 = vadd.f32 %v1573_v31, %v4955_v61 }
 0x4a6   :  { %v1729_v37 = vmul.f32 0.16666667, %v1697_v22 }
 0x4a7   :  { %v1735_v30 = vmul.f32 0.16666667, %v1703_v38  ;;  %v1608_v63 = vadd.f32 3.0, %v1574_v33 }
 0x4a8   :  { %1761 = vst.msk [vmem:[#allocation2 + $0x129] sm:$0xff] %vm99_vm0, %v1729_v37 }
 0x4a9   :  { %1767 = vst.msk [vmem:[#allocation2 + $0x171] sm:$0xff] %vm99_vm0, %v1735_v30  ;;  %v1640_v28 = vmax.f32 %v1608_v63, 0.0 }
 0x4ab   :  { %v1672_v10 = vmin.f32 %v1640_v28, 6.0 }
 0x4ac   :  { %v1575_v26 = vpop.f32.mrf.mxu3 }
 0x4ad   :  { %v1704_v34 = vmul.f32 %v1672_v10, %v1574_v33  ;;  %v1576_v0 = vadd.f32 %v1575_v26, %v4955_v61 }
 0x4af   :  { %v1736_v16 = vmul.f32 0.16666667, %v1704_v34  ;;  %v1609_v42 = vadd.f32 3.0, %v1576_v0 }
 0x4b1   :  { %1768 = vst.msk [vmem:[#allocation2 + $0x181] sm:$0xff] %vm99_vm0, %v1736_v16  ;;  %v1641_v17 = vmax.f32 %v1609_v42, 0.0 }
 0x4b3   :  { %v1673_v35 = vmin.f32 %v1641_v17, 6.0 }
 0x4b5   :  { %v1705_v1 = vmul.f32 %v1673_v35, %v1576_v0 }
 0x4b7   :  { %v1737_v19 = vmul.f32 0.16666667, %v1705_v1 }
 0x4b9   :  { %1769 = vst.msk [vmem:[#allocation2 + $0x189] sm:$0xff] %vm99_vm0, %v1737_v19 }
 0x4ba LB: > { %s2933_s6 = smul.u32 192, %s3334_s7  ;;  %s3034_s24 = sshll.u32 %s3334_s7, 7  ;;  %s3334_s7 = sphi %s4363_s7, %s1775_s7   ;;  %v3330_v39 = vphi %v4361_v39, %v4960_v39  }
 0x4bb   : > { %s4522_s25 = sshra.s32 %s3034_s24, 3  ;;  %s1775_s7 = sadd.s32 1, %s3334_s7  }
 0x4bc   : > { %s4372_s23 = scalar_lea.vmem [#allocation2], %s2933_s6  ;;  %s3035_s26 = sshll.u32 %s4522_s25, 2 }
 0x4bd   : > { %s4549_s2 = scalar_lea.vmem [#allocation3], %s3035_s26  ;;  %p1772_p1 = scmp.ge.s32.totalorder %s1775_s7, 2  }
 0x4be   :  { %2396 = vmatpush.msra.mxu3 (%p1772_p1), %v3459_v9  ;;  %2426 = vmatpush.msrb.mxu2 (%p1772_p1), %v3470_v12  ;;  %s3345_s13 = smov (%p1772_p1), [#allocation10]   ;;  %s2665_s17 = sshll.u32 (%p1772_p1), %s4924_s8, 4  ;;  %s2666_s17 = int_to_ptr.hbm [resolvable:$true] %s2665_s17 }
 0x4bf   :  { %s2663_s14 = sshll.u32 (%p1772_p1), %s3345_s13, 4  ;;  %s3346_s18 = smov (%p1772_p1), 256   ;;  %s2664_s14 = int_to_ptr.vmem [resolvable:$true] %s2663_s14 }
 0x4c0   : > { %v1780_v61 = vld [vmem:[%s4372_s23] sm:$0xff]  ;;  %v2936_v50 = vld [vmem:[%s4372_s23 + $0x18] sm:$0xff]  ;;  %v4387_v22 = vld [vmem:[%s4372_s23 + $0x30] sm:$0xff]  ;;  %2397 = vmatpush.msra.mxu3 (%p1772_p1), %v3454_v8  ;;  %2427 = vmatpush.msrb.mxu2 (%p1772_p1), %v3468_v11  ;;  %s3347_s5 = smov (%p1772_p1), 16  }
 0x4c1   : > { %v1813_v32 = vld [vmem:[%s4372_s23 + $0x1] sm:$0xff]  ;;  %v1797_v14 = vmul.f32 %v1780_v61, %v3669_v51  ;;  %v2952_v29 = vld [vmem:[%s4372_s23 + $0x19] sm:$0xff]  ;;  %v1931_v25 = vmul.f32 %v2936_v50, %v3678_v54  ;;  %v4390_v15 = vld [vmem:[%s4372_s23 + $0x31] sm:$0xff]  ;;  %v1799_v37 = vmul.f32 %v2936_v50, %v3669_v51  ;;  %v2081_v36 = vmul.f32 %v4387_v22, %v3687_v57 }
 0x4c2   : > { %v1862_v43 = vld [vmem:[%s4372_s23 + $0x2] sm:$0xff]  ;;  %v1830_v62 = vmul.f32 %v1813_v32, %v3672_v52  ;;  %v2968_v46 = vld [vmem:[%s4372_s23 + $0x1a] sm:$0xff]  ;;  %v1980_v60 = vmul.f32 %v2952_v29, %v3681_v55  ;;  %v4393_v44 = vld [vmem:[%s4372_s23 + $0x32] sm:$0xff]  ;;  %v2130_v48 = vmul.f32 %v4390_v15, %v3690_v58  ;;  %v1832_v63 = vmul.f32 %v2952_v29, %v3672_v52  ;;  %2398 = vmatpush.msra.mxu3 (%p1772_p1), %v3449_v7 }
 0x4c3   : > { %v1879_v41 = vmul.f32 %v1862_v43, %v3675_v53  ;;  %v2029_v40 = vmul.f32 %v2968_v46, %v3684_v56  ;;  %v4402_v18 = vmul.f32 %v4393_v44, %v3693_v59  ;;  %v1781_v13 = vld [vmem:[%s4372_s23 + $0x8] sm:$0xff]  ;;  %v2937_v38 = vld [vmem:[%s4372_s23 + $0x20] sm:$0xff]  ;;  %v4418_v0 = vld [vmem:[%s4372_s23 + $0x38] sm:$0xff]  ;;  %v1881_v43 = vmul.f32 %v2968_v46, %v3675_v53 }
 0x4c4   : > { %v1846_v45 = vadd.f32 %v1830_v62, %v1797_v14  ;;  %v1814_v2 = vld [vmem:[%s4372_s23 + $0x9] sm:$0xff]  ;;  %v1798_v24 = vmul.f32 %v1781_v13, %v3669_v51  ;;  %v2953_v33 = vld [vmem:[%s4372_s23 + $0x21] sm:$0xff]  ;;  %v1932_v10 = vmul.f32 %v2937_v38, %v3678_v54  ;;  %v4421_v16 = vld [vmem:[%s4372_s23 + $0x39] sm:$0xff]  ;;  %v2082_v35 = vmul.f32 %v4418_v0, %v3687_v57  ;;  %2399 = vmatpush.msra.mxu3 (%p1772_p1), %v3442_v6 }
 0x4c5   : > { %v1863_v49 = vld [vmem:[%s4372_s23 + $0xa] sm:$0xff]  ;;  %v1831_v23 = vmul.f32 %v1814_v2, %v3672_v52  ;;  %v2969_v30 = vld [vmem:[%s4372_s23 + $0x22] sm:$0xff]  ;;  %v1981_v26 = vmul.f32 %v2953_v33, %v3681_v55  ;;  %v4424_v42 = vld [vmem:[%s4372_s23 + $0x3a] sm:$0xff]  ;;  %v2131_v1 = vmul.f32 %v4421_v16, %v3690_v58  ;;  %v1848_v32 = vadd.f32 %v1832_v63, %v1799_v37 }
 0x4c6   : > { %v1880_v31 = vmul.f32 %v1863_v49, %v3675_v53  ;;  %v1895_v28 = vadd.f32 %v1879_v41, %v1846_v45  ;;  %v2030_v34 = vmul.f32 %v2969_v30, %v3684_v56  ;;  %v2180_v19 = vmul.f32 %v4424_v42, %v3693_v59  ;;  %v4436_v62 = vld [vmem:[%s4372_s23 + $0x48] sm:$0xff]  ;;  %2400 = vmatpush.msra.mxu3 (%p1772_p1), %v3437_v5 }
 0x4c7   : > { %v1847_v17 = vadd.f32 %v1831_v23, %v1798_v24  ;;  %v1933_v14 = vmul.f32 %v4387_v22, %v3678_v54  ;;  %v1982_v50 = vmul.f32 %v4390_v15, %v3681_v55  ;;  %v2031_v29 = vmul.f32 %v4393_v44, %v3684_v56  ;;  %v4448_v37 = vld [vmem:[%s4372_s23 + $0x4a] sm:$0xff] }
 0x4c8   : > { %v1947_v61 = vadd.f32 %v1931_v25, %v1895_v28  ;;  %v2083_v45 = vmul.f32 %v4436_v62, %v3687_v57  ;;  %v4445_v25 = vld [vmem:[%s4372_s23 + $0x49] sm:$0xff]  ;;  %v1897_v13 = vadd.f32 %v1881_v43, %v1848_v32  ;;  %v2181_v49 = vmul.f32 %v4448_v37, %v3693_v59  ;;  %2401 = vmatpush.msra.mxu3 (%p1772_p1), %v3432_v4 }
 0x4c9   : > { %v1896_v41 = vadd.f32 %v1880_v31, %v1847_v17  ;;  %v2132_v2 = vmul.f32 %v4445_v25, %v3690_v58  ;;  %v1800_v23 = vmul.f32 %v2937_v38, %v3669_v51  ;;  %v1833_v31 = vmul.f32 %v2953_v33, %v3672_v52  ;;  %v4462_v32 = vld [vmem:[%s4372_s23 + $0x50] sm:$0xff] }
 0x4ca   : > { %v1996_v46 = vadd.f32 %v1980_v60, %v1947_v61  ;;  %v1882_v63 = vmul.f32 %v2969_v30, %v3675_v53  ;;  %v1949_v17 = vadd.f32 %v1933_v14, %v1897_v13  ;;  %v1934_v60 = vmul.f32 %v4418_v0, %v3678_v54  ;;  %v4469_v33 = vld [vmem:[%s4372_s23 + $0x51] sm:$0xff]  ;;  %2402 = vmatpush.msra.mxu3 (%p1772_p1), %v3425_v3 }
 0x4cb   : > { %v1948_v24 = vadd.f32 %v1932_v10, %v1896_v41  ;;  %v1983_v61 = vmul.f32 %v4421_v16, %v3681_v55  ;;  %v1849_v20 = vadd.f32 %v1833_v31, %v1800_v23  ;;  %v2032_v10 = vmul.f32 %v4424_v42, %v3684_v56 }
 0x4cc   : > { %v2045_v28 = vadd.f32 %v2029_v40, %v1996_v46  ;;  %v2084_v38 = vmul.f32 %v4462_v32, %v3687_v57  ;;  %v4472_v40 = vld [vmem:[%s4372_s23 + $0x52] sm:$0xff]  ;;  %v1998_v14 = vadd.f32 %v1982_v50, %v1949_v17  ;;  %v2133_v41 = vmul.f32 %v4469_v33, %v3690_v58 }
 0x4cd   : > { %v1997_v43 = vadd.f32 %v1981_v26, %v1948_v24  ;;  %v2182_v26 = vmul.f32 %v4472_v40, %v3693_v59  ;;  %v1898_v13 = vadd.f32 %v1882_v63, %v1849_v20  ;;  %v1801_v24 = vmul.f32 %v4387_v22, %v3669_v51  ;;  %v4489_v63 = vld [vmem:[%s4372_s23 + $0x60] sm:$0xff] }
 0x4ce   : > { %v2097_v30 = vadd.f32 %v2081_v36, %v2045_v28  ;;  %v1834_v23 = vmul.f32 %v4390_v15, %v3672_v52  ;;  %v2047_v47 = vadd.f32 %v2031_v29, %v1998_v14  ;;  %v1883_v36 = vmul.f32 %v4393_v44, %v3675_v53  ;;  %v4497_v29 = vld [vmem:[%s4372_s23 + $0x61] sm:$0xff] }
 0x4cf   : > { %v2046_v46 = vadd.f32 %v2030_v34, %v1997_v43  ;;  %v1935_v50 = vmul.f32 %v4436_v62, %v3678_v54  ;;  %v1950_v17 = vadd.f32 %v1934_v60, %v1898_v13  ;;  %v1984_v20 = vmul.f32 %v4445_v25, %v3681_v55  ;;  %v4502_v14 = vld [vmem:[%s4372_s23 + $0x62] sm:$0xff] }
 0x4d0   : > { %v2146_v31 = vadd.f32 %v2130_v48, %v2097_v30  ;;  %v1850_v34 = vadd.f32 %v1834_v23, %v1801_v24  ;;  %v2099_v15 = vadd.f32 %v2083_v45, %v2047_v47  ;;  %v2033_v48 = vmul.f32 %v4448_v37, %v3684_v56 }
 0x4d1   : > { %v2098_v28 = vadd.f32 %v2082_v35, %v2046_v46  ;;  %v2085_v44 = vmul.f32 %v4489_v63, %v3687_v57  ;;  %v1999_v60 = vadd.f32 %v1983_v61, %v1950_v17  ;;  %v2134_v30 = vmul.f32 %v4497_v29, %v3690_v58 }
 0x4d2   : > { %v2195_v22 = vadd.f32 %v4402_v18, %v2146_v31  ;;  %v1899_v43 = vadd.f32 %v1883_v36, %v1850_v34  ;;  %v2148_v47 = vadd.f32 %v2132_v2, %v2099_v15  ;;  %v2183_v45 = vmul.f32 %v4502_v14, %v3693_v59 }
 0x4d3   : > { %v2147_v35 = vadd.f32 %v2131_v1, %v2098_v28  ;;  %v1802_v46 = vmul.f32 %v4418_v0, %v3669_v51  ;;  %v2048_v24 = vadd.f32 %v2032_v10, %v1999_v60  ;;  %v1835_v1 = vmul.f32 %v4421_v16, %v3672_v52 }
 0x4d4   : > { %v2212_v18 = vadd.f32 %v2195_v22, %v3707_v21  ;;  %v1951_v23 = vadd.f32 %v1935_v50, %v1899_v43  ;;  %v2197_v31 = vadd.f32 %v2181_v49, %v2148_v47  ;;  %v1884_v36 = vmul.f32 %v4424_v42, %v3675_v53 }
 0x4d5   : > { %v2196_v13 = vadd.f32 %v2180_v19, %v2147_v35  ;;  %v1936_v2 = vmul.f32 %v4462_v32, %v3678_v54  ;;  %v2100_v0 = vadd.f32 %v2084_v38, %v2048_v24  ;;  %v1851_v10 = vadd.f32 %v1835_v1, %v1802_v46  ;;  %v4525_v38 = vld [vmem:[%s4372_s23 + $0x68] sm:$0xff] }
 0x4d6   : > { %v2228_v61 = vadd.f32 3.0, %v2212_v18  ;;  %v2000_v19 = vadd.f32 %v1984_v20, %v1951_v23  ;;  %v2214_v17 = vadd.f32 %v2197_v31, %v3707_v21  ;;  %v1985_v16 = vmul.f32 %v4469_v33, %v3681_v55  ;;  %v4528_v20 = vld [vmem:[%s4372_s23 + $0x69] sm:$0xff] }
 0x4d7   : > { %v2213_v28 = vadd.f32 %v2196_v13, %v3707_v21  ;;  %v2034_v49 = vmul.f32 %v4472_v40, %v3684_v56  ;;  %v2149_v34 = vadd.f32 %v2133_v41, %v2100_v0  ;;  %v1900_v15 = vadd.f32 %v1884_v36, %v1851_v10  ;;  %v4535_v1 = vld [vmem:[%s4372_s23 + $0x6a] sm:$0xff] }
 0x4d8   : > { %v2244_v50 = vmax.f32 %v2228_v61, 0.0  ;;  %v2049_v22 = vadd.f32 %v2033_v48, %v2000_v19  ;;  %v2230_v60 = vadd.f32 3.0, %v2214_v17  ;;  %v2086_v43 = vmul.f32 %v4525_v38, %v3687_v57 }
 0x4d9   : > { %v2229_v42 = vadd.f32 3.0, %v2213_v28  ;;  %v2135_v47 = vmul.f32 %v4528_v20, %v3690_v58  ;;  %v2198_v13 = vadd.f32 %v2182_v26, %v2149_v34  ;;  %v1952_v23 = vadd.f32 %v1936_v2, %v1900_v15 }
 0x4da   : > { %v2260_v35 = vmin.f32 %v2244_v50, 6.0  ;;  %v2101_v24 = vadd.f32 %v2085_v44, %v2049_v22  ;;  %v2246_v48 = vmax.f32 %v2230_v60, 0.0  ;;  %v2184_v61 = vmul.f32 %v4535_v1, %v3693_v59 }
 0x4db   : > { %v2245_v46 = vmax.f32 %v2229_v42, 0.0  ;;  %v1803_v31 = vmul.f32 %v4436_v62, %v3669_v51  ;;  %v2215_v0 = vadd.f32 %v2198_v13, %v3707_v21  ;;  %v2001_v10 = vadd.f32 %v1985_v16, %v1952_v23 }
 0x4dc   : > { %v2276_v41 = vmul.f32 %v2260_v35, %v2212_v18  ;;  %v2150_v19 = vadd.f32 %v2134_v30, %v2101_v24  ;;  %v2262_v26 = vmin.f32 %v2246_v48, 6.0  ;;  %v1836_v44 = vmul.f32 %v4445_v25, %v3672_v52 }
 0x4dd   : > { %v2261_v36 = vmin.f32 %v2245_v46, 6.0  ;;  %v1885_v18 = vmul.f32 %v4448_v37, %v3675_v53  ;;  %v2231_v42 = vadd.f32 3.0, %v2215_v0  ;;  %v2050_v22 = vadd.f32 %v2034_v49, %v2001_v10 }
 0x4de   : > { %v2292_v50 = vmul.f32 0.16666667, %v2276_v41  ;;  %v2199_v34 = vadd.f32 %v2183_v45, %v2150_v19  ;;  %v2278_v35 = vmul.f32 %v2262_v26, %v2214_v17  ;;  %v1852_v60 = vadd.f32 %v1836_v44, %v1803_v31  ;;  %v4566_v44 = vld [vmem:[%s4372_s23 + $0x78] sm:$0xff] }
 0x4df   : > { %v2277_v2 = vmul.f32 %v2261_v36, %v2213_v28  ;;  %v2247_v30 = vmax.f32 %v2231_v42, 0.0  ;;  %v2102_v13 = vadd.f32 %v2086_v43, %v2050_v22  ;;  %v1937_v45 = vmul.f32 %v4489_v63, %v3678_v54 }
 0x4e0   : > { %v2309_v15 = vpack.c.bf16 %v2292_v50, %v2292_v50  ;;  %v2346_v62 = vsel %vm99_vm0, %v2292_v50, 0.0  ;;  %v2216_v16 = vadd.f32 %v2199_v34, %v3707_v21  ;;  %v2294_v25 = vmul.f32 0.16666667, %v2278_v35  ;;  %v4572_v34 = vld [vmem:[%s4372_s23 + $0x79] sm:$0xff] }
 0x4e1   : > { %v2293_v46 = vmul.f32 0.16666667, %v2277_v2  ;;  %v1901_v37 = vadd.f32 %v1885_v18, %v1852_v60  ;;  %v1986_v28 = vmul.f32 %v4497_v29, %v3681_v55  ;;  %v2263_v43 = vmin.f32 %v2247_v30, 6.0 }
 0x4e2   : > { %2330 = vst.msk [vmem:[%s4549_s2] sm:$0xf] %vm1068_vm4, %v2309_v15  ;;  %v2232_v24 = vadd.f32 3.0, %v2216_v16  ;;  %v2311_v23 = vpack.c.bf16 %v2294_v25, %v2294_v25  ;;  %v2151_v41 = vadd.f32 %v2135_v47, %v2102_v13  ;;  %v2035_v19 = vmul.f32 %v4502_v14, %v3684_v56  ;;  %v4583_v13 = vld [vmem:[%s4372_s23 + $0x7a] sm:$0xff] }
 0x4e3   : > { %v2310_v17 = vpack.c.bf16 %v2293_v46, %v2293_v46  ;;  %v2347_v49 = vsel %vm99_vm0, %v2293_v46, 0.0  ;;  %v2279_v48 = vmul.f32 %v2263_v43, %v2215_v0  ;;  %v1953_v36 = vadd.f32 %v1937_v45, %v1901_v37 }
 0x4e4   : > { %v2248_v31 = vmax.f32 %v2232_v24, 0.0  ;;  %v2348_v10 = vadd.f32 %v2347_v49, %v2346_v62  ;;  %2332 = vst.msk [vmem:[%s4549_s2 + $0x8] sm:$0xf] %vm1068_vm4, %v2311_v23  ;;  %v2349_v50 = vsel %vm99_vm0, %v2294_v25, 0.0  ;;  %v2200_v26 = vadd.f32 %v2184_v61, %v2151_v41 }
 0x4e5   : > { %2331 = vst.msk [vmem:[%s4549_s2 + $0x4] sm:$0xf] %vm1068_vm4, %v2310_v17  ;;  %v2295_v18 = vmul.f32 0.16666667, %v2279_v48  ;;  %v2002_v2 = vadd.f32 %v1986_v28, %v1953_v36  ;;  %v2087_v0 = vmul.f32 %v4566_v44, %v3687_v57  ;;  %v1804_v22 = vmul.f32 %v4462_v32, %v3669_v51 }
 0x4e6   : > { %v2264_v47 = vmin.f32 %v2248_v31, 6.0  ;;  %v2217_v42 = vadd.f32 %v2200_v26, %v3707_v21  ;;  %v1837_v61 = vmul.f32 %v4469_v33, %v3672_v52  ;;  %v1886_v15 = vmul.f32 %v4472_v40, %v3675_v53 }
 0x4e7   : > { %v2312_v62 = vpack.c.bf16 %v2295_v18, %v2295_v18  ;;  %v2051_v60 = vadd.f32 %v2035_v19, %v2002_v2  ;;  %v2136_v46 = vmul.f32 %v4572_v34, %v3690_v58  ;;  %v1938_v37 = vmul.f32 %v4525_v38, %v3678_v54 }
 0x4e8   : > { %v2280_v35 = vmul.f32 %v2264_v47, %v2216_v16  ;;  %v2233_v30 = vadd.f32 3.0, %v2217_v42  ;;  %v1853_v25 = vadd.f32 %v1837_v61, %v1804_v22  ;;  %v2350_v32 = vadd.f32 %v2349_v50, %v2348_v10  ;;  %v4601_v10 = vld [vmem:[%s4372_s23 + $0x80] sm:$0xff] }
 0x4e9   : > { %2333 = vst.msk [vmem:[%s4549_s2 + $0xc] sm:$0xf] %vm1068_vm4, %v2312_v62  ;;  %v2103_v40 = vadd.f32 %v2087_v0, %v2051_v60  ;;  %v2185_v16 = vmul.f32 %v4583_v13, %v3693_v59  ;;  %v2351_v45 = vsel %vm99_vm0, %v2295_v18, 0.0  ;;  %v1987_v49 = vmul.f32 %v4528_v20, %v3681_v55  ;;  %v4604_v50 = vld [vmem:[%s4372_s23 + $0x81] sm:$0xff] }
 0x4ea   : > { %v2296_v33 = vmul.f32 0.16666667, %v2280_v35  ;;  %v2249_v28 = vmax.f32 %v2233_v30, 0.0  ;;  %v1902_v17 = vadd.f32 %v1886_v15, %v1853_v25  ;;  %v2036_v48 = vmul.f32 %v4535_v1, %v3684_v56 }
 0x4eb   : > { %v2152_v24 = vadd.f32 %v2136_v46, %v2103_v40  ;;  %v1805_v31 = vmul.f32 %v4489_v63, %v3669_v51  ;;  %v2352_v36 = vadd.f32 %v2351_v45, %v2350_v32  ;;  %v1838_v26 = vmul.f32 %v4497_v29, %v3672_v52  ;;  %v4623_v46 = vld [vmem:[%s4372_s23 + $0x82] sm:$0xff] }
 0x4ec   : > { %v2313_v43 = vpack.c.bf16 %v2296_v33, %v2296_v33  ;;  %v2265_v23 = vmin.f32 %v2249_v28, 6.0  ;;  %v1954_v41 = vadd.f32 %v1938_v37, %v1902_v17  ;;  %v1887_v18 = vmul.f32 %v4502_v14, %v3675_v53  ;;  %v4634_v28 = vld [vmem:[%s4372_s23 + $0x90] sm:$0xff] }
 0x4ed   : > { %v2201_v19 = vadd.f32 %v2185_v16, %v2152_v24  ;;  %v2088_v63 = vmul.f32 %v4601_v10, %v3687_v57  ;;  %v2137_v0 = vmul.f32 %v4604_v50, %v3690_v58  ;;  %v2353_v22 = vsel %vm99_vm0, %v2296_v33, 0.0  ;;  %v4637_v17 = vld [vmem:[%s4372_s23 + $0x91] sm:$0xff] }
 0x4ee   : > { %2334 = vst.msk [vmem:[%s4549_s2 + $0x10] sm:$0xf] %vm1068_vm4, %v2313_v43  ;;  %v2281_v47 = vmul.f32 %v2265_v23, %v2217_v42  ;;  %v2003_v2 = vadd.f32 %v1987_v49, %v1954_v41  ;;  %v1854_v15 = vadd.f32 %v1838_v26, %v1805_v31  ;;  %v1939_v62 = vmul.f32 %v4566_v44, %v3678_v54 }
 0x4ef   : > { %v2218_v61 = vadd.f32 %v2201_v19, %v3707_v21  ;;  %v1988_v42 = vmul.f32 %v4572_v34, %v3681_v55  ;;  %v1806_v35 = vmul.f32 %v4525_v38, %v3669_v51  ;;  %v1839_v25 = vmul.f32 %v4528_v20, %v3672_v52 }
 0x4f0   : > { %v2297_v29 = vmul.f32 0.16666667, %v2281_v47  ;;  %v2052_v14 = vadd.f32 %v2036_v48, %v2003_v2  ;;  %v1903_v30 = vadd.f32 %v1887_v18, %v1854_v15  ;;  %v1888_v37 = vmul.f32 %v4535_v1, %v3675_v53 }
 0x4f1   : > { %v2234_v60 = vadd.f32 3.0, %v2218_v61  ;;  %v2186_v40 = vmul.f32 %v4623_v46, %v3693_v59  ;;  %v2037_v16 = vmul.f32 %v4583_v13, %v3684_v56  ;;  %v1855_v49 = vadd.f32 %v1839_v25, %v1806_v35 }
 0x4f2   : > { %v2314_v32 = vpack.c.bf16 %v2297_v29, %v2297_v29  ;;  %v2104_v33 = vadd.f32 %v2088_v63, %v2052_v14  ;;  %v1955_v45 = vadd.f32 %v1939_v62, %v1903_v30  ;;  %v1940_v20 = vmul.f32 %v4601_v10, %v3678_v54 }
 0x4f3   : > { %v2250_v38 = vmax.f32 %v2234_v60, 0.0  ;;  %v4641_v1 = vadd.f32 %v2353_v22, %v2352_v36  ;;  %v2089_v24 = vmul.f32 %v4634_v28, %v3687_v57  ;;  %v2138_v23 = vmul.f32 %v4637_v17, %v3690_v58 }
 0x4f4   : > { %2335 = vst.msk [vmem:[%s4549_s2 + $0x14] sm:$0xf] %vm1068_vm4, %v2314_v32  ;;  %v2153_v43 = vadd.f32 %v2137_v0, %v2104_v33  ;;  %v2004_v48 = vadd.f32 %v1988_v42, %v1955_v45  ;;  %v1904_v31 = vadd.f32 %v1888_v37, %v1855_v49  ;;  %v1989_v19 = vmul.f32 %v4604_v50, %v3681_v55  ;;  %v3026_v0 = vld [vmem:[%s4372_s23 + $0x92] sm:$0xff]  ;;  %v4682_v49 = vld [vmem:[%s4372_s23 + $0x9a] sm:$0xff] }
 0x4f5   : > { %v2266_v41 = vmin.f32 %v2250_v38, 6.0  ;;  %v2038_v36 = vmul.f32 %v4623_v46, %v3684_v56  ;;  %v1807_v18 = vmul.f32 %v4566_v44, %v3669_v51  ;;  %v1840_v47 = vmul.f32 %v4572_v34, %v3672_v52  ;;  %v4663_v42 = vld [vmem:[%s4372_s23 + $0x98] sm:$0xff] }
 0x4f6   : > { %v2202_v26 = vadd.f32 %v2186_v40, %v2153_v43  ;;  %v2053_v63 = vadd.f32 %v2037_v16, %v2004_v48  ;;  %v1956_v22 = vadd.f32 %v1940_v20, %v1904_v31  ;;  %v1889_v15 = vmul.f32 %v4583_v13, %v3675_v53  ;;  %v4673_v37 = vld [vmem:[%s4372_s23 + $0x99] sm:$0xff] }
 0x4f7   : > { %v2282_v2 = vmul.f32 %v2266_v41, %v2218_v61  ;;  %v2187_v14 = vmul.f32 %v3026_v0, %v3693_v59  ;;  %v1856_v35 = vadd.f32 %v1840_v47, %v1807_v18  ;;  %v1941_v44 = vmul.f32 %v4634_v28, %v3678_v54 }
 0x4f8   : > { %v2219_v62 = vadd.f32 %v2202_v26, %v3707_v21  ;;  %v2105_v61 = vadd.f32 %v2089_v24, %v2053_v63  ;;  %v2005_v60 = vadd.f32 %v1989_v19, %v1956_v22  ;;  %v2090_v30 = vmul.f32 %v4663_v42, %v3687_v57  ;;  %v4702_v22 = vld [vmem:[%s4372_s23 + $0xa9] sm:$0xff] }
 0x4f9   : > { %v4667_v34 = vmul.f32 0.16666667, %v2282_v2  ;;  %v2355_v13 = vsel %vm99_vm0, %v2297_v29, 0.0  ;;  %v1905_v32 = vadd.f32 %v1889_v15, %v1856_v35  ;;  %v1990_v33 = vmul.f32 %v4637_v17, %v3681_v55  ;;  %v4705_v15 = vld [vmem:[%s4372_s23 + $0xaa] sm:$0xff] }
 0x4fa   : > { %v2235_v25 = vadd.f32 3.0, %v2219_v62  ;;  %v2154_v16 = vadd.f32 %v2138_v23, %v2105_v61  ;;  %v2054_v38 = vadd.f32 %v2038_v36, %v2005_v60  ;;  %v2139_v45 = vmul.f32 %v4673_v37, %v3690_v58  ;;  %v4690_v23 = vld [vmem:[%s4372_s23 + $0xa8] sm:$0xff] }
 0x4fb   : > { %v2315_v40 = vpack.c.bf16 %v4667_v34, %v4667_v34  ;;  %v2188_v29 = vmul.f32 %v4682_v49, %v3693_v59  ;;  %v1957_v43 = vadd.f32 %v1941_v44, %v1905_v32  ;;  %v2039_v24 = vmul.f32 %v3026_v0, %v3684_v56 }
 0x4fc   : > { %v2251_v20 = vmax.f32 %v2235_v25, 0.0  ;;  %v2203_v41 = vadd.f32 %v2187_v14, %v2154_v16  ;;  %v2106_v48 = vadd.f32 %v2090_v30, %v2054_v38  ;;  %v1808_v31 = vmul.f32 %v4601_v10, %v3669_v51 }
 0x4fd   : > { %2336 = vst.msk [vmem:[%s4549_s2 + $0x18] sm:$0xf] %vm1068_vm4, %v2315_v40  ;;  %v1841_v19 = vmul.f32 %v4604_v50, %v3672_v52  ;;  %v2006_v36 = vadd.f32 %v1990_v33, %v1957_v43  ;;  %v2091_v18 = vmul.f32 %v4690_v23, %v3687_v57  ;;  %v1890_v47 = vmul.f32 %v4623_v46, %v3675_v53 }
 0x4fe   : > { %v2267_v26 = vmin.f32 %v2251_v20, 6.0  ;;  %v2220_v2 = vadd.f32 %v2203_v41, %v3707_v21  ;;  %v2155_v63 = vadd.f32 %v2139_v45, %v2106_v48  ;;  %v1942_v10 = vmul.f32 %v4663_v42, %v3678_v54 }
 0x4ff   : > { %v1857_v14 = vadd.f32 %v1841_v19, %v1808_v31  ;;  %v2055_v35 = vadd.f32 %v2039_v24, %v2006_v36  ;;  %v2140_v44 = vmul.f32 %v4702_v22, %v3690_v58  ;;  %v2189_v46 = vmul.f32 %v4705_v15, %v3693_v59  ;;  %v4727_v24 = vld [vmem:[%s4372_s23 + $0xb0] sm:$0xff] }
 0x500   : > { %v2283_v50 = vmul.f32 %v2267_v26, %v2219_v62  ;;  %v2236_v61 = vadd.f32 3.0, %v2220_v2  ;;  %v2204_v60 = vadd.f32 %v2188_v29, %v2155_v63  ;;  %v1991_v25 = vmul.f32 %v4673_v37, %v3681_v55  ;;  %v4736_v36 = vld [vmem:[%s4372_s23 + $0xb1] sm:$0xff] }
 0x501   : > { %v1906_v30 = vadd.f32 %v1890_v47, %v1857_v14  ;;  %v2107_v33 = vadd.f32 %v2091_v18, %v2055_v35  ;;  %v2040_v62 = vmul.f32 %v4682_v49, %v3684_v56  ;;  %v1809_v40 = vmul.f32 %v4634_v28, %v3669_v51 }
 0x502   : > { %v4715_v32 = vmul.f32 0.16666667, %v2283_v50  ;;  %v2252_v16 = vmax.f32 %v2236_v61, 0.0  ;;  %v2221_v38 = vadd.f32 %v2204_v60, %v3707_v21  ;;  %v1842_v20 = vmul.f32 %v4637_v17, %v3672_v52  ;;  %v4743_v50 = vld [vmem:[%s4372_s23 + $0xb2] sm:$0xff] }
 0x503   : > { %v1958_v45 = vadd.f32 %v1942_v10, %v1906_v30  ;;  %v2156_v43 = vadd.f32 %v2140_v44, %v2107_v33  ;;  %v1891_v41 = vmul.f32 %v3026_v0, %v3675_v53  ;;  %v2092_v19 = vmul.f32 %v4727_v24, %v3687_v57 }
 0x504   : > { %v2316_v29 = vpack.c.bf16 %v4715_v32, %v4715_v32  ;;  %v2268_v48 = vmin.f32 %v2252_v16, 6.0  ;;  %v2237_v31 = vadd.f32 3.0, %v2221_v38  ;;  %v2356_v26 = vadd.f32 %v2355_v13, %v4641_v1 }
 0x505   : > { %v2007_v28 = vadd.f32 %v1991_v25, %v1958_v45  ;;  %v2205_v17 = vadd.f32 %v2189_v46, %v2156_v43  ;;  %v1858_v18 = vadd.f32 %v1842_v20, %v1809_v40  ;;  %v1943_v47 = vmul.f32 %v4690_v23, %v3678_v54 }
 0x506   : > { %2337 = vst.msk [vmem:[%s4549_s2 + $0x1c] sm:$0xf] %vm1068_vm4, %v2316_v29  ;;  %v2284_v63 = vmul.f32 %v2268_v48, %v2220_v2  ;;  %v2253_v14 = vmax.f32 %v2237_v31, 0.0  ;;  %v2141_v10 = vmul.f32 %v4736_v36, %v3690_v58  ;;  %v2190_v1 = vmul.f32 %v4743_v50, %v3693_v59  ;;  %v2998_v29 = vld [vmem:[%s4372_s23 + $0xc0] sm:$0xff] }
 0x507   : > { %v2056_v0 = vadd.f32 %v2040_v62, %v2007_v28  ;;  %v2222_v35 = vadd.f32 %v2205_v17, %v3707_v21  ;;  %v1907_v13 = vadd.f32 %v1891_v41, %v1858_v18  ;;  %v1992_v44 = vmul.f32 %v4702_v22, %v3681_v55  ;;  %v3014_v28 = vld [vmem:[%s4372_s23 + $0xc1] sm:$0xff] }
 0x508   : > { %v4750_v46 = vmul.f32 0.16666667, %v2284_v63  ;;  %v2269_v2 = vmin.f32 %v2253_v14, 6.0  ;;  %v2041_v60 = vmul.f32 %v4705_v15, %v3684_v56  ;;  %v1810_v33 = vmul.f32 %v4663_v42, %v3669_v51  ;;  %v3030_v14 = vld [vmem:[%s4372_s23 + $0xc2] sm:$0xff] }
 0x509   : > { %v2108_v61 = vadd.f32 %v2092_v19, %v2056_v0  ;;  %v2238_v30 = vadd.f32 3.0, %v2222_v35  ;;  %v1959_v25 = vadd.f32 %v1943_v47, %v1907_v13  ;;  %v1843_v62 = vmul.f32 %v4673_v37, %v3672_v52 }
 0x50a   : > { %v2357_v40 = vsel %vm99_vm0, %v4667_v34, 0.0  ;;  %v2317_v16 = vpack.c.bf16 %v4750_v46, %v4750_v46  ;;  %v2285_v45 = vmul.f32 %v2269_v2, %v2221_v38  ;;  %v2093_v48 = vmul.f32 %v2998_v29, %v3687_v57 }
 0x50b   : > { %v2157_v20 = vadd.f32 %v2141_v10, %v2108_v61  ;;  %v2254_v43 = vmax.f32 %v2238_v30, 0.0  ;;  %v2008_v41 = vadd.f32 %v1992_v44, %v1959_v25  ;;  %v1859_v31 = vadd.f32 %v1843_v62, %v1810_v33 }
 0x50c   : > { %2338 = vst.msk [vmem:[%s4549_s2 + $0x20] sm:$0xf] %vm1068_vm4, %v2317_v16  ;;  %v4766_v42 = vmul.f32 0.16666667, %v2285_v45  ;;  %v1892_v34 = vmul.f32 %v4682_v49, %v3675_v53  ;;  %v1944_v38 = vmul.f32 %v4727_v24, %v3678_v54  ;;  %v2142_v18 = vmul.f32 %v3014_v28, %v3690_v58 }
 0x50d   : > { %v2206_v37 = vadd.f32 %v2190_v1, %v2157_v20  ;;  %v2270_v19 = vmin.f32 %v2254_v43, 6.0  ;;  %v2057_v17 = vadd.f32 %v2041_v60, %v2008_v41  ;;  %v1993_v10 = vmul.f32 %v4736_v36, %v3681_v55  ;;  %v3015_v41 = vld [vmem:[%s4372_s23 + $0xc9] sm:$0xff] }
 0x50e   : > { %v2318_v47 = vpack.c.bf16 %v4766_v42, %v4766_v42  ;;  %v1908_v0 = vadd.f32 %v1892_v34, %v1859_v31  ;;  %v2358_v1 = vadd.f32 %v2357_v40, %v2356_v26  ;;  %v2191_v44 = vmul.f32 %v3030_v14, %v3693_v59  ;;  %v2999_v26 = vld [vmem:[%s4372_s23 + $0xc8] sm:$0xff] }
 0x50f   : > { %v2223_v63 = vadd.f32 %v2206_v37, %v3707_v21  ;;  %v2286_v49 = vmul.f32 %v2270_v19, %v2222_v35  ;;  %v2109_v13 = vadd.f32 %v2093_v48, %v2057_v17  ;;  %v2359_v2 = vsel %vm99_vm0, %v4715_v32, 0.0 }
 0x510   : > { %2339 = vst.msk [vmem:[%s4549_s2 + $0x24] sm:$0xf] %vm1068_vm4, %v2318_v47  ;;  %v1960_v60 = vadd.f32 %v1944_v38, %v1908_v0  ;;  %v2042_v30 = vmul.f32 %v4743_v50, %v3684_v56  ;;  %v1811_v35 = vmul.f32 %v4690_v23, %v3669_v51  ;;  %v1844_v32 = vmul.f32 %v4702_v22, %v3672_v52  ;;  %v3031_v38 = vld [vmem:[%s4372_s23 + $0xca] sm:$0xff] }
 0x511   : > { %v2239_v61 = vadd.f32 3.0, %v2223_v63  ;;  %v4787_v25 = vmul.f32 0.16666667, %v2286_v49  ;;  %v2158_v33 = vadd.f32 %v2142_v18, %v2109_v13  ;;  %v2094_v16 = vmul.f32 %v2999_v26, %v3687_v57 }
 0x512   : > { %v2009_v40 = vadd.f32 %v1993_v10, %v1960_v60  ;;  %v1893_v45 = vmul.f32 %v4705_v15, %v3675_v53  ;;  %v1860_v48 = vadd.f32 %v1844_v32, %v1811_v35  ;;  %v1945_v23 = vmul.f32 %v2998_v29, %v3678_v54  ;;  %v3000_v10 = vld [vmem:[%s4372_s23 + $0xd8] sm:$0xff] }
 0x513   : > { %v2255_v62 = vmax.f32 %v2239_v61, 0.0  ;;  %v2319_v20 = vpack.c.bf16 %v4787_v25, %v4787_v25  ;;  %v2207_v43 = vadd.f32 %v2191_v44, %v2158_v33  ;;  %v2143_v22 = vmul.f32 %v3015_v41, %v3690_v58 }
 0x514   : > { %v2058_v37 = vadd.f32 %v2042_v30, %v2009_v40  ;;  %v1909_v15 = vadd.f32 %v1893_v45, %v1860_v48  ;;  %v1994_v19 = vmul.f32 %v3014_v28, %v3681_v55  ;;  %v2360_v17 = vadd.f32 %v2359_v2, %v2358_v1  ;;  %v3016_v28 = vld [vmem:[%s4372_s23 + $0xd9] sm:$0xff] }
 0x515   : > { %v2271_v31 = vmin.f32 %v2255_v62, 6.0  ;;  %2340 = vst.msk [vmem:[%s4549_s2 + $0x28] sm:$0xf] %vm1068_vm4, %v2319_v20  ;;  %v2224_v34 = vadd.f32 %v2207_v43, %v3707_v21  ;;  %v2192_v0 = vmul.f32 %v3031_v38, %v3693_v59  ;;  %v2043_v13 = vmul.f32 %v3030_v14, %v3684_v56 }
 0x516   : > { %v2110_v47 = vadd.f32 %v2094_v16, %v2058_v37  ;;  %v1961_v49 = vadd.f32 %v1945_v23, %v1909_v15  ;;  %v1812_v44 = vmul.f32 %v4727_v24, %v3669_v51  ;;  %v2361_v61 = vsel %vm99_vm0, %v4750_v46, 0.0  ;;  %v3032_v24 = vld [vmem:[%s4372_s23 + $0xda] sm:$0xff] }
 0x517   : > { %v2287_v18 = vmul.f32 %v2271_v31, %v2223_v63  ;;  %v2240_v29 = vadd.f32 3.0, %v2224_v34  ;;  %v1845_v63 = vmul.f32 %v4736_v36, %v3672_v52  ;;  %v2095_v33 = vmul.f32 %v3000_v10, %v3687_v57  ;;  %v3001_v37 = vld [vmem:[%s4372_s23 + $0xe0] sm:$0xff] }
 0x518   : > { %v2159_v30 = vadd.f32 %v2143_v22, %v2110_v47  ;;  %v2010_v2 = vadd.f32 %v1994_v19, %v1961_v49  ;;  %v1894_v14 = vmul.f32 %v4743_v50, %v3675_v53  ;;  %v1946_v46 = vmul.f32 %v2999_v26, %v3678_v54  ;;  %v3017_v47 = vld [vmem:[%s4372_s23 + $0xe1] sm:$0xff] }
 0x519   : > { %v2303_v60 = vmul.f32 0.16666667, %v2287_v18  ;;  %v2256_v1 = vmax.f32 %v2240_v29, 0.0  ;;  %v1861_v62 = vadd.f32 %v1845_v63, %v1812_v44  ;;  %v2362_v40 = vadd.f32 %v2361_v61, %v2360_v17 }
 0x51a   : > { %v2208_v32 = vadd.f32 %v2192_v0, %v2159_v30  ;;  %v2059_v45 = vadd.f32 %v2043_v13, %v2010_v2  ;;  %v2144_v20 = vmul.f32 %v3016_v28, %v3690_v58  ;;  %v2363_v36 = vsel %vm99_vm0, %v4766_v42, 0.0  ;;  %v3033_v13 = vld [vmem:[%s4372_s23 + $0xe2] sm:$0xff] }
 0x51b   : > { %v2320_v35 = vpack.c.bf16 %v2303_v60, %v2303_v60  ;;  %v2272_v16 = vmin.f32 %v2256_v1, 6.0  ;;  %v1910_v43 = vadd.f32 %v1894_v14, %v1861_v62  ;;  %v1995_v48 = vmul.f32 %v3015_v41, %v3681_v55 }
 0x51c   : > { %v2225_v50 = vadd.f32 %v2208_v32, %v3707_v21  ;;  %v2111_v31 = vadd.f32 %v2095_v33, %v2059_v45  ;;  %v2193_v26 = vmul.f32 %v3032_v24, %v3693_v59  ;;  %v2044_v19 = vmul.f32 %v3031_v38, %v3684_v56 }
 0x51d   : > { %2341 = vst.msk [vmem:[%s4549_s2 + $0x2c] sm:$0xf] %vm1068_vm4, %v2320_v35  ;;  %v2288_v23 = vmul.f32 %v2272_v16, %v2224_v34  ;;  %v1962_v15 = vadd.f32 %v1946_v46, %v1910_v43  ;;  %v2364_v17 = vadd.f32 %v2363_v36, %v2362_v40  ;;  %v2365_v0 = vsel %vm99_vm0, %v4787_v25, 0.0 }
 0x51e   : > { %v2241_v22 = vadd.f32 3.0, %v2225_v50  ;;  %v2160_v18 = vadd.f32 %v2144_v20, %v2111_v31  ;;  %v2096_v34 = vmul.f32 %v3001_v37, %v3687_v57  ;;  %v2145_v30 = vmul.f32 %v3017_v47, %v3690_v58 }
 0x51f   : > { %v2304_v42 = vmul.f32 0.16666667, %v2288_v23  ;;  %v2011_v41 = vadd.f32 %v1995_v48, %v1962_v15  ;;  %v2366_v38 = vadd.f32 %v2365_v0, %v2364_v17  ;;  %v2367_v63 = vsel %vm99_vm0, %v2303_v60, 0.0 }
 0x520   : > { %v2257_v10 = vmax.f32 %v2241_v22, 0.0  ;;  %v2209_v49 = vadd.f32 %v2193_v26, %v2160_v18  ;;  %v2194_v2 = vmul.f32 %v3033_v13, %v3693_v59  ;;  %v4961_v13 = vld [vmem:[#allocation15_spill] sm:$0xff] (%p1772_p1)  ;;  %v4962_v59 = vld [vmem:[#allocation16_spill] sm:$0xff] (%p1772_p1) }
 0x521   : > { %v2321_v29 = vpack.c.bf16 %v2304_v42, %v2304_v42  ;;  %v2060_v61 = vadd.f32 %v2044_v19, %v2011_v41  ;;  %v2368_v32 = vadd.f32 %v2367_v63, %v2366_v38  ;;  %v2369_v62 = vsel %vm99_vm0, %v2304_v42, 0.0  ;;  %2403 = vmatpush.msra.mxu3 (%p1772_p1), %v4961_v13 }
 0x522   : > { %v2273_v44 = vmin.f32 %v2257_v10, 6.0  ;;  %v2226_v28 = vadd.f32 %v2209_v49, %v3707_v21 }
 0x523   : > { %2342 = vst.msk [vmem:[%s4549_s2 + $0x30] sm:$0xf] %vm1068_vm4, %v2321_v29  ;;  %v2112_v1 = vadd.f32 %v2096_v34, %v2060_v61  ;;  %v2370_v60 = vadd.f32 %v2369_v62, %v2368_v32 }
 0x524   : > { %v2289_v25 = vmul.f32 %v2273_v44, %v2225_v50  ;;  %v2242_v33 = vadd.f32 3.0, %v2226_v28 }
 0x525   : > { %v2161_v35 = vadd.f32 %v2145_v30, %v2112_v1 }
 0x526   : > { %v2305_v14 = vmul.f32 0.16666667, %v2289_v25  ;;  %v2258_v24 = vmax.f32 %v2242_v33, 0.0 }
 0x527   : > { %v2210_v40 = vadd.f32 %v2194_v2, %v2161_v35 }
 0x528   : > { %v2322_v46 = vpack.c.bf16 %v2305_v14, %v2305_v14  ;;  %v2274_v16 = vmin.f32 %v2258_v24, 6.0  ;;  %v2371_v36 = vsel %vm99_vm0, %v2305_v14, 0.0 }
 0x529   : > { %v2227_v45 = vadd.f32 %v2210_v40, %v3707_v21  ;;  %v2372_v23 = vadd.f32 %v2371_v36, %v2370_v60 }
 0x52a   : > { %2343 = vst.msk [vmem:[%s4549_s2 + $0x34] sm:$0xf] %vm1068_vm4, %v2322_v46  ;;  %v2290_v20 = vmul.f32 %v2274_v16, %v2226_v28 }
 0x52b   : > { %v2243_v50 = vadd.f32 3.0, %v2227_v45 }
 0x52c   : > { %v2306_v43 = vmul.f32 0.16666667, %v2290_v20 }
 0x52d   : > { %v2259_v48 = vmax.f32 %v2243_v50, 0.0 }
 0x52e   : > { %v2323_v31 = vpack.c.bf16 %v2306_v43, %v2306_v43  ;;  %v2373_v26 = vsel %vm99_vm0, %v2306_v43, 0.0 }
 0x52f   : > { %v2275_v37 = vmin.f32 %v2259_v48, 6.0  ;;  %v2374_v15 = vadd.f32 %v2373_v26, %v2372_v23 }
 0x530   : > { %2344 = vst.msk [vmem:[%s4549_s2 + $0x38] sm:$0xf] %vm1068_vm4, %v2323_v31 }
 0x531   : > { %v2291_v22 = vmul.f32 %v2275_v37, %v2227_v45  ;;  %v4963_v45 = vld [vmem:[#allocation20_spill] sm:$0xff] (%p1772_p1) }
 0x532   :  { %v4964_v60 = vrot.slane (%p1772_p1), %v4963_v45, 3 }
 0x533   : > { %v2307_v19 = vmul.f32 0.16666667, %v2291_v22 }
 0x535   : > { %v2324_v17 = vpack.c.bf16 %v2307_v19, %v2307_v19  ;;  %v2375_v42 = vsel %vm99_vm0, %v2307_v19, 0.0 }
 0x536   : > { %v2376_v18 = vadd.f32 %v2375_v42, %v2374_v15 }
 0x537   : > { %2345 = vst.msk [vmem:[%s4549_s2 + $0x3c] sm:$0xf] %vm1068_vm4, %v2324_v17 }
 0x538   : > { %v2377_v47 = vrot.slane %v2376_v18, 4 }
 0x53a   : > { %v2378_v0 = vadd.f32 %v2377_v47, %v2376_v18  ;;  %v4965_v47 = vld [vmem:[#allocation17_spill] sm:$0xff] (%p1772_p1) }
 0x53c   : > { %v2379_v10 = vrot.slane %v2378_v0, 2 }
 0x53e   : > { %v2380_v41 = vadd.f32 %v2379_v10, %v2378_v0  ;;  %v3133_v9 = vld [vmem:[#allocation3 + $0x38] sm:$0xff] (%p1772_p1)  ;;  %v3132_v6 = vld [vmem:[#allocation3 + $0x30] sm:$0xff] (%p1772_p1)  ;;  %v3131_v3 = vld [vmem:[#allocation3 + $0x28] sm:$0xff] (%p1772_p1)  ;;  %v4966_v0 = vunpack.c.l.bf16 (%p1772_p1), %v4965_v47 }
 0x53f   :  { %v3141_v12 = vld [vmem:[#allocation3 + $0x78] sm:$0xff] (%p1772_p1)  ;;  %v2592_v8 = vsel (%p1772_p1), %vm99_vm0, %v3133_v9, 0  ;;  %v3140_v7 = vld [vmem:[#allocation3 + $0x70] sm:$0xff] (%p1772_p1)  ;;  %v2589_v5 = vsel (%p1772_p1), %vm99_vm0, %v3132_v6, 0  ;;  %v3139_v51 = vld [vmem:[#allocation3 + $0x68] sm:$0xff] (%p1772_p1)  ;;  %v2586_v52 = vsel (%p1772_p1), %vm99_vm0, %v3131_v3, 0 }
 0x540   : > { %v2381_v34 = vrot.slane %v2380_v41, 1  ;;  %v2616_v11 = vsel (%p1772_p1), %vm99_vm0, %v3141_v12, 0  ;;  %2618 = vmatpush.bf16.xpose.msrb.mxu3 (%p1772_p1), %v2592_v8  ;;  %v2613_v4 = vsel (%p1772_p1), %vm99_vm0, %v3140_v7, 0  ;;  %v2610_v53 = vsel (%p1772_p1), %vm99_vm0, %v3139_v51, 0  ;;  %v3130_v54 = vld [vmem:[#allocation3 + $0x20] sm:$0xff] (%p1772_p1)  ;;  %v3129_v61 = vld [vmem:[#allocation3 + $0x18] sm:$0xff] (%p1772_p1) }
 0x541   :  { %2632 = vmatpush.bf16.xpose.msra.mxu2 (%p1772_p1), %v2616_v11  ;;  %v3138_v55 = vld [vmem:[#allocation3 + $0x60] sm:$0xff] (%p1772_p1)  ;;  %v2583_v56 = vsel (%p1772_p1), %vm99_vm0, %v3130_v54, 0  ;;  %v3137_v30 = vld [vmem:[#allocation3 + $0x58] sm:$0xff] (%p1772_p1)  ;;  %v2580_v38 = vsel (%p1772_p1), %vm99_vm0, %v3129_v61, 0  ;;  %v3128_v63 = vld [vmem:[#allocation3 + $0x10] sm:$0xff] (%p1772_p1) }
 0x542   : > { %v2382_v29 = vadd.f32 %v2381_v34, %v2380_v41  ;;  %1774 = sbr.rel (!%p1772_p1) target bundleno = 1210 (0x4ba), region = 101  ;;  %v2607_v57 = vsel (%p1772_p1), %vm99_vm0, %v3138_v55, 0  ;;  %v2604_v28 = vsel (%p1772_p1), %vm99_vm0, %v3137_v30, 0  ;;  %v3136_v25 = vld [vmem:[#allocation3 + $0x50] sm:$0xff] (%p1772_p1)  ;;  %v2577_v1 = vsel (%p1772_p1), %vm99_vm0, %v3128_v63, 0  ;;  %v3127_v33 = vld [vmem:[#allocation3 + $0x8] sm:$0xff] (%p1772_p1) }
 0x543   :  { %v2601_v2 = vsel (%p1772_p1), %vm99_vm0, %v3136_v25, 0  ;;  %v3135_v14 = vld [vmem:[#allocation3 + $0x48] sm:$0xff] (%p1772_p1)  ;;  %v2574_v35 = vsel (%p1772_p1), %vm99_vm0, %v3127_v33, 0  ;;  %v3126_v24 = vld [vmem:[#allocation3] sm:$0xff] (%p1772_p1)  ;;  %v4967_v41 = vunpack.c.h.bf16 (%p1772_p1), %v4965_v47  ;;  %v3106_v9 = vld [vmem:[%s4916_s0 + $0x28] sm:$0xff] (%p1772_p1) }
 0x544   : > { %v2383_v49 = vadd.f32 %v3330_v39, %v2382_v29   ;;  %v2598_v32 = vsel (%p1772_p1), %vm99_vm0, %v3135_v14, 0  ;;  %v3134_v62 = vld [vmem:[#allocation3 + $0x40] sm:$0xff] (%p1772_p1)  ;;  %v2571_v46 = vsel (%p1772_p1), %vm99_vm0, %v3126_v24, 0  ;;  %v3108_v3 = vld [vmem:[%s4916_s0 + $0x38] sm:$0xff] (%p1772_p1) }
 0x545   :  { %v2595_v40 = vsel (%p1772_p1), %vm99_vm0, %v3134_v62, 0 }
 0x546   : > { %v4960_v39 = vmov %v2383_v49 }
 0x547   :  { %v2384_v39 = vmul.f32 0.00390625, %v2383_v49 }
 0x548   :  { %2619 = vmatpush.bf16.xpose.msrb.mxu3 %v2589_v5  ;;  %v3107_v5 = vld [vmem:[%s4916_s0 + $0x30] sm:$0xff] }
 0x549   :  { %3036 = vmatmul.msk.f32.vlgmr.msra.gmra.mxu3 %vm99_vm0, %v2384_v39  ;;  %2633 = vmatpush.bf16.xpose.msra.mxu2 %v2613_v4  ;;  %v3105_v39 = vld [vmem:[%s4916_s0 + $0x20] sm:$0xff] }
 0x550   :  { %2620 = vmatpush.bf16.xpose.msrb.mxu3 %v2586_v52 }
 0x551   :  { %2634 = vmatpush.bf16.xpose.msra.mxu2 %v2610_v53 }
 0x558   :  { %2621 = vmatpush.bf16.xpose.msrb.mxu3 %v2583_v56 }
 0x559   :  { %2635 = vmatpush.bf16.xpose.msra.mxu2 %v2607_v57 }
 0x560   :  { %2622 = vmatpush.bf16.xpose.msrb.mxu3 %v2580_v38 }
 0x561   :  { %2636 = vmatpush.bf16.xpose.msra.mxu2 %v2604_v28 }
 0x568   :  { %2623 = vmatpush.bf16.xpose.msrb.mxu3 %v2577_v1 }
 0x569   :  { %2637 = vmatpush.bf16.xpose.msra.mxu2 %v2601_v2 }
 0x570   :  { %2624 = vmatpush.bf16.xpose.msrb.mxu3 %v2574_v35 }
 0x571   :  { %2638 = vmatpush.bf16.xpose.msra.mxu2 %v2598_v32 }
 0x578   :  { %2625 = vmatpush.bf16.xpose.msrb.mxu3 %v2571_v46 }
 0x579   :  { %2639 = vmatpush.bf16.xpose.msra.mxu2 %v2595_v40 }
 0x5cc   :  { %v2405_v58 = vpop.f32.mrf.mxu3 }
 0x5cd   :  { %v2406_v21 = vadd.f32 %v2405_v58, %v4962_v59 }
 0x5cf   :  { %v2408_v44 = vmax.f32 %v2406_v21, 0.0 }
 0x5d1   :  { %3037 = vmatmul.msk.f32.vlgmr.msrb.gmra.mxu2 %vm179_vm3, %v2408_v44 }
 0x654   :  { %v2429_v16 = vpop.f32.mrf.mxu2 }
 0x655   :  { %v2430_v20 = vadd.f32 %v2429_v16, %v4964_v60 }
 0x657   :  { %v3038_v36 = vmul.f32 -1.442695, %v2430_v20 }
 0x659   :  { %3198 = vpow2.f32 %v3038_v36 }
 0x65f   :  { %v3199_v50 = vpop.eup %3198 }
 0x660   :  { %v2435_v43 = vadd.f32 1.0, %v3199_v50 }
 0x662   :  { %3200 = vrcp.f32 %v2435_v43  ;;  %v2447_v26 = vand.u32 2147483648, %v2435_v43  ;;  %v2445_v22 = vand.u32 2147483647, %v2435_v43  ;;  %vm2441_vm10 = vweird.f32 %v2435_v43 }
 0x664   :  { %v2448_v19 = vor.u32 1.1754944e-38, %v2447_v26  ;;  %vm2446_vm12 = vcmp.eq.f32.partialorder %v2445_v22, 8.507059e+37 }
 0x668   :  { %v3201_v48 = vpop.eup %3200 }
 0x669   :  { %v2437_v23 = vmul.f32 %v3201_v48, %v2435_v43  ;;  %vm2442_vm9 = vweird.f32 %v3201_v48 }
 0x66a   :  { %vm2443_vm11 = vmor %vm2441_vm10, %vm2442_vm9 }
 0x66b   :  { %v2438_v31 = vsub.f32 1.0, %v2437_v23 }
 0x66d   :  { %v2439_v37 = vmul.f32 %v3201_v48, %v2438_v31 }
 0x66f   :  { %v2440_v15 = vadd.f32 %v3201_v48, %v2439_v37 }
 0x671   :  { %v2444_v17 = vsel %vm2443_vm11, %v3201_v48, %v2440_v15 }
 0x672   :  { %v2449_v42 = vsel %vm2446_vm12, %v2448_v19, %v2444_v17 }
 0x673   :  { %v2451_v18 = vperm.slane %v2449_v42, 0 }
 0x675   :  { %v2452_v10 = vmul.f32 %v4966_v0, %v2451_v18  ;;  %v2453_v34 = vmul.f32 %v4967_v41, %v2451_v18 }
 0x677   :  { %v2454_v29 = vpack.c.bf16 %v2453_v34, %v2452_v10 }
 0x679   :  { %3103 = vmatmul.msk.bf16.vlgmr.msrb.gmra.mxu3 %vm99_vm0, %v2454_v29  ;;  %3104 = vmatmul.msk.bf16.vlgmr.msra.gmra.mxu2 %vm99_vm0, %v2454_v29 }
 0x6fc   :  { %v2627_v49 = vpop.f32.mrf.mxu3  ;;  %v2641_v13 = vpop.f32.mrf.mxu2 }
 0x6fd   :  { %v2628_v12 = vadd.f32 %v2627_v49, %v4312_v27  ;;  %v2642_v8 = vadd.f32 %v2641_v13, %v4312_v27  ;;  %v4968_v27 = vld [vmem:[#allocation14_spill] sm:$0xff] }
 0x6ff   :  { %v2650_v11 = vadd.f32 %v3105_v39, %v2628_v12  ;;  %v2651_v6 = vadd.f32 %v3106_v9, %v2642_v8 }
 0x701   :  { %2655 = vst [vmem:[#allocation10 + $0x20] sm:$0xff] %v2650_v11 }
 0x702   :  { %2656 = vst [vmem:[#allocation10 + $0x28] sm:$0xff] %v2651_v6 }
 0x704   :  { %v2629_v7 = vpop.f32.mrf.mxu3  ;;  %v2643_v4 = vpop.f32.mrf.mxu2 }
 0x705   :  { %v2630_v51 = vadd.f32 %v2629_v7, %v4968_v27  ;;  %v2644_v52 = vadd.f32 %v2643_v4, %v4968_v27 }
 0x707   :  { %v2652_v53 = vadd.f32 %v3107_v5, %v2630_v51  ;;  %v2653_v54 = vadd.f32 %v3108_v3, %v2644_v52 }
 0x709   :  { %2657 = vst [vmem:[#allocation10 + $0x30] sm:$0xff] %v2652_v53 }
 0x70a   :  { %2658 = vst [vmem:[#allocation10 + $0x38] sm:$0xff] %v2653_v54 }
 0x70b   :  { %2671 = dma.vmem_to_hbm [thread:$0]  %s2664_s14, 1024, %s2666_s17, [#allocation6], %s3346_s18, %s3346_s18, %s3347_s5  }
 0x70c   :  { %3318 = dma.done.wait [#allocation6], 1024  }
 0x70d   :  { %3319 = vsyncadd [#allocation6], 4294966272 }
 0x70e   :  { %2676 = vsyncpa [#allocation5], 1 }
 0x70f   :  { %2677 = vsyncpa [#allocation8], 1 }
 0x710   :  { %2678 = vsyncpa [#allocation6], 1 }

</bundles_post_ra>
